<compile_context>
chip_gen: v6e
topology: v6e:2x2x1
jax: 0.10.0
libtpu: 0.0.40
codegen_flags: <defaults>
</compile_context>

<pallas_src>
import functools
import math

import jax
import jax.numpy as jnp
from jax.experimental import pallas as pl
from jax.experimental.pallas import tpu as pltpu


def _nbytes(a):
    return int(a.size) * int(jnp.dtype(a.dtype).itemsize)


def _vmem_limit_bytes(block_bytes, scratch_bytes=0):
    """Resident-set-derived VMEM budget: 2x (double-buffered pipeline blocks)
    + scratch + headroom, clamped to [16 MiB, 64 MiB] (64 MiB = v7x physical)."""
    est = 2 * int(block_bytes) + int(scratch_bytes)
    est = int(est * 1.5) + (2 << 20)
    return int(min(max(est, 16 << 20), 64 << 20))


# ----------------------------------------------------------------------------
# K1: per-image 3x3 conv (9 shifted matmuls, no im2col) + BN stats partials
# ----------------------------------------------------------------------------

def _conv_stats_kernel(xp_ref, w_ref, b_ref, y_ref, sum_ref, sq_ref):
    f32 = jnp.float32
    Hp, Wp, Cs = xp_ref.shape
    Hs, Ws = Hp - 2, Wp - 2
    Ls = Hs * Ws

    acc = jnp.zeros((Ls, Cs), f32)
    for t in range(9):                       # 9 taps, statically unrolled
        kh, kw = divmod(t, 3)
        xs = xp_ref[kh:kh + Hs, kw:kw + Ws, :].reshape(Ls, Cs)
        acc = acc + jnp.dot(xs, w_ref[t], preferred_element_type=f32)
    y = acc + b_ref[...]                     # (Ls, Cs) f32

    y_ref[...] = y.astype(y_ref.dtype)       # bf16 writeback (halves HBM traffic)
    sum_ref[...] = jnp.sum(y, axis=0, keepdims=True)       # f32 partials
    sq_ref[...] = jnp.sum(y * y, axis=0, keepdims=True)


def pallas_conv_stats(xp, w_taps, b):
    """xp: (N, Hs+2, Ws+2, Cs) bf16 (halo-padded NHWC), w_taps: (9, Cs, Cs) bf16,
    b: (1, Cs) f32.  Returns (conv_y (N, Ls, Cs) bf16, per-image channel sum
    (N, 1, Cs) f32, per-image channel sum-of-squares (N, 1, Cs) f32)."""
    N, Hp, Wp, Cs = xp.shape
    Hs, Ws = Hp - 2, Wp - 2
    Ls = Hs * Ws

    block_bytes = (_nbytes(xp) // N + _nbytes(w_taps) + _nbytes(b)
                   + Ls * Cs * 2 + 2 * Cs * 4)
    cost = pl.CostEstimate(
        flops=2 * N * Ls * 9 * Cs * Cs,
        transcendentals=0,
        bytes_accessed=_nbytes(xp) + _nbytes(w_taps) + _nbytes(b)
        + N * Ls * Cs * 2 + 2 * N * Cs * 4)

    return pl.pallas_call(
        _conv_stats_kernel,
        out_shape=(jax.ShapeDtypeStruct((N, Ls, Cs), jnp.bfloat16),
                   jax.ShapeDtypeStruct((N, 1, Cs), jnp.float32),
                   jax.ShapeDtypeStruct((N, 1, Cs), jnp.float32)),
        grid=(N,),
        in_specs=[
            pl.BlockSpec((None, Hp, Wp, Cs), lambda n: (n, 0, 0, 0)),
            pl.BlockSpec((9, Cs, Cs), lambda n: (0, 0, 0)),
            pl.BlockSpec((1, Cs), lambda n: (0, 0)),
        ],
        out_specs=(
            pl.BlockSpec((None, Ls, Cs), lambda n: (n, 0, 0)),
            pl.BlockSpec((None, 1, Cs), lambda n: (n, 0, 0)),
            pl.BlockSpec((None, 1, Cs), lambda n: (n, 0, 0)),
        ),
        compiler_params=pltpu.CompilerParams(
            dimension_semantics=("parallel",),
            vmem_limit_bytes=_vmem_limit_bytes(block_bytes)),
        cost_estimate=cost,
    )(xp, w_taps, b)


# ----------------------------------------------------------------------------
# K3: fused BN/ReLU/pos + query path + K/V proj + MHA + wo + LayerNorm + FFN
# ----------------------------------------------------------------------------

def _fused_pipeline_kernel(conv_ref, sum_ref, sq_ref, g_ref, bt_ref, pos_ref,
                           emb_ref, w1q_ref, b1q_ref, wq_ref, bq_ref,
                           wk_ref, bk_ref, wv_ref, bv_ref, wo_ref, bo_ref,
                           lng_ref, lnb_ref, fw1_ref, fb1_ref, fw2_ref, fb2_ref,
                           out_ref, ctx_ref, *, num_heads, scale, total_tokens):
    f32, bf16 = jnp.float32, jnp.bfloat16

    # ---- BatchNorm (global batch stats) + ReLU + pos_embed ------------------
    inv_n = 1.0 / float(total_tokens)
    mean = sum_ref[...] * inv_n                             # (1, Cs)
    var = jnp.maximum(sq_ref[...] * inv_n - mean * mean, 0.0)
    inv_std = jax.lax.rsqrt(var + 1e-5)
    s = (conv_ref[...].astype(f32) - mean) * (inv_std * g_ref[...]) + bt_ref[...]
    s = jnp.maximum(s, 0.0) + pos_ref[...]                  # (Ls, Cs) f32
    s_bf = s.astype(bf16)

    # ---- query path (1x1 conv + ReLU + q-proj), recomputed per image (tiny) --
    q = jnp.dot(emb_ref[...], w1q_ref[...], preferred_element_type=f32) + b1q_ref[...]
    q = jnp.maximum(q, 0.0)
    q = jnp.dot(q.astype(bf16), wq_ref[...], preferred_element_type=f32) + bq_ref[...]
    q_bf = q.astype(bf16)                                   # (Lq, Ct)

    # ---- full-width K/V projections (single MXU-wide matmuls) ----------------
    k_all = (jnp.dot(s_bf, wk_ref[...], preferred_element_type=f32)
             + bk_ref[...]).astype(bf16)                    # (Ls, Ct)
    v_all = (jnp.dot(s_bf, wv_ref[...], preferred_element_type=f32)
             + bv_ref[...]).astype(bf16)                    # (Ls, Ct)

    # ---- per-head scores / softmax / context into a VMEM scratch -------------
    Ct = wo_ref.shape[0]
    hd = Ct // num_heads
    for h in range(num_heads):
        lo = h * hd
        qh = q_bf[:, lo:lo + hd]                            # (Lq, hd)
        kh = k_all[:, lo:lo + hd]                           # (Ls, hd)
        vh = v_all[:, lo:lo + hd]                           # (Ls, hd)
        sc = jax.lax.dot_general(qh, kh, (((1,), (1,)), ((), ())),
                                 preferred_element_type=f32) * scale   # (Lq, Ls)
        m = jnp.max(sc, axis=-1, keepdims=True)
        p = jnp.exp(sc - m)
        p = p * pl.reciprocal(jnp.sum(p, axis=-1, keepdims=True), approx=True)
        oh = jnp.dot(p.astype(bf16), vh, preferred_element_type=f32)   # (Lq, hd)
        ctx_ref[:, lo:lo + hd] = oh.astype(bf16)

    # ---- single full-width output projection ---------------------------------
    fea = jnp.dot(ctx_ref[...], wo_ref[...], preferred_element_type=f32) + bo_ref[...]

    # ---- LayerNorm ------------------------------------------------------------
    mu = jnp.mean(fea, axis=-1, keepdims=True)
    va = jnp.mean((fea - mu) ** 2, axis=-1, keepdims=True)
    normed = (fea - mu) * jax.lax.rsqrt(va + 1e-5) * lng_ref[...] + lnb_ref[...]

    # ---- FFN (fc1 -> ReLU -> fc2, residual on the normed input) --------------
    h1 = jnp.dot(normed.astype(bf16), fw1_ref[...],
                 preferred_element_type=f32) + fb1_ref[...]
    h1 = jnp.maximum(h1, 0.0)
    y = jnp.dot(h1.astype(bf16), fw2_ref[...],
                preferred_element_type=f32) + fb2_ref[...]
    out_ref[...] = normed + y


def pallas_fused_pipeline(conv_tok, ch_sum, ch_sq, bn_g, bn_b, pos_tok,
                          query_emb, w1q, b1q, wq, bq, wk, bk, wv, bv, wo, bo,
                          ln_g, ln_b, fw1, fb1, fw2, fb2, *,
                          num_heads, scale, total_tokens):
    N, Ls, Cs = conv_tok.shape
    Lq, Ct = query_emb.shape
    Ch = fw1.shape[1]
    c2 = lambda n: (0, 0)

    const_ins = (ch_sum, ch_sq, bn_g, bn_b, pos_tok, query_emb, w1q, b1q, wq,
                 bq, wk, bk, wv, bv, wo, bo, ln_g, ln_b, fw1, fb1, fw2, fb2)
    const_bytes = sum(_nbytes(a) for a in const_ins)
    block_bytes = _nbytes(conv_tok) // N + const_bytes + Lq * Ct * 4
    scratch_bytes = Lq * Ct * 2

    flops = N * (4 * Lq * Ct * Ct        # query path (2 matmuls)
                 + 4 * Ls * Cs * Ct      # K and V projections
                 + 4 * Lq * Ls * Ct      # scores + context across all heads
                 + 2 * Lq * Ct * Ct      # output projection
                 + 16 * Lq * Ct * Ct)    # FFN
    cost = pl.CostEstimate(
        flops=flops,
        transcendentals=N * (num_heads * Lq * Ls + 2 * Lq),
        bytes_accessed=_nbytes(conv_tok) + const_bytes + N * Lq * Ct * 4)

    kernel = functools.partial(_fused_pipeline_kernel, num_heads=num_heads,
                               scale=scale, total_tokens=total_tokens)
    # NOTE: demo Ct < 128 gives masked lane stores on the output; at production
    # Ct >= 128 the out block is lane-dense (and per-head slices lane-aligned).
    return pl.pallas_call(
        kernel,
        out_shape=jax.ShapeDtypeStruct((N, Lq, Ct), jnp.float32),
        grid=(N,),
        in_specs=[
            pl.BlockSpec((None, Ls, Cs), lambda n: (n, 0, 0)),  # conv tokens (per image)
            pl.BlockSpec((1, Cs), c2),                          # channel sum
            pl.BlockSpec((1, Cs), c2),                          # channel sum of squares
            pl.BlockSpec((1, Cs), c2),                          # bn gamma
            pl.BlockSpec((1, Cs), c2),                          # bn beta
            pl.BlockSpec((Ls, Cs), c2),                         # pos_embed tokens
            pl.BlockSpec((Lq, Ct), c2),                         # query embedding
            pl.BlockSpec((Ct, Ct), c2),                         # proj_pos 1x1 conv w
            pl.BlockSpec((1, Ct), c2),                          # proj_pos 1x1 conv b
            pl.BlockSpec((Ct, Ct), c2),                         # wq
            pl.BlockSpec((1, Ct), c2),                          # bq
            pl.BlockSpec((Cs, Ct), c2),                         # wk (full width)
            pl.BlockSpec((1, Ct), c2),                          # bk
            pl.BlockSpec((Cs, Ct), c2),                         # wv (full width)
            pl.BlockSpec((1, Ct), c2),                          # bv
            pl.BlockSpec((Ct, Ct), c2),                         # wo (full width)
            pl.BlockSpec((1, Ct), c2),                          # bo
            pl.BlockSpec((1, Ct), c2),                          # ln gamma
            pl.BlockSpec((1, Ct), c2),                          # ln beta
            pl.BlockSpec((Ct, Ch), c2),                         # ffn w1
            pl.BlockSpec((1, Ch), c2),                          # ffn b1
            pl.BlockSpec((Ch, Ct), c2),                         # ffn w2
            pl.BlockSpec((1, Ct), c2),                          # ffn b2
        ],
        out_specs=pl.BlockSpec((None, Lq, Ct), lambda n: (n, 0, 0)),
        scratch_shapes=[pltpu.VMEM((Lq, Ct), jnp.bfloat16)],
        compiler_params=pltpu.CompilerParams(
            dimension_semantics=("parallel",),
            vmem_limit_bytes=_vmem_limit_bytes(block_bytes, scratch_bytes)),
        cost_estimate=cost,
    )(conv_tok, ch_sum, ch_sq, bn_g, bn_b, pos_tok, query_emb, w1q, b1q, wq,
      bq, wk, bk, wv, bv, wo, bo, ln_g, ln_b, fw1, fb1, fw2, fb2)


# ----------------------------------------------------------------------------
# Parameters (deterministic synthetic init)
# ----------------------------------------------------------------------------

def init_params(key, student_dims, teacher_dims, query_hw, pos_hw):
    ks = jax.random.split(key, 12)
    std = 0.02
    Cs, Ct = student_dims, teacher_dims
    return {
        # proj_student: Conv2d(Cs, Cs, 3, padding=1) (PyTorch layout Cout,Cin,kh,kw)
        "conv3_w": jax.random.normal(ks[0], (Cs, Cs, 3, 3), jnp.float32) * std,
        "conv3_b": jnp.zeros((1, Cs), jnp.float32),
        "bn_gamma": jnp.ones((1, Cs), jnp.float32),
        "bn_beta": jnp.zeros((1, Cs), jnp.float32),
        # pos_embed: (1, Cs, pos_h, pos_w), trunc_normal std=0.02
        "pos_embed": jax.random.normal(ks[1], (1, Cs, pos_hw[0], pos_hw[1]),
                                       jnp.float32) * std,
        # proj_pos: Conv2d(Ct, Ct, 1)  (stored as (Cin, Cout))
        "conv1_w": jax.random.normal(ks[2], (Ct, Ct), jnp.float32) * std,
        "conv1_b": jnp.zeros((1, Ct), jnp.float32),
        # self.query: nn.Embedding(H*W, Ct)
        "query_emb": jax.random.normal(ks[3], (query_hw[0] * query_hw[1], Ct),
                                       jnp.float32) * std,
        # pos_attention (cross-attention) projections
        "wq": jax.random.normal(ks[4], (Ct, Ct), jnp.float32) * std,
        "bq": jnp.zeros((1, Ct), jnp.float32),
        "wk": jax.random.normal(ks[5], (Cs, Ct), jnp.float32) * std,
        "bk": jnp.zeros((1, Ct), jnp.float32),
        "wv": jax.random.normal(ks[6], (Cs, Ct), jnp.float32) * std,
        "bv": jnp.zeros((1, Ct), jnp.float32),
        "wo": jax.random.normal(ks[7], (Ct, Ct), jnp.float32) * std,
        "bo": jnp.zeros((1, Ct), jnp.float32),
        # LayerNorm([Ct])
        "ln_gamma": jnp.ones((1, Ct), jnp.float32),
        "ln_beta": jnp.zeros((1, Ct), jnp.float32),
        # FFN(Ct, 4*Ct)
        "ffn_w1": jax.random.normal(ks[8], (Ct, 4 * Ct), jnp.float32) * std,
        "ffn_b1": jnp.zeros((1, 4 * Ct), jnp.float32),
        "ffn_w2": jax.random.normal(ks[9], (4 * Ct, Ct), jnp.float32) * std,
        "ffn_b2": jnp.zeros((1, Ct), jnp.float32),
    }


# ----------------------------------------------------------------------------
# Forward (thin JAX glue around the 2 Pallas kernels)
# ----------------------------------------------------------------------------

def attention_projector_forward(x, params, *, query_hw, num_heads=8,
                                softmax_scale=1.0):
    """x: (N, Cs, Hs, Ws) float32 NCHW.  Returns (N, H*W, Ct)."""
    N, Cs, Hs, Ws = x.shape
    H, W = query_hw
    Ct = params["query_emb"].shape[1]
    hd = Ct // num_heads
    Ls, Lq, M = Hs * Ws, H * W, N * Hs * Ws
    bf16 = jnp.bfloat16

    # ---- halo-padded NHWC activations (NO 9x im2col replication) -------------
    x_nhwc = jnp.transpose(x, (0, 2, 3, 1)).astype(bf16)
    xp = jnp.pad(x_nhwc, ((0, 0), (1, 1), (1, 1), (0, 0)))          # (N,Hs+2,Ws+2,Cs)
    # conv weight as 9 per-tap (Cin, Cout) matrices
    w_taps = jnp.transpose(params["conv3_w"], (2, 3, 1, 0)).reshape(9, Cs, Cs).astype(bf16)

    # K1: per-image conv + per-image BN-stat partials (parallel over N)
    conv_tok, psum, psq = pallas_conv_stats(xp, w_taps, params["conv3_b"])
    ch_sum = jnp.sum(psum, axis=0)     # (1, Cs) global batch sums (tiny reduce)
    ch_sq = jnp.sum(psq, axis=0)

    # pos_embed as (Ls, Cs) tokens (broadcast over N inside K3 via constant index_map)
    pos_tok = jnp.transpose(params["pos_embed"], (0, 2, 3, 1)).reshape(Ls, Cs)

    # K3: fused BN + ReLU + pos + query path + K/V proj + MHA + wo + LN + FFN
    scale = softmax_scale / math.sqrt(hd)
    out = pallas_fused_pipeline(
        conv_tok, ch_sum, ch_sq, params["bn_gamma"], params["bn_beta"], pos_tok,
        params["query_emb"].astype(bf16),
        params["conv1_w"].astype(bf16), params["conv1_b"],
        params["wq"].astype(bf16), params["bq"],
        params["wk"].astype(bf16), params["bk"],
        params["wv"].astype(bf16), params["bv"],
        params["wo"].astype(bf16), params["bo"],
        params["ln_gamma"], params["ln_beta"],
        params["ffn_w1"].astype(bf16), params["ffn_b1"],
        params["ffn_w2"].astype(bf16), params["ffn_b2"],
        num_heads=num_heads, scale=scale, total_tokens=M)
    return out                                            # (N, Lq, Ct)


# ----------------------------------------------------------------------------
# Demo
# ----------------------------------------------------------------------------

if __name__ == "__main__":
    student_dims = 32
    teacher_dims = 64
    num_heads = 8
    query_hw = (8, 8)
    pos_hw = (8, 8)      # must match spatial size of x for the pos_embed add

    key = jax.random.PRNGKey(0)
    k_param, k_x = jax.random.split(key)
    params = init_params(k_param, student_dims, teacher_dims, query_hw, pos_hw)

    N = 2
    x = jax.random.normal(k_x, (N, student_dims, pos_hw[0], pos_hw[1]), jnp.float32)

    fwd = jax.jit(functools.partial(attention_projector_forward,
                                    query_hw=query_hw, num_heads=num_heads,
                                    softmax_scale=1.0))
    out = fwd(x, params)
    jax.block_until_ready(out)
    assert out.shape == (N, query_hw[0] * query_hw[1], teacher_dims)
    print("KERNEL_OK")
</pallas_src>

<mosaic_0001>
module attributes {stable_mosaic.version = 11 : i64} {
  func.func @_conv_stats_kernel(%arg0: i32, %arg1: memref<1x10x10x32xbf16, #tpu.memory_space<vmem>>, %arg2: memref<9x32x32xbf16, #tpu.memory_space<vmem>>, %arg3: memref<1x32xf32, #tpu.memory_space<vmem>>, %arg4: memref<1x64x32xbf16, #tpu.memory_space<vmem>>, %arg5: memref<1x1x32xf32, #tpu.memory_space<vmem>>, %arg6: memref<1x1x32xf32, #tpu.memory_space<vmem>>) attributes {dimension_semantics = [#tpu.dimension_semantics<parallel>], iteration_bounds = array<i64: 2>, scalar_prefetch = 0 : i64, scratch_operands = 0 : i64, tpu.core_type = #tpu.core_type<tc>, window_params = [{transform_indices = @transform_0, window_bounds = array<i64: 1, 10, 10, 32>}, {pipeline_mode = #tpu.pipeline_mode<synchronous>, transform_indices = @transform_1, window_bounds = array<i64: 9, 32, 32>}, {pipeline_mode = #tpu.pipeline_mode<synchronous>, transform_indices = @transform_2, window_bounds = array<i64: 1, 32>}, {transform_indices = @transform_3, window_bounds = array<i64: 1, 64, 32>}, {transform_indices = @transform_4, window_bounds = array<i64: 1, 1, 32>}, {transform_indices = @transform_5, window_bounds = array<i64: 1, 1, 32>}]} {
    %cst = arith.constant 0.000000e+00 : f32
    %0 = vector.broadcast %cst : f32 to vector<64x32xf32>
    %c0 = arith.constant 0 : index
    %c0_0 = arith.constant 0 : index
    %c0_1 = arith.constant 0 : index
    %c0_2 = arith.constant 0 : index
    %1 = vector.load %arg1[%c0, %c0_0, %c0_1, %c0_2] : memref<1x10x10x32xbf16, #tpu.memory_space<vmem>>, vector<1x8x8x32xbf16>
    %2 = vector.shape_cast %1 : vector<1x8x8x32xbf16> to vector<8x8x32xbf16>
    %3 = vector.shape_cast %2 : vector<8x8x32xbf16> to vector<64x32xbf16>
    %c0_3 = arith.constant 0 : index
    %c0_4 = arith.constant 0 : index
    %c0_5 = arith.constant 0 : index
    %4 = vector.load %arg2[%c0_3, %c0_4, %c0_5] : memref<9x32x32xbf16, #tpu.memory_space<vmem>>, vector<1x32x32xbf16>
    %5 = vector.shape_cast %4 : vector<1x32x32xbf16> to vector<32x32xbf16>
    %cst_6 = arith.constant dense<0.000000e+00> : vector<64x32xf32>
    %6 = tpu.matmul %3, %5, %cst_6 {dimension_numbers = #tpu.dot_dimension_numbers<[1], [0], [0], [1], [0, 0, 1, 1], [], []>} : vector<64x32xbf16>, vector<32x32xbf16>, vector<64x32xf32> -> vector<64x32xf32>
    %7 = arith.addf %0, %6 : vector<64x32xf32>
    %c0_7 = arith.constant 0 : index
    %c0_8 = arith.constant 0 : index
    %c1 = arith.constant 1 : index
    %c0_9 = arith.constant 0 : index
    %8 = vector.load %arg1[%c0_7, %c0_8, %c1, %c0_9] : memref<1x10x10x32xbf16, #tpu.memory_space<vmem>>, vector<1x8x8x32xbf16>
    %9 = vector.shape_cast %8 : vector<1x8x8x32xbf16> to vector<8x8x32xbf16>
    %10 = vector.shape_cast %9 : vector<8x8x32xbf16> to vector<64x32xbf16>
    %c1_10 = arith.constant 1 : index
    %c0_11 = arith.constant 0 : index
    %c0_12 = arith.constant 0 : index
    %11 = vector.load %arg2[%c1_10, %c0_11, %c0_12] : memref<9x32x32xbf16, #tpu.memory_space<vmem>>, vector<1x32x32xbf16>
    %12 = vector.shape_cast %11 : vector<1x32x32xbf16> to vector<32x32xbf16>
    %cst_13 = arith.constant dense<0.000000e+00> : vector<64x32xf32>
    %13 = tpu.matmul %10, %12, %cst_13 {dimension_numbers = #tpu.dot_dimension_numbers<[1], [0], [0], [1], [0, 0, 1, 1], [], []>} : vector<64x32xbf16>, vector<32x32xbf16>, vector<64x32xf32> -> vector<64x32xf32>
    %14 = arith.addf %7, %13 : vector<64x32xf32>
    %c0_14 = arith.constant 0 : index
    %c0_15 = arith.constant 0 : index
    %c2 = arith.constant 2 : index
    %c0_16 = arith.constant 0 : index
    %15 = vector.load %arg1[%c0_14, %c0_15, %c2, %c0_16] : memref<1x10x10x32xbf16, #tpu.memory_space<vmem>>, vector<1x8x8x32xbf16>
    %16 = vector.shape_cast %15 : vector<1x8x8x32xbf16> to vector<8x8x32xbf16>
    %17 = vector.shape_cast %16 : vector<8x8x32xbf16> to vector<64x32xbf16>
    %c2_17 = arith.constant 2 : index
    %c0_18 = arith.constant 0 : index
    %c0_19 = arith.constant 0 : index
    %18 = vector.load %arg2[%c2_17, %c0_18, %c0_19] : memref<9x32x32xbf16, #tpu.memory_space<vmem>>, vector<1x32x32xbf16>
    %19 = vector.shape_cast %18 : vector<1x32x32xbf16> to vector<32x32xbf16>
    %cst_20 = arith.constant dense<0.000000e+00> : vector<64x32xf32>
    %20 = tpu.matmul %17, %19, %cst_20 {dimension_numbers = #tpu.dot_dimension_numbers<[1], [0], [0], [1], [0, 0, 1, 1], [], []>} : vector<64x32xbf16>, vector<32x32xbf16>, vector<64x32xf32> -> vector<64x32xf32>
    %21 = arith.addf %14, %20 : vector<64x32xf32>
    %c0_21 = arith.constant 0 : index
    %c1_22 = arith.constant 1 : index
    %c0_23 = arith.constant 0 : index
    %c0_24 = arith.constant 0 : index
    %22 = vector.load %arg1[%c0_21, %c1_22, %c0_23, %c0_24] : memref<1x10x10x32xbf16, #tpu.memory_space<vmem>>, vector<1x8x8x32xbf16>
    %23 = vector.shape_cast %22 : vector<1x8x8x32xbf16> to vector<8x8x32xbf16>
    %24 = vector.shape_cast %23 : vector<8x8x32xbf16> to vector<64x32xbf16>
    %c3 = arith.constant 3 : index
    %c0_25 = arith.constant 0 : index
    %c0_26 = arith.constant 0 : index
    %25 = vector.load %arg2[%c3, %c0_25, %c0_26] : memref<9x32x32xbf16, #tpu.memory_space<vmem>>, vector<1x32x32xbf16>
    %26 = vector.shape_cast %25 : vector<1x32x32xbf16> to vector<32x32xbf16>
    %cst_27 = arith.constant dense<0.000000e+00> : vector<64x32xf32>
    %27 = tpu.matmul %24, %26, %cst_27 {dimension_numbers = #tpu.dot_dimension_numbers<[1], [0], [0], [1], [0, 0, 1, 1], [], []>} : vector<64x32xbf16>, vector<32x32xbf16>, vector<64x32xf32> -> vector<64x32xf32>
    %28 = arith.addf %21, %27 : vector<64x32xf32>
    %c0_28 = arith.constant 0 : index
    %c1_29 = arith.constant 1 : index
    %c1_30 = arith.constant 1 : index
    %c0_31 = arith.constant 0 : index
    %29 = vector.load %arg1[%c0_28, %c1_29, %c1_30, %c0_31] : memref<1x10x10x32xbf16, #tpu.memory_space<vmem>>, vector<1x8x8x32xbf16>
    %30 = vector.shape_cast %29 : vector<1x8x8x32xbf16> to vector<8x8x32xbf16>
    %31 = vector.shape_cast %30 : vector<8x8x32xbf16> to vector<64x32xbf16>
    %c4 = arith.constant 4 : index
    %c0_32 = arith.constant 0 : index
    %c0_33 = arith.constant 0 : index
    %32 = vector.load %arg2[%c4, %c0_32, %c0_33] : memref<9x32x32xbf16, #tpu.memory_space<vmem>>, vector<1x32x32xbf16>
    %33 = vector.shape_cast %32 : vector<1x32x32xbf16> to vector<32x32xbf16>
    %cst_34 = arith.constant dense<0.000000e+00> : vector<64x32xf32>
    %34 = tpu.matmul %31, %33, %cst_34 {dimension_numbers = #tpu.dot_dimension_numbers<[1], [0], [0], [1], [0, 0, 1, 1], [], []>} : vector<64x32xbf16>, vector<32x32xbf16>, vector<64x32xf32> -> vector<64x32xf32>
    %35 = arith.addf %28, %34 : vector<64x32xf32>
    %c0_35 = arith.constant 0 : index
    %c1_36 = arith.constant 1 : index
    %c2_37 = arith.constant 2 : index
    %c0_38 = arith.constant 0 : index
    %36 = vector.load %arg1[%c0_35, %c1_36, %c2_37, %c0_38] : memref<1x10x10x32xbf16, #tpu.memory_space<vmem>>, vector<1x8x8x32xbf16>
    %37 = vector.shape_cast %36 : vector<1x8x8x32xbf16> to vector<8x8x32xbf16>
    %38 = vector.shape_cast %37 : vector<8x8x32xbf16> to vector<64x32xbf16>
    %c5 = arith.constant 5 : index
    %c0_39 = arith.constant 0 : index
    %c0_40 = arith.constant 0 : index
    %39 = vector.load %arg2[%c5, %c0_39, %c0_40] : memref<9x32x32xbf16, #tpu.memory_space<vmem>>, vector<1x32x32xbf16>
    %40 = vector.shape_cast %39 : vector<1x32x32xbf16> to vector<32x32xbf16>
    %cst_41 = arith.constant dense<0.000000e+00> : vector<64x32xf32>
    %41 = tpu.matmul %38, %40, %cst_41 {dimension_numbers = #tpu.dot_dimension_numbers<[1], [0], [0], [1], [0, 0, 1, 1], [], []>} : vector<64x32xbf16>, vector<32x32xbf16>, vector<64x32xf32> -> vector<64x32xf32>
    %42 = arith.addf %35, %41 : vector<64x32xf32>
    %c0_42 = arith.constant 0 : index
    %c2_43 = arith.constant 2 : index
    %c0_44 = arith.constant 0 : index
    %c0_45 = arith.constant 0 : index
    %43 = vector.load %arg1[%c0_42, %c2_43, %c0_44, %c0_45] : memref<1x10x10x32xbf16, #tpu.memory_space<vmem>>, vector<1x8x8x32xbf16>
    %44 = vector.shape_cast %43 : vector<1x8x8x32xbf16> to vector<8x8x32xbf16>
    %45 = vector.shape_cast %44 : vector<8x8x32xbf16> to vector<64x32xbf16>
    %c6 = arith.constant 6 : index
    %c0_46 = arith.constant 0 : index
    %c0_47 = arith.constant 0 : index
    %46 = vector.load %arg2[%c6, %c0_46, %c0_47] : memref<9x32x32xbf16, #tpu.memory_space<vmem>>, vector<1x32x32xbf16>
    %47 = vector.shape_cast %46 : vector<1x32x32xbf16> to vector<32x32xbf16>
    %cst_48 = arith.constant dense<0.000000e+00> : vector<64x32xf32>
    %48 = tpu.matmul %45, %47, %cst_48 {dimension_numbers = #tpu.dot_dimension_numbers<[1], [0], [0], [1], [0, 0, 1, 1], [], []>} : vector<64x32xbf16>, vector<32x32xbf16>, vector<64x32xf32> -> vector<64x32xf32>
    %49 = arith.addf %42, %48 : vector<64x32xf32>
    %c0_49 = arith.constant 0 : index
    %c2_50 = arith.constant 2 : index
    %c1_51 = arith.constant 1 : index
    %c0_52 = arith.constant 0 : index
    %50 = vector.load %arg1[%c0_49, %c2_50, %c1_51, %c0_52] : memref<1x10x10x32xbf16, #tpu.memory_space<vmem>>, vector<1x8x8x32xbf16>
    %51 = vector.shape_cast %50 : vector<1x8x8x32xbf16> to vector<8x8x32xbf16>
    %52 = vector.shape_cast %51 : vector<8x8x32xbf16> to vector<64x32xbf16>
    %c7 = arith.constant 7 : index
    %c0_53 = arith.constant 0 : index
    %c0_54 = arith.constant 0 : index
    %53 = vector.load %arg2[%c7, %c0_53, %c0_54] : memref<9x32x32xbf16, #tpu.memory_space<vmem>>, vector<1x32x32xbf16>
    %54 = vector.shape_cast %53 : vector<1x32x32xbf16> to vector<32x32xbf16>
    %cst_55 = arith.constant dense<0.000000e+00> : vector<64x32xf32>
    %55 = tpu.matmul %52, %54, %cst_55 {dimension_numbers = #tpu.dot_dimension_numbers<[1], [0], [0], [1], [0, 0, 1, 1], [], []>} : vector<64x32xbf16>, vector<32x32xbf16>, vector<64x32xf32> -> vector<64x32xf32>
    %56 = arith.addf %49, %55 : vector<64x32xf32>
    %c0_56 = arith.constant 0 : index
    %c2_57 = arith.constant 2 : index
    %c2_58 = arith.constant 2 : index
    %c0_59 = arith.constant 0 : index
    %57 = vector.load %arg1[%c0_56, %c2_57, %c2_58, %c0_59] : memref<1x10x10x32xbf16, #tpu.memory_space<vmem>>, vector<1x8x8x32xbf16>
    %58 = vector.shape_cast %57 : vector<1x8x8x32xbf16> to vector<8x8x32xbf16>
    %59 = vector.shape_cast %58 : vector<8x8x32xbf16> to vector<64x32xbf16>
    %c8 = arith.constant 8 : index
    %c0_60 = arith.constant 0 : index
    %c0_61 = arith.constant 0 : index
    %60 = vector.load %arg2[%c8, %c0_60, %c0_61] : memref<9x32x32xbf16, #tpu.memory_space<vmem>>, vector<1x32x32xbf16>
    %61 = vector.shape_cast %60 : vector<1x32x32xbf16> to vector<32x32xbf16>
    %cst_62 = arith.constant dense<0.000000e+00> : vector<64x32xf32>
    %62 = tpu.matmul %59, %61, %cst_62 {dimension_numbers = #tpu.dot_dimension_numbers<[1], [0], [0], [1], [0, 0, 1, 1], [], []>} : vector<64x32xbf16>, vector<32x32xbf16>, vector<64x32xf32> -> vector<64x32xf32>
    %63 = arith.addf %56, %62 : vector<64x32xf32>
    %c0_63 = arith.constant 0 : index
    %c0_64 = arith.constant 0 : index
    %64 = vector.load %arg3[%c0_63, %c0_64] : memref<1x32xf32, #tpu.memory_space<vmem>>, vector<1x32xf32>
    %65 = vector.broadcast %64 : vector<1x32xf32> to vector<64x32xf32>
    %66 = arith.addf %63, %65 : vector<64x32xf32>
    %67 = arith.truncf %66 : vector<64x32xf32> to vector<64x32xbf16>
    %c0_65 = arith.constant 0 : index
    %c0_66 = arith.constant 0 : index
    %c0_67 = arith.constant 0 : index
    %68 = vector.load %arg4[%c0_65, %c0_66, %c0_67] : memref<1x64x32xbf16, #tpu.memory_space<vmem>>, vector<1x64x32xbf16>
    %69 = vector.shape_cast %68 : vector<1x64x32xbf16> to vector<64x32xbf16>
    %70 = vector.shape_cast %67 : vector<64x32xbf16> to vector<1x64x32xbf16>
    tpu.vector_store %arg4[%c0_65, %c0_66, %c0_67], %70 {strides = array<i32>} : memref<1x64x32xbf16, #tpu.memory_space<vmem>>, vector<1x64x32xbf16>,
    %cst_68 = arith.constant dense<0.000000e+00> : vector<32xf32>
    %71 = vector.multi_reduction <add>, %66, %cst_68 [0] : vector<64x32xf32> to vector<32xf32>
    %72 = vector.shape_cast %71 : vector<32xf32> to vector<1x32xf32>
    %c0_69 = arith.constant 0 : index
    %c0_70 = arith.constant 0 : index
    %c0_71 = arith.constant 0 : index
    %73 = vector.load %arg5[%c0_69, %c0_70, %c0_71] : memref<1x1x32xf32, #tpu.memory_space<vmem>>, vector<1x1x32xf32>
    %74 = vector.shape_cast %73 : vector<1x1x32xf32> to vector<1x32xf32>
    %75 = vector.shape_cast %72 : vector<1x32xf32> to vector<1x1x32xf32>
    tpu.vector_store %arg5[%c0_69, %c0_70, %c0_71], %75 {strides = array<i32>} : memref<1x1x32xf32, #tpu.memory_space<vmem>>, vector<1x1x32xf32>,
    %76 = arith.mulf %66, %66 : vector<64x32xf32>
    %cst_72 = arith.constant dense<0.000000e+00> : vector<32xf32>
    %77 = vector.multi_reduction <add>, %76, %cst_72 [0] : vector<64x32xf32> to vector<32xf32>
    %78 = vector.shape_cast %77 : vector<32xf32> to vector<1x32xf32>
    %c0_73 = arith.constant 0 : index
    %c0_74 = arith.constant 0 : index
    %c0_75 = arith.constant 0 : index
    %79 = vector.load %arg6[%c0_73, %c0_74, %c0_75] : memref<1x1x32xf32, #tpu.memory_space<vmem>>, vector<1x1x32xf32>
    %80 = vector.shape_cast %79 : vector<1x1x32xf32> to vector<1x32xf32>
    %81 = vector.shape_cast %78 : vector<1x32xf32> to vector<1x1x32xf32>
    tpu.vector_store %arg6[%c0_73, %c0_74, %c0_75], %81 {strides = array<i32>} : memref<1x1x32xf32, #tpu.memory_space<vmem>>, vector<1x1x32xf32>,
    return
  }
  func.func @transform_0(%arg0: i32) -> (i32, i32, i32, i32) {
    %c0_i32 = arith.constant 0 : i32
    %c0_i32_0 = arith.constant 0 : i32
    %c0_i32_1 = arith.constant 0 : i32
    %c0_i32_2 = arith.constant 0 : i32
    return %arg0, %c0_i32, %c0_i32_0, %c0_i32_1 : i32, i32, i32, i32
  }
  func.func @transform_1(%arg0: i32) -> (i32, i32, i32) {
    %c0_i32 = arith.constant 0 : i32
    %c0_i32_0 = arith.constant 0 : i32
    %c0_i32_1 = arith.constant 0 : i32
    %c0_i32_2 = arith.constant 0 : i32
    return %c0_i32, %c0_i32_0, %c0_i32_1 : i32, i32, i32
  }
  func.func @transform_2(%arg0: i32) -> (i32, i32) {
    %c0_i32 = arith.constant 0 : i32
    %c0_i32_0 = arith.constant 0 : i32
    %c0_i32_1 = arith.constant 0 : i32
    return %c0_i32, %c0_i32_0 : i32, i32
  }
  func.func @transform_3(%arg0: i32) -> (i32, i32, i32) {
    %c0_i32 = arith.constant 0 : i32
    %c0_i32_0 = arith.constant 0 : i32
    %c0_i32_1 = arith.constant 0 : i32
    return %arg0, %c0_i32, %c0_i32_0 : i32, i32, i32
  }
  func.func @transform_4(%arg0: i32) -> (i32, i32, i32) {
    %c0_i32 = arith.constant 0 : i32
    %c0_i32_0 = arith.constant 0 : i32
    %c0_i32_1 = arith.constant 0 : i32
    return %arg0, %c0_i32, %c0_i32_0 : i32, i32, i32
  }
  func.func @transform_5(%arg0: i32) -> (i32, i32, i32) {
    %c0_i32 = arith.constant 0 : i32
    %c0_i32_0 = arith.constant 0 : i32
    %c0_i32_1 = arith.constant 0 : i32
    return %arg0, %c0_i32, %c0_i32_0 : i32, i32, i32
  }
}

module attributes {stable_mosaic.version = 11 : i64} {
  func.func @_fused_pipeline_kernel(%arg0: i32, %arg1: memref<1x64x32xbf16, #tpu.memory_space<vmem>>, %arg2: memref<1x32xf32, #tpu.memory_space<vmem>>, %arg3: memref<1x32xf32, #tpu.memory_space<vmem>>, %arg4: memref<1x32xf32, #tpu.memory_space<vmem>>, %arg5: memref<1x32xf32, #tpu.memory_space<vmem>>, %arg6: memref<64x32xf32, #tpu.memory_space<vmem>>, %arg7: memref<64x64xbf16, #tpu.memory_space<vmem>>, %arg8: memref<64x64xbf16, #tpu.memory_space<vmem>>, %arg9: memref<1x64xf32, #tpu.memory_space<vmem>>, %arg10: memref<64x64xbf16, #tpu.memory_space<vmem>>, %arg11: memref<1x64xf32, #tpu.memory_space<vmem>>, %arg12: memref<32x64xbf16, #tpu.memory_space<vmem>>, %arg13: memref<1x64xf32, #tpu.memory_space<vmem>>, %arg14: memref<32x64xbf16, #tpu.memory_space<vmem>>, %arg15: memref<1x64xf32, #tpu.memory_space<vmem>>, %arg16: memref<64x64xbf16, #tpu.memory_space<vmem>>, %arg17: memref<1x64xf32, #tpu.memory_space<vmem>>, %arg18: memref<1x64xf32, #tpu.memory_space<vmem>>, %arg19: memref<1x64xf32, #tpu.memory_space<vmem>>, %arg20: memref<64x256xbf16, #tpu.memory_space<vmem>>, %arg21: memref<1x256xf32, #tpu.memory_space<vmem>>, %arg22: memref<256x64xbf16, #tpu.memory_space<vmem>>, %arg23: memref<1x64xf32, #tpu.memory_space<vmem>>, %arg24: memref<1x64x64xf32, #tpu.memory_space<vmem>>, %arg25: memref<64x64xbf16, #tpu.memory_space<vmem>>) attributes {dimension_semantics = [#tpu.dimension_semantics<parallel>], iteration_bounds = array<i64: 2>, scalar_prefetch = 0 : i64, scratch_operands = 1 : i64, tpu.core_type = #tpu.core_type<tc>, window_params = [{transform_indices = @transform_0, window_bounds = array<i64: 1, 64, 32>}, {pipeline_mode = #tpu.pipeline_mode<synchronous>, transform_indices = @transform_1, window_bounds = array<i64: 1, 32>}, {pipeline_mode = #tpu.pipeline_mode<synchronous>, transform_indices = @transform_2, window_bounds = array<i64: 1, 32>}, {pipeline_mode = #tpu.pipeline_mode<synchronous>, transform_indices = @transform_3, window_bounds = array<i64: 1, 32>}, {pipeline_mode = #tpu.pipeline_mode<synchronous>, transform_indices = @transform_4, window_bounds = array<i64: 1, 32>}, {pipeline_mode = #tpu.pipeline_mode<synchronous>, transform_indices = @transform_5, window_bounds = array<i64: 64, 32>}, {pipeline_mode = #tpu.pipeline_mode<synchronous>, transform_indices = @transform_6, window_bounds = array<i64: 64, 64>}, {pipeline_mode = #tpu.pipeline_mode<synchronous>, transform_indices = @transform_7, window_bounds = array<i64: 64, 64>}, {pipeline_mode = #tpu.pipeline_mode<synchronous>, transform_indices = @transform_8, window_bounds = array<i64: 1, 64>}, {pipeline_mode = #tpu.pipeline_mode<synchronous>, transform_indices = @transform_9, window_bounds = array<i64: 64, 64>}, {pipeline_mode = #tpu.pipeline_mode<synchronous>, transform_indices = @transform_10, window_bounds = array<i64: 1, 64>}, {pipeline_mode = #tpu.pipeline_mode<synchronous>, transform_indices = @transform_11, window_bounds = array<i64: 32, 64>}, {pipeline_mode = #tpu.pipeline_mode<synchronous>, transform_indices = @transform_12, window_bounds = array<i64: 1, 64>}, {pipeline_mode = #tpu.pipeline_mode<synchronous>, transform_indices = @transform_13, window_bounds = array<i64: 32, 64>}, {pipeline_mode = #tpu.pipeline_mode<synchronous>, transform_indices = @transform_14, window_bounds = array<i64: 1, 64>}, {pipeline_mode = #tpu.pipeline_mode<synchronous>, transform_indices = @transform_15, window_bounds = array<i64: 64, 64>}, {pipeline_mode = #tpu.pipeline_mode<synchronous>, transform_indices = @transform_16, window_bounds = array<i64: 1, 64>}, {pipeline_mode = #tpu.pipeline_mode<synchronous>, transform_indices = @transform_17, window_bounds = array<i64: 1, 64>}, {pipeline_mode = #tpu.pipeline_mode<synchronous>, transform_indices = @transform_18, window_bounds = array<i64: 1, 64>}, {pipeline_mode = #tpu.pipeline_mode<synchronous>, transform_indices = @transform_19, window_bounds = array<i64: 64, 256>}, {pipeline_mode = #tpu.pipeline_mode<synchronous>, transform_indices = @transform_20, window_bounds = array<i64: 1, 256>}, {pipeline_mode = #tpu.pipeline_mode<synchronous>, transform_indices = @transform_21, window_bounds = array<i64: 256, 64>}, {pipeline_mode = #tpu.pipeline_mode<synchronous>, transform_indices = @transform_22, window_bounds = array<i64: 1, 64>}, {transform_indices = @transform_23, window_bounds = array<i64: 1, 64, 64>}]} {
    %c0 = arith.constant 0 : index
    %c0_0 = arith.constant 0 : index
    %0 = vector.load %arg2[%c0, %c0_0] : memref<1x32xf32, #tpu.memory_space<vmem>>, vector<1x32xf32>
    %cst = arith.constant 7.812500e-03 : f32
    %1 = vector.broadcast %cst : f32 to vector<1x32xf32>
    %2 = arith.mulf %0, %1 : vector<1x32xf32>
    %c0_1 = arith.constant 0 : index
    %c0_2 = arith.constant 0 : index
    %3 = vector.load %arg3[%c0_1, %c0_2] : memref<1x32xf32, #tpu.memory_space<vmem>>, vector<1x32xf32>
    %cst_3 = arith.constant 7.812500e-03 : f32
    %4 = vector.broadcast %cst_3 : f32 to vector<1x32xf32>
    %5 = arith.mulf %3, %4 : vector<1x32xf32>
    %6 = arith.mulf %2, %2 : vector<1x32xf32>
    %7 = arith.subf %5, %6 : vector<1x32xf32>
    %cst_4 = arith.constant 0.000000e+00 : f32
    %8 = vector.broadcast %cst_4 : f32 to vector<1x32xf32>
    %9 = arith.maximumf %7, %8 : vector<1x32xf32>
    %cst_5 = arith.constant 9.99999974E-6 : f32
    %10 = vector.broadcast %cst_5 : f32 to vector<1x32xf32>
    %11 = arith.addf %9, %10 : vector<1x32xf32>
    %12 = math.rsqrt %11 : vector<1x32xf32>
    %c0_6 = arith.constant 0 : index
    %c0_7 = arith.constant 0 : index
    %c0_8 = arith.constant 0 : index
    %13 = vector.load %arg1[%c0_6, %c0_7, %c0_8] : memref<1x64x32xbf16, #tpu.memory_space<vmem>>, vector<1x64x32xbf16>
    %14 = vector.shape_cast %13 : vector<1x64x32xbf16> to vector<64x32xbf16>
    %15 = arith.extf %14 : vector<64x32xbf16> to vector<64x32xf32>
    %16 = vector.broadcast %2 : vector<1x32xf32> to vector<64x32xf32>
    %17 = arith.subf %15, %16 : vector<64x32xf32>
    %c0_9 = arith.constant 0 : index
    %c0_10 = arith.constant 0 : index
    %18 = vector.load %arg4[%c0_9, %c0_10] : memref<1x32xf32, #tpu.memory_space<vmem>>, vector<1x32xf32>
    %19 = arith.mulf %12, %18 : vector<1x32xf32>
    %20 = vector.broadcast %19 : vector<1x32xf32> to vector<64x32xf32>
    %21 = arith.mulf %17, %20 : vector<64x32xf32>
    %c0_11 = arith.constant 0 : index
    %c0_12 = arith.constant 0 : index
    %22 = vector.load %arg5[%c0_11, %c0_12] : memref<1x32xf32, #tpu.memory_space<vmem>>, vector<1x32xf32>
    %23 = vector.broadcast %22 : vector<1x32xf32> to vector<64x32xf32>
    %24 = arith.addf %21, %23 : vector<64x32xf32>
    %cst_13 = arith.constant 0.000000e+00 : f32
    %25 = vector.broadcast %cst_13 : f32 to vector<64x32xf32>
    %26 = arith.maximumf %24, %25 : vector<64x32xf32>
    %c0_14 = arith.constant 0 : index
    %c0_15 = arith.constant 0 : index
    %27 = vector.load %arg6[%c0_14, %c0_15] : memref<64x32xf32, #tpu.memory_space<vmem>>, vector<64x32xf32>
    %28 = arith.addf %26, %27 : vector<64x32xf32>
    %29 = arith.truncf %28 : vector<64x32xf32> to vector<64x32xbf16>
    %c0_16 = arith.constant 0 : index
    %c0_17 = arith.constant 0 : index
    %30 = vector.load %arg7[%c0_16, %c0_17] : memref<64x64xbf16, #tpu.memory_space<vmem>>, vector<64x64xbf16>
    %c0_18 = arith.constant 0 : index
    %c0_19 = arith.constant 0 : index
    %31 = vector.load %arg8[%c0_18, %c0_19] : memref<64x64xbf16, #tpu.memory_space<vmem>>, vector<64x64xbf16>
    %cst_20 = arith.constant dense<0.000000e+00> : vector<64x64xf32>
    %32 = tpu.matmul %30, %31, %cst_20 {dimension_numbers = #tpu.dot_dimension_numbers<[1], [0], [0], [1], [0, 0, 1, 1], [], []>} : vector<64x64xbf16>, vector<64x64xbf16>, vector<64x64xf32> -> vector<64x64xf32>
    %c0_21 = arith.constant 0 : index
    %c0_22 = arith.constant 0 : index
    %33 = vector.load %arg9[%c0_21, %c0_22] : memref<1x64xf32, #tpu.memory_space<vmem>>, vector<1x64xf32>
    %34 = vector.broadcast %33 : vector<1x64xf32> to vector<64x64xf32>
    %35 = arith.addf %32, %34 : vector<64x64xf32>
    %cst_23 = arith.constant 0.000000e+00 : f32
    %36 = vector.broadcast %cst_23 : f32 to vector<64x64xf32>
    %37 = arith.maximumf %35, %36 : vector<64x64xf32>
    %38 = arith.truncf %37 : vector<64x64xf32> to vector<64x64xbf16>
    %c0_24 = arith.constant 0 : index
    %c0_25 = arith.constant 0 : index
    %39 = vector.load %arg10[%c0_24, %c0_25] : memref<64x64xbf16, #tpu.memory_space<vmem>>, vector<64x64xbf16>
    %cst_26 = arith.constant dense<0.000000e+00> : vector<64x64xf32>
    %40 = tpu.matmul %38, %39, %cst_26 {dimension_numbers = #tpu.dot_dimension_numbers<[1], [0], [0], [1], [0, 0, 1, 1], [], []>} : vector<64x64xbf16>, vector<64x64xbf16>, vector<64x64xf32> -> vector<64x64xf32>
    %c0_27 = arith.constant 0 : index
    %c0_28 = arith.constant 0 : index
    %41 = vector.load %arg11[%c0_27, %c0_28] : memref<1x64xf32, #tpu.memory_space<vmem>>, vector<1x64xf32>
    %42 = vector.broadcast %41 : vector<1x64xf32> to vector<64x64xf32>
    %43 = arith.addf %40, %42 : vector<64x64xf32>
    %44 = arith.truncf %43 : vector<64x64xf32> to vector<64x64xbf16>
    %c0_29 = arith.constant 0 : index
    %c0_30 = arith.constant 0 : index
    %45 = vector.load %arg12[%c0_29, %c0_30] : memref<32x64xbf16, #tpu.memory_space<vmem>>, vector<32x64xbf16>
    %cst_31 = arith.constant dense<0.000000e+00> : vector<64x64xf32>
    %46 = tpu.matmul %29, %45, %cst_31 {dimension_numbers = #tpu.dot_dimension_numbers<[1], [0], [0], [1], [0, 0, 1, 1], [], []>} : vector<64x32xbf16>, vector<32x64xbf16>, vector<64x64xf32> -> vector<64x64xf32>
    %c0_32 = arith.constant 0 : index
    %c0_33 = arith.constant 0 : index
    %47 = vector.load %arg13[%c0_32, %c0_33] : memref<1x64xf32, #tpu.memory_space<vmem>>, vector<1x64xf32>
    %48 = vector.broadcast %47 : vector<1x64xf32> to vector<64x64xf32>
    %49 = arith.addf %46, %48 : vector<64x64xf32>
    %50 = arith.truncf %49 : vector<64x64xf32> to vector<64x64xbf16>
    %c0_34 = arith.constant 0 : index
    %c0_35 = arith.constant 0 : index
    %51 = vector.load %arg14[%c0_34, %c0_35] : memref<32x64xbf16, #tpu.memory_space<vmem>>, vector<32x64xbf16>
    %cst_36 = arith.constant dense<0.000000e+00> : vector<64x64xf32>
    %52 = tpu.matmul %29, %51, %cst_36 {dimension_numbers = #tpu.dot_dimension_numbers<[1], [0], [0], [1], [0, 0, 1, 1], [], []>} : vector<64x32xbf16>, vector<32x64xbf16>, vector<64x64xf32> -> vector<64x64xf32>
    %c0_37 = arith.constant 0 : index
    %c0_38 = arith.constant 0 : index
    %53 = vector.load %arg15[%c0_37, %c0_38] : memref<1x64xf32, #tpu.memory_space<vmem>>, vector<1x64xf32>
    %54 = vector.broadcast %53 : vector<1x64xf32> to vector<64x64xf32>
    %55 = arith.addf %52, %54 : vector<64x64xf32>
    %56 = arith.truncf %55 : vector<64x64xf32> to vector<64x64xbf16>
    %57 = vector.extract_strided_slice %44 {offsets = [0, 0], sizes = [64, 8], strides = [1, 1]} : vector<64x64xbf16> to vector<64x8xbf16>
    %58 = vector.extract_strided_slice %50 {offsets = [0, 0], sizes = [64, 8], strides = [1, 1]} : vector<64x64xbf16> to vector<64x8xbf16>
    %59 = vector.extract_strided_slice %56 {offsets = [0, 0], sizes = [64, 8], strides = [1, 1]} : vector<64x64xbf16> to vector<64x8xbf16>
    %cst_39 = arith.constant dense<0.000000e+00> : vector<64x64xf32>
    %60 = tpu.matmul %57, %58, %cst_39 {dimension_numbers = #tpu.dot_dimension_numbers<[1], [1], [0], [0], [0, 0, 1, 0], [], []>} : vector<64x8xbf16>, vector<64x8xbf16>, vector<64x64xf32> -> vector<64x64xf32>
    %cst_40 = arith.constant 0.353553385 : f32
    %61 = vector.broadcast %cst_40 : f32 to vector<64x64xf32>
    %62 = arith.mulf %60, %61 : vector<64x64xf32>
    %cst_41 = arith.constant dense<0xFF800000> : vector<64xf32>
    %63 = vector.multi_reduction <maximumf>, %62, %cst_41 [1] : vector<64x64xf32> to vector<64xf32>
    %64 = vector.shape_cast %63 : vector<64xf32> to vector<64x1xf32>
    %65 = vector.broadcast %64 : vector<64x1xf32> to vector<64x64xf32>
    %66 = arith.subf %62, %65 : vector<64x64xf32>
    %67 = math.exp %66 : vector<64x64xf32>
    %cst_42 = arith.constant dense<0.000000e+00> : vector<64xf32>
    %68 = vector.multi_reduction <add>, %67, %cst_42 [1] : vector<64x64xf32> to vector<64xf32>
    %69 = vector.shape_cast %68 : vector<64xf32> to vector<64x1xf32>
    %70 = tpu.reciprocal %69 {approx = true} : vector<64x1xf32> -> vector<64x1xf32>
    %71 = vector.broadcast %70 : vector<64x1xf32> to vector<64x64xf32>
    %72 = arith.mulf %67, %71 : vector<64x64xf32>
    %73 = arith.truncf %72 : vector<64x64xf32> to vector<64x64xbf16>
    %cst_43 = arith.constant dense<0.000000e+00> : vector<64x8xf32>
    %74 = tpu.matmul %73, %59, %cst_43 {dimension_numbers = #tpu.dot_dimension_numbers<[1], [0], [0], [1], [0, 0, 1, 1], [], []>} : vector<64x64xbf16>, vector<64x8xbf16>, vector<64x8xf32> -> vector<64x8xf32>
    %75 = arith.truncf %74 : vector<64x8xf32> to vector<64x8xbf16>
    %c0_44 = arith.constant 0 : index
    %c0_45 = arith.constant 0 : index
    %76 = vector.load %arg25[%c0_44, %c0_45] : memref<64x64xbf16, #tpu.memory_space<vmem>>, vector<64x8xbf16>
    tpu.vector_store %arg25[%c0_44, %c0_45], %75 {strides = array<i32>} : memref<64x64xbf16, #tpu.memory_space<vmem>>, vector<64x8xbf16>,
    %77 = vector.extract_strided_slice %44 {offsets = [0, 8], sizes = [64, 8], strides = [1, 1]} : vector<64x64xbf16> to vector<64x8xbf16>
    %78 = vector.extract_strided_slice %50 {offsets = [0, 8], sizes = [64, 8], strides = [1, 1]} : vector<64x64xbf16> to vector<64x8xbf16>
    %79 = vector.extract_strided_slice %56 {offsets = [0, 8], sizes = [64, 8], strides = [1, 1]} : vector<64x64xbf16> to vector<64x8xbf16>
    %cst_46 = arith.constant dense<0.000000e+00> : vector<64x64xf32>
    %80 = tpu.matmul %77, %78, %cst_46 {dimension_numbers = #tpu.dot_dimension_numbers<[1], [1], [0], [0], [0, 0, 1, 0], [], []>} : vector<64x8xbf16>, vector<64x8xbf16>, vector<64x64xf32> -> vector<64x64xf32>
    %cst_47 = arith.constant 0.353553385 : f32
    %81 = vector.broadcast %cst_47 : f32 to vector<64x64xf32>
    %82 = arith.mulf %80, %81 : vector<64x64xf32>
    %cst_48 = arith.constant dense<0xFF800000> : vector<64xf32>
    %83 = vector.multi_reduction <maximumf>, %82, %cst_48 [1] : vector<64x64xf32> to vector<64xf32>
    %84 = vector.shape_cast %83 : vector<64xf32> to vector<64x1xf32>
    %85 = vector.broadcast %84 : vector<64x1xf32> to vector<64x64xf32>
    %86 = arith.subf %82, %85 : vector<64x64xf32>
    %87 = math.exp %86 : vector<64x64xf32>
    %cst_49 = arith.constant dense<0.000000e+00> : vector<64xf32>
    %88 = vector.multi_reduction <add>, %87, %cst_49 [1] : vector<64x64xf32> to vector<64xf32>
    %89 = vector.shape_cast %88 : vector<64xf32> to vector<64x1xf32>
    %90 = tpu.reciprocal %89 {approx = true} : vector<64x1xf32> -> vector<64x1xf32>
    %91 = vector.broadcast %90 : vector<64x1xf32> to vector<64x64xf32>
    %92 = arith.mulf %87, %91 : vector<64x64xf32>
    %93 = arith.truncf %92 : vector<64x64xf32> to vector<64x64xbf16>
    %cst_50 = arith.constant dense<0.000000e+00> : vector<64x8xf32>
    %94 = tpu.matmul %93, %79, %cst_50 {dimension_numbers = #tpu.dot_dimension_numbers<[1], [0], [0], [1], [0, 0, 1, 1], [], []>} : vector<64x64xbf16>, vector<64x8xbf16>, vector<64x8xf32> -> vector<64x8xf32>
    %95 = arith.truncf %94 : vector<64x8xf32> to vector<64x8xbf16>
    %c0_51 = arith.constant 0 : index
    %c8 = arith.constant 8 : index
    %96 = vector.load %arg25[%c0_51, %c8] : memref<64x64xbf16, #tpu.memory_space<vmem>>, vector<64x8xbf16>
    tpu.vector_store %arg25[%c0_51, %c8], %95 {strides = array<i32>} : memref<64x64xbf16, #tpu.memory_space<vmem>>, vector<64x8xbf16>,
    %97 = vector.extract_strided_slice %44 {offsets = [0, 16], sizes = [64, 8], strides = [1, 1]} : vector<64x64xbf16> to vector<64x8xbf16>
    %98 = vector.extract_strided_slice %50 {offsets = [0, 16], sizes = [64, 8], strides = [1, 1]} : vector<64x64xbf16> to vector<64x8xbf16>
    %99 = vector.extract_strided_slice %56 {offsets = [0, 16], sizes = [64, 8], strides = [1, 1]} : vector<64x64xbf16> to vector<64x8xbf16>
    %cst_52 = arith.constant dense<0.000000e+00> : vector<64x64xf32>
    %100 = tpu.matmul %97, %98, %cst_52 {dimension_numbers = #tpu.dot_dimension_numbers<[1], [1], [0], [0], [0, 0, 1, 0], [], []>} : vector<64x8xbf16>, vector<64x8xbf16>, vector<64x64xf32> -> vector<64x64xf32>
    %cst_53 = arith.constant 0.353553385 : f32
    %101 = vector.broadcast %cst_53 : f32 to vector<64x64xf32>
    %102 = arith.mulf %100, %101 : vector<64x64xf32>
    %cst_54 = arith.constant dense<0xFF800000> : vector<64xf32>
    %103 = vector.multi_reduction <maximumf>, %102, %cst_54 [1] : vector<64x64xf32> to vector<64xf32>
    %104 = vector.shape_cast %103 : vector<64xf32> to vector<64x1xf32>
    %105 = vector.broadcast %104 : vector<64x1xf32> to vector<64x64xf32>
    %106 = arith.subf %102, %105 : vector<64x64xf32>
    %107 = math.exp %106 : vector<64x64xf32>
    %cst_55 = arith.constant dense<0.000000e+00> : vector<64xf32>
    %108 = vector.multi_reduction <add>, %107, %cst_55 [1] : vector<64x64xf32> to vector<64xf32>
    %109 = vector.shape_cast %108 : vector<64xf32> to vector<64x1xf32>
    %110 = tpu.reciprocal %109 {approx = true} : vector<64x1xf32> -> vector<64x1xf32>
    %111 = vector.broadcast %110 : vector<64x1xf32> to vector<64x64xf32>
    %112 = arith.mulf %107, %111 : vector<64x64xf32>
    %113 = arith.truncf %112 : vector<64x64xf32> to vector<64x64xbf16>
    %cst_56 = arith.constant dense<0.000000e+00> : vector<64x8xf32>
    %114 = tpu.matmul %113, %99, %cst_56 {dimension_numbers = #tpu.dot_dimension_numbers<[1], [0], [0], [1], [0, 0, 1, 1], [], []>} : vector<64x64xbf16>, vector<64x8xbf16>, vector<64x8xf32> -> vector<64x8xf32>
    %115 = arith.truncf %114 : vector<64x8xf32> to vector<64x8xbf16>
    %c0_57 = arith.constant 0 : index
    %c16 = arith.constant 16 : index
    %116 = vector.load %arg25[%c0_57, %c16] : memref<64x64xbf16, #tpu.memory_space<vmem>>, vector<64x8xbf16>
    tpu.vector_store %arg25[%c0_57, %c16], %115 {strides = array<i32>} : memref<64x64xbf16, #tpu.memory_space<vmem>>, vector<64x8xbf16>,
    %117 = vector.extract_strided_slice %44 {offsets = [0, 24], sizes = [64, 8], strides = [1, 1]} : vector<64x64xbf16> to vector<64x8xbf16>
    %118 = vector.extract_strided_slice %50 {offsets = [0, 24], sizes = [64, 8], strides = [1, 1]} : vector<64x64xbf16> to vector<64x8xbf16>
    %119 = vector.extract_strided_slice %56 {offsets = [0, 24], sizes = [64, 8], strides = [1, 1]} : vector<64x64xbf16> to vector<64x8xbf16>
    %cst_58 = arith.constant dense<0.000000e+00> : vector<64x64xf32>
    %120 = tpu.matmul %117, %118, %cst_58 {dimension_numbers = #tpu.dot_dimension_numbers<[1], [1], [0], [0], [0, 0, 1, 0], [], []>} : vector<64x8xbf16>, vector<64x8xbf16>, vector<64x64xf32> -> vector<64x64xf32>
    %cst_59 = arith.constant 0.353553385 : f32
    %121 = vector.broadcast %cst_59 : f32 to vector<64x64xf32>
    %122 = arith.mulf %120, %121 : vector<64x64xf32>
    %cst_60 = arith.constant dense<0xFF800000> : vector<64xf32>
    %123 = vector.multi_reduction <maximumf>, %122, %cst_60 [1] : vector<64x64xf32> to vector<64xf32>
    %124 = vector.shape_cast %123 : vector<64xf32> to vector<64x1xf32>
    %125 = vector.broadcast %124 : vector<64x1xf32> to vector<64x64xf32>
    %126 = arith.subf %122, %125 : vector<64x64xf32>
    %127 = math.exp %126 : vector<64x64xf32>
    %cst_61 = arith.constant dense<0.000000e+00> : vector<64xf32>
    %128 = vector.multi_reduction <add>, %127, %cst_61 [1] : vector<64x64xf32> to vector<64xf32>
    %129 = vector.shape_cast %128 : vector<64xf32> to vector<64x1xf32>
    %130 = tpu.reciprocal %129 {approx = true} : vector<64x1xf32> -> vector<64x1xf32>
    %131 = vector.broadcast %130 : vector<64x1xf32> to vector<64x64xf32>
    %132 = arith.mulf %127, %131 : vector<64x64xf32>
    %133 = arith.truncf %132 : vector<64x64xf32> to vector<64x64xbf16>
    %cst_62 = arith.constant dense<0.000000e+00> : vector<64x8xf32>
    %134 = tpu.matmul %133, %119, %cst_62 {dimension_numbers = #tpu.dot_dimension_numbers<[1], [0], [0], [1], [0, 0, 1, 1], [], []>} : vector<64x64xbf16>, vector<64x8xbf16>, vector<64x8xf32> -> vector<64x8xf32>
    %135 = arith.truncf %134 : vector<64x8xf32> to vector<64x8xbf16>
    %c0_63 = arith.constant 0 : index
    %c24 = arith.constant 24 : index
    %136 = vector.load %arg25[%c0_63, %c24] : memref<64x64xbf16, #tpu.memory_space<vmem>>, vector<64x8xbf16>
    tpu.vector_store %arg25[%c0_63, %c24], %135 {strides = array<i32>} : memref<64x64xbf16, #tpu.memory_space<vmem>>, vector<64x8xbf16>,
    %137 = vector.extract_strided_slice %44 {offsets = [0, 32], sizes = [64, 8], strides = [1, 1]} : vector<64x64xbf16> to vector<64x8xbf16>
    %138 = vector.extract_strided_slice %50 {offsets = [0, 32], sizes = [64, 8], strides = [1, 1]} : vector<64x64xbf16> to vector<64x8xbf16>
    %139 = vector.extract_strided_slice %56 {offsets = [0, 32], sizes = [64, 8], strides = [1, 1]} : vector<64x64xbf16> to vector<64x8xbf16>
    %cst_64 = arith.constant dense<0.000000e+00> : vector<64x64xf32>
    %140 = tpu.matmul %137, %138, %cst_64 {dimension_numbers = #tpu.dot_dimension_numbers<[1], [1], [0], [0], [0, 0, 1, 0], [], []>} : vector<64x8xbf16>, vector<64x8xbf16>, vector<64x64xf32> -> vector<64x64xf32>
    %cst_65 = arith.constant 0.353553385 : f32
    %141 = vector.broadcast %cst_65 : f32 to vector<64x64xf32>
    %142 = arith.mulf %140, %141 : vector<64x64xf32>
    %cst_66 = arith.constant dense<0xFF800000> : vector<64xf32>
    %143 = vector.multi_reduction <maximumf>, %142, %cst_66 [1] : vector<64x64xf32> to vector<64xf32>
    %144 = vector.shape_cast %143 : vector<64xf32> to vector<64x1xf32>
    %145 = vector.broadcast %144 : vector<64x1xf32> to vector<64x64xf32>
    %146 = arith.subf %142, %145 : vector<64x64xf32>
    %147 = math.exp %146 : vector<64x64xf32>
    %cst_67 = arith.constant dense<0.000000e+00> : vector<64xf32>
    %148 = vector.multi_reduction <add>, %147, %cst_67 [1] : vector<64x64xf32> to vector<64xf32>
    %149 = vector.shape_cast %148 : vector<64xf32> to vector<64x1xf32>
    %150 = tpu.reciprocal %149 {approx = true} : vector<64x1xf32> -> vector<64x1xf32>
    %151 = vector.broadcast %150 : vector<64x1xf32> to vector<64x64xf32>
    %152 = arith.mulf %147, %151 : vector<64x64xf32>
    %153 = arith.truncf %152 : vector<64x64xf32> to vector<64x64xbf16>
    %cst_68 = arith.constant dense<0.000000e+00> : vector<64x8xf32>
    %154 = tpu.matmul %153, %139, %cst_68 {dimension_numbers = #tpu.dot_dimension_numbers<[1], [0], [0], [1], [0, 0, 1, 1], [], []>} : vector<64x64xbf16>, vector<64x8xbf16>, vector<64x8xf32> -> vector<64x8xf32>
    %155 = arith.truncf %154 : vector<64x8xf32> to vector<64x8xbf16>
    %c0_69 = arith.constant 0 : index
    %c32 = arith.constant 32 : index
    %156 = vector.load %arg25[%c0_69, %c32] : memref<64x64xbf16, #tpu.memory_space<vmem>>, vector<64x8xbf16>
    tpu.vector_store %arg25[%c0_69, %c32], %155 {strides = array<i32>} : memref<64x64xbf16, #tpu.memory_space<vmem>>, vector<64x8xbf16>,
    %157 = vector.extract_strided_slice %44 {offsets = [0, 40], sizes = [64, 8], strides = [1, 1]} : vector<64x64xbf16> to vector<64x8xbf16>
    %158 = vector.extract_strided_slice %50 {offsets = [0, 40], sizes = [64, 8], strides = [1, 1]} : vector<64x64xbf16> to vector<64x8xbf16>
    %159 = vector.extract_strided_slice %56 {offsets = [0, 40], sizes = [64, 8], strides = [1, 1]} : vector<64x64xbf16> to vector<64x8xbf16>
    %cst_70 = arith.constant dense<0.000000e+00> : vector<64x64xf32>
    %160 = tpu.matmul %157, %158, %cst_70 {dimension_numbers = #tpu.dot_dimension_numbers<[1], [1], [0], [0], [0, 0, 1, 0], [], []>} : vector<64x8xbf16>, vector<64x8xbf16>, vector<64x64xf32> -> vector<64x64xf32>
    %cst_71 = arith.constant 0.353553385 : f32
    %161 = vector.broadcast %cst_71 : f32 to vector<64x64xf32>
    %162 = arith.mulf %160, %161 : vector<64x64xf32>
    %cst_72 = arith.constant dense<0xFF800000> : vector<64xf32>
    %163 = vector.multi_reduction <maximumf>, %162, %cst_72 [1] : vector<64x64xf32> to vector<64xf32>
    %164 = vector.shape_cast %163 : vector<64xf32> to vector<64x1xf32>
    %165 = vector.broadcast %164 : vector<64x1xf32> to vector<64x64xf32>
    %166 = arith.subf %162, %165 : vector<64x64xf32>
    %167 = math.exp %166 : vector<64x64xf32>
    %cst_73 = arith.constant dense<0.000000e+00> : vector<64xf32>
    %168 = vector.multi_reduction <add>, %167, %cst_73 [1] : vector<64x64xf32> to vector<64xf32>
    %169 = vector.shape_cast %168 : vector<64xf32> to vector<64x1xf32>
    %170 = tpu.reciprocal %169 {approx = true} : vector<64x1xf32> -> vector<64x1xf32>
    %171 = vector.broadcast %170 : vector<64x1xf32> to vector<64x64xf32>
    %172 = arith.mulf %167, %171 : vector<64x64xf32>
    %173 = arith.truncf %172 : vector<64x64xf32> to vector<64x64xbf16>
    %cst_74 = arith.constant dense<0.000000e+00> : vector<64x8xf32>
    %174 = tpu.matmul %173, %159, %cst_74 {dimension_numbers = #tpu.dot_dimension_numbers<[1], [0], [0], [1], [0, 0, 1, 1], [], []>} : vector<64x64xbf16>, vector<64x8xbf16>, vector<64x8xf32> -> vector<64x8xf32>
    %175 = arith.truncf %174 : vector<64x8xf32> to vector<64x8xbf16>
    %c0_75 = arith.constant 0 : index
    %c40 = arith.constant 40 : index
    %176 = vector.load %arg25[%c0_75, %c40] : memref<64x64xbf16, #tpu.memory_space<vmem>>, vector<64x8xbf16>
    tpu.vector_store %arg25[%c0_75, %c40], %175 {strides = array<i32>} : memref<64x64xbf16, #tpu.memory_space<vmem>>, vector<64x8xbf16>,
    %177 = vector.extract_strided_slice %44 {offsets = [0, 48], sizes = [64, 8], strides = [1, 1]} : vector<64x64xbf16> to vector<64x8xbf16>
    %178 = vector.extract_strided_slice %50 {offsets = [0, 48], sizes = [64, 8], strides = [1, 1]} : vector<64x64xbf16> to vector<64x8xbf16>
    %179 = vector.extract_strided_slice %56 {offsets = [0, 48], sizes = [64, 8], strides = [1, 1]} : vector<64x64xbf16> to vector<64x8xbf16>
    %cst_76 = arith.constant dense<0.000000e+00> : vector<64x64xf32>
    %180 = tpu.matmul %177, %178, %cst_76 {dimension_numbers = #tpu.dot_dimension_numbers<[1], [1], [0], [0], [0, 0, 1, 0], [], []>} : vector<64x8xbf16>, vector<64x8xbf16>, vector<64x64xf32> -> vector<64x64xf32>
    %cst_77 = arith.constant 0.353553385 : f32
    %181 = vector.broadcast %cst_77 : f32 to vector<64x64xf32>
    %182 = arith.mulf %180, %181 : vector<64x64xf32>
    %cst_78 = arith.constant dense<0xFF800000> : vector<64xf32>
    %183 = vector.multi_reduction <maximumf>, %182, %cst_78 [1] : vector<64x64xf32> to vector<64xf32>
    %184 = vector.shape_cast %183 : vector<64xf32> to vector<64x1xf32>
    %185 = vector.broadcast %184 : vector<64x1xf32> to vector<64x64xf32>
    %186 = arith.subf %182, %185 : vector<64x64xf32>
    %187 = math.exp %186 : vector<64x64xf32>
    %cst_79 = arith.constant dense<0.000000e+00> : vector<64xf32>
    %188 = vector.multi_reduction <add>, %187, %cst_79 [1] : vector<64x64xf32> to vector<64xf32>
    %189 = vector.shape_cast %188 : vector<64xf32> to vector<64x1xf32>
    %190 = tpu.reciprocal %189 {approx = true} : vector<64x1xf32> -> vector<64x1xf32>
    %191 = vector.broadcast %190 : vector<64x1xf32> to vector<64x64xf32>
    %192 = arith.mulf %187, %191 : vector<64x64xf32>
    %193 = arith.truncf %192 : vector<64x64xf32> to vector<64x64xbf16>
    %cst_80 = arith.constant dense<0.000000e+00> : vector<64x8xf32>
    %194 = tpu.matmul %193, %179, %cst_80 {dimension_numbers = #tpu.dot_dimension_numbers<[1], [0], [0], [1], [0, 0, 1, 1], [], []>} : vector<64x64xbf16>, vector<64x8xbf16>, vector<64x8xf32> -> vector<64x8xf32>
    %195 = arith.truncf %194 : vector<64x8xf32> to vector<64x8xbf16>
    %c0_81 = arith.constant 0 : index
    %c48 = arith.constant 48 : index
    %196 = vector.load %arg25[%c0_81, %c48] : memref<64x64xbf16, #tpu.memory_space<vmem>>, vector<64x8xbf16>
    tpu.vector_store %arg25[%c0_81, %c48], %195 {strides = array<i32>} : memref<64x64xbf16, #tpu.memory_space<vmem>>, vector<64x8xbf16>,
    %197 = vector.extract_strided_slice %44 {offsets = [0, 56], sizes = [64, 8], strides = [1, 1]} : vector<64x64xbf16> to vector<64x8xbf16>
    %198 = vector.extract_strided_slice %50 {offsets = [0, 56], sizes = [64, 8], strides = [1, 1]} : vector<64x64xbf16> to vector<64x8xbf16>
    %199 = vector.extract_strided_slice %56 {offsets = [0, 56], sizes = [64, 8], strides = [1, 1]} : vector<64x64xbf16> to vector<64x8xbf16>
    %cst_82 = arith.constant dense<0.000000e+00> : vector<64x64xf32>
    %200 = tpu.matmul %197, %198, %cst_82 {dimension_numbers = #tpu.dot_dimension_numbers<[1], [1], [0], [0], [0, 0, 1, 0], [], []>} : vector<64x8xbf16>, vector<64x8xbf16>, vector<64x64xf32> -> vector<64x64xf32>
    %cst_83 = arith.constant 0.353553385 : f32
    %201 = vector.broadcast %cst_83 : f32 to vector<64x64xf32>
    %202 = arith.mulf %200, %201 : vector<64x64xf32>
    %cst_84 = arith.constant dense<0xFF800000> : vector<64xf32>
    %203 = vector.multi_reduction <maximumf>, %202, %cst_84 [1] : vector<64x64xf32> to vector<64xf32>
    %204 = vector.shape_cast %203 : vector<64xf32> to vector<64x1xf32>
    %205 = vector.broadcast %204 : vector<64x1xf32> to vector<64x64xf32>
    %206 = arith.subf %202, %205 : vector<64x64xf32>
    %207 = math.exp %206 : vector<64x64xf32>
    %cst_85 = arith.constant dense<0.000000e+00> : vector<64xf32>
    %208 = vector.multi_reduction <add>, %207, %cst_85 [1] : vector<64x64xf32> to vector<64xf32>
    %209 = vector.shape_cast %208 : vector<64xf32> to vector<64x1xf32>
    %210 = tpu.reciprocal %209 {approx = true} : vector<64x1xf32> -> vector<64x1xf32>
    %211 = vector.broadcast %210 : vector<64x1xf32> to vector<64x64xf32>
    %212 = arith.mulf %207, %211 : vector<64x64xf32>
    %213 = arith.truncf %212 : vector<64x64xf32> to vector<64x64xbf16>
    %cst_86 = arith.constant dense<0.000000e+00> : vector<64x8xf32>
    %214 = tpu.matmul %213, %199, %cst_86 {dimension_numbers = #tpu.dot_dimension_numbers<[1], [0], [0], [1], [0, 0, 1, 1], [], []>} : vector<64x64xbf16>, vector<64x8xbf16>, vector<64x8xf32> -> vector<64x8xf32>
    %215 = arith.truncf %214 : vector<64x8xf32> to vector<64x8xbf16>
    %c0_87 = arith.constant 0 : index
    %c56 = arith.constant 56 : index
    %216 = vector.load %arg25[%c0_87, %c56] : memref<64x64xbf16, #tpu.memory_space<vmem>>, vector<64x8xbf16>
    tpu.vector_store %arg25[%c0_87, %c56], %215 {strides = array<i32>} : memref<64x64xbf16, #tpu.memory_space<vmem>>, vector<64x8xbf16>,
    %c0_88 = arith.constant 0 : index
    %c0_89 = arith.constant 0 : index
    %217 = vector.load %arg25[%c0_88, %c0_89] : memref<64x64xbf16, #tpu.memory_space<vmem>>, vector<64x64xbf16>
    %c0_90 = arith.constant 0 : index
    %c0_91 = arith.constant 0 : index
    %218 = vector.load %arg16[%c0_90, %c0_91] : memref<64x64xbf16, #tpu.memory_space<vmem>>, vector<64x64xbf16>
    %cst_92 = arith.constant dense<0.000000e+00> : vector<64x64xf32>
    %219 = tpu.matmul %217, %218, %cst_92 {dimension_numbers = #tpu.dot_dimension_numbers<[1], [0], [0], [1], [0, 0, 1, 1], [], []>} : vector<64x64xbf16>, vector<64x64xbf16>, vector<64x64xf32> -> vector<64x64xf32>
    %c0_93 = arith.constant 0 : index
    %c0_94 = arith.constant 0 : index
    %220 = vector.load %arg17[%c0_93, %c0_94] : memref<1x64xf32, #tpu.memory_space<vmem>>, vector<1x64xf32>
    %221 = vector.broadcast %220 : vector<1x64xf32> to vector<64x64xf32>
    %222 = arith.addf %219, %221 : vector<64x64xf32>
    %cst_95 = arith.constant dense<0.000000e+00> : vector<64xf32>
    %223 = vector.multi_reduction <add>, %222, %cst_95 [1] : vector<64x64xf32> to vector<64xf32>
    %224 = vector.shape_cast %223 : vector<64xf32> to vector<64x1xf32>
    %cst_96 = arith.constant 6.400000e+01 : f32
    %225 = vector.broadcast %cst_96 : f32 to vector<64x1xf32>
    %226 = arith.divf %224, %225 : vector<64x1xf32>
    %227 = vector.broadcast %226 : vector<64x1xf32> to vector<64x64xf32>
    %228 = arith.subf %222, %227 : vector<64x64xf32>
    %229 = arith.mulf %228, %228 : vector<64x64xf32>
    %cst_97 = arith.constant dense<0.000000e+00> : vector<64xf32>
    %230 = vector.multi_reduction <add>, %229, %cst_97 [1] : vector<64x64xf32> to vector<64xf32>
    %231 = vector.shape_cast %230 : vector<64xf32> to vector<64x1xf32>
    %cst_98 = arith.constant 6.400000e+01 : f32
    %232 = vector.broadcast %cst_98 : f32 to vector<64x1xf32>
    %233 = arith.divf %231, %232 : vector<64x1xf32>
    %234 = vector.broadcast %226 : vector<64x1xf32> to vector<64x64xf32>
    %235 = arith.subf %222, %234 : vector<64x64xf32>
    %cst_99 = arith.constant 9.99999974E-6 : f32
    %236 = vector.broadcast %cst_99 : f32 to vector<64x1xf32>
    %237 = arith.addf %233, %236 : vector<64x1xf32>
    %238 = math.rsqrt %237 : vector<64x1xf32>
    %239 = vector.broadcast %238 : vector<64x1xf32> to vector<64x64xf32>
    %240 = arith.mulf %235, %239 : vector<64x64xf32>
    %c0_100 = arith.constant 0 : index
    %c0_101 = arith.constant 0 : index
    %241 = vector.load %arg18[%c0_100, %c0_101] : memref<1x64xf32, #tpu.memory_space<vmem>>, vector<1x64xf32>
    %242 = vector.broadcast %241 : vector<1x64xf32> to vector<64x64xf32>
    %243 = arith.mulf %240, %242 : vector<64x64xf32>
    %c0_102 = arith.constant 0 : index
    %c0_103 = arith.constant 0 : index
    %244 = vector.load %arg19[%c0_102, %c0_103] : memref<1x64xf32, #tpu.memory_space<vmem>>, vector<1x64xf32>
    %245 = vector.broadcast %244 : vector<1x64xf32> to vector<64x64xf32>
    %246 = arith.addf %243, %245 : vector<64x64xf32>
    %247 = arith.truncf %246 : vector<64x64xf32> to vector<64x64xbf16>
    %c0_104 = arith.constant 0 : index
    %c0_105 = arith.constant 0 : index
    %248 = vector.load %arg20[%c0_104, %c0_105] : memref<64x256xbf16, #tpu.memory_space<vmem>>, vector<64x256xbf16>
    %cst_106 = arith.constant dense<0.000000e+00> : vector<64x256xf32>
    %249 = tpu.matmul %247, %248, %cst_106 {dimension_numbers = #tpu.dot_dimension_numbers<[1], [0], [0], [1], [0, 0, 1, 1], [], []>} : vector<64x64xbf16>, vector<64x256xbf16>, vector<64x256xf32> -> vector<64x256xf32>
    %c0_107 = arith.constant 0 : index
    %c0_108 = arith.constant 0 : index
    %250 = vector.load %arg21[%c0_107, %c0_108] : memref<1x256xf32, #tpu.memory_space<vmem>>, vector<1x256xf32>
    %251 = vector.broadcast %250 : vector<1x256xf32> to vector<64x256xf32>
    %252 = arith.addf %249, %251 : vector<64x256xf32>
    %cst_109 = arith.constant 0.000000e+00 : f32
    %253 = vector.broadcast %cst_109 : f32 to vector<64x256xf32>
    %254 = arith.maximumf %252, %253 : vector<64x256xf32>
    %255 = arith.truncf %254 : vector<64x256xf32> to vector<64x256xbf16>
    %c0_110 = arith.constant 0 : index
    %c0_111 = arith.constant 0 : index
    %256 = vector.load %arg22[%c0_110, %c0_111] : memref<256x64xbf16, #tpu.memory_space<vmem>>, vector<256x64xbf16>
    %cst_112 = arith.constant dense<0.000000e+00> : vector<64x64xf32>
    %257 = tpu.matmul %255, %256, %cst_112 {dimension_numbers = #tpu.dot_dimension_numbers<[1], [0], [0], [1], [0, 0, 1, 1], [], []>} : vector<64x256xbf16>, vector<256x64xbf16>, vector<64x64xf32> -> vector<64x64xf32>
    %c0_113 = arith.constant 0 : index
    %c0_114 = arith.constant 0 : index
    %258 = vector.load %arg23[%c0_113, %c0_114] : memref<1x64xf32, #tpu.memory_space<vmem>>, vector<1x64xf32>
    %259 = vector.broadcast %258 : vector<1x64xf32> to vector<64x64xf32>
    %260 = arith.addf %257, %259 : vector<64x64xf32>
    %261 = arith.addf %246, %260 : vector<64x64xf32>
    %c0_115 = arith.constant 0 : index
    %c0_116 = arith.constant 0 : index
    %c0_117 = arith.constant 0 : index
    %262 = vector.load %arg24[%c0_115, %c0_116, %c0_117] : memref<1x64x64xf32, #tpu.memory_space<vmem>>, vector<1x64x64xf32>
    %263 = vector.shape_cast %262 : vector<1x64x64xf32> to vector<64x64xf32>
    %264 = vector.shape_cast %261 : vector<64x64xf32> to vector<1x64x64xf32>
    tpu.vector_store %arg24[%c0_115, %c0_116, %c0_117], %264 {strides = array<i32>} : memref<1x64x64xf32, #tpu.memory_space<vmem>>, vector<1x64x64xf32>,
    return
  }
  func.func @transform_0(%arg0: i32) -> (i32, i32, i32) {
    %c0_i32 = arith.constant 0 : i32
    %c0_i32_0 = arith.constant 0 : i32
    %c0_i32_1 = arith.constant 0 : i32
    return %arg0, %c0_i32, %c0_i32_0 : i32, i32, i32
  }
  func.func @transform_1(%arg0: i32) -> (i32, i32) {
    %c0_i32 = arith.constant 0 : i32
    %c0_i32_0 = arith.constant 0 : i32
    %c0_i32_1 = arith.constant 0 : i32
    return %c0_i32, %c0_i32_0 : i32, i32
  }
  func.func @transform_2(%arg0: i32) -> (i32, i32) {
    %c0_i32 = arith.constant 0 : i32
    %c0_i32_0 = arith.constant 0 : i32
    %c0_i32_1 = arith.constant 0 : i32
    return %c0_i32, %c0_i32_0 : i32, i32
  }
  func.func @transform_3(%arg0: i32) -> (i32, i32) {
    %c0_i32 = arith.constant 0 : i32
    %c0_i32_0 = arith.constant 0 : i32
    %c0_i32_1 = arith.constant 0 : i32
    return %c0_i32, %c0_i32_0 : i32, i32
  }
  func.func @transform_4(%arg0: i32) -> (i32, i32) {
    %c0_i32 = arith.constant 0 : i32
    %c0_i32_0 = arith.constant 0 : i32
    %c0_i32_1 = arith.constant 0 : i32
    return %c0_i32, %c0_i32_0 : i32, i32
  }
  func.func @transform_5(%arg0: i32) -> (i32, i32) {
    %c0_i32 = arith.constant 0 : i32
    %c0_i32_0 = arith.constant 0 : i32
    %c0_i32_1 = arith.constant 0 : i32
    return %c0_i32, %c0_i32_0 : i32, i32
  }
  func.func @transform_6(%arg0: i32) -> (i32, i32) {
    %c0_i32 = arith.constant 0 : i32
    %c0_i32_0 = arith.constant 0 : i32
    %c0_i32_1 = arith.constant 0 : i32
    return %c0_i32, %c0_i32_0 : i32, i32
  }
  func.func @transform_7(%arg0: i32) -> (i32, i32) {
    %c0_i32 = arith.constant 0 : i32
    %c0_i32_0 = arith.constant 0 : i32
    %c0_i32_1 = arith.constant 0 : i32
    return %c0_i32, %c0_i32_0 : i32, i32
  }
  func.func @transform_8(%arg0: i32) -> (i32, i32) {
    %c0_i32 = arith.constant 0 : i32
    %c0_i32_0 = arith.constant 0 : i32
    %c0_i32_1 = arith.constant 0 : i32
    return %c0_i32, %c0_i32_0 : i32, i32
  }
  func.func @transform_9(%arg0: i32) -> (i32, i32) {
    %c0_i32 = arith.constant 0 : i32
    %c0_i32_0 = arith.constant 0 : i32
    %c0_i32_1 = arith.constant 0 : i32
    return %c0_i32, %c0_i32_0 : i32, i32
  }
  func.func @transform_10(%arg0: i32) -> (i32, i32) {
    %c0_i32 = arith.constant 0 : i32
    %c0_i32_0 = arith.constant 0 : i32
    %c0_i32_1 = arith.constant 0 : i32
    return %c0_i32, %c0_i32_0 : i32, i32
  }
  func.func @transform_11(%arg0: i32) -> (i32, i32) {
    %c0_i32 = arith.constant 0 : i32
    %c0_i32_0 = arith.constant 0 : i32
    %c0_i32_1 = arith.constant 0 : i32
    return %c0_i32, %c0_i32_0 : i32, i32
  }
  func.func @transform_12(%arg0: i32) -> (i32, i32) {
    %c0_i32 = arith.constant 0 : i32
    %c0_i32_0 = arith.constant 0 : i32
    %c0_i32_1 = arith.constant 0 : i32
    return %c0_i32, %c0_i32_0 : i32, i32
  }
  func.func @transform_13(%arg0: i32) -> (i32, i32) {
    %c0_i32 = arith.constant 0 : i32
    %c0_i32_0 = arith.constant 0 : i32
    %c0_i32_1 = arith.constant 0 : i32
    return %c0_i32, %c0_i32_0 : i32, i32
  }
  func.func @transform_14(%arg0: i32) -> (i32, i32) {
    %c0_i32 = arith.constant 0 : i32
    %c0_i32_0 = arith.constant 0 : i32
    %c0_i32_1 = arith.constant 0 : i32
    return %c0_i32, %c0_i32_0 : i32, i32
  }
  func.func @transform_15(%arg0: i32) -> (i32, i32) {
    %c0_i32 = arith.constant 0 : i32
    %c0_i32_0 = arith.constant 0 : i32
    %c0_i32_1 = arith.constant 0 : i32
    return %c0_i32, %c0_i32_0 : i32, i32
  }
  func.func @transform_16(%arg0: i32) -> (i32, i32) {
    %c0_i32 = arith.constant 0 : i32
    %c0_i32_0 = arith.constant 0 : i32
    %c0_i32_1 = arith.constant 0 : i32
    return %c0_i32, %c0_i32_0 : i32, i32
  }
  func.func @transform_17(%arg0: i32) -> (i32, i32) {
    %c0_i32 = arith.constant 0 : i32
    %c0_i32_0 = arith.constant 0 : i32
    %c0_i32_1 = arith.constant 0 : i32
    return %c0_i32, %c0_i32_0 : i32, i32
  }
  func.func @transform_18(%arg0: i32) -> (i32, i32) {
    %c0_i32 = arith.constant 0 : i32
    %c0_i32_0 = arith.constant 0 : i32
    %c0_i32_1 = arith.constant 0 : i32
    return %c0_i32, %c0_i32_0 : i32, i32
  }
  func.func @transform_19(%arg0: i32) -> (i32, i32) {
    %c0_i32 = arith.constant 0 : i32
    %c0_i32_0 = arith.constant 0 : i32
    %c0_i32_1 = arith.constant 0 : i32
    return %c0_i32, %c0_i32_0 : i32, i32
  }
  func.func @transform_20(%arg0: i32) -> (i32, i32) {
    %c0_i32 = arith.constant 0 : i32
    %c0_i32_0 = arith.constant 0 : i32
    %c0_i32_1 = arith.constant 0 : i32
    return %c0_i32, %c0_i32_0 : i32, i32
  }
  func.func @transform_21(%arg0: i32) -> (i32, i32) {
    %c0_i32 = arith.constant 0 : i32
    %c0_i32_0 = arith.constant 0 : i32
    %c0_i32_1 = arith.constant 0 : i32
    return %c0_i32, %c0_i32_0 : i32, i32
  }
  func.func @transform_22(%arg0: i32) -> (i32, i32) {
    %c0_i32 = arith.constant 0 : i32
    %c0_i32_0 = arith.constant 0 : i32
    %c0_i32_1 = arith.constant 0 : i32
    return %c0_i32, %c0_i32_0 : i32, i32
  }
  func.func @transform_23(%arg0: i32) -> (i32, i32, i32) {
    %c0_i32 = arith.constant 0 : i32
    %c0_i32_0 = arith.constant 0 : i32
    %c0_i32_1 = arith.constant 0 : i32
    return %arg0, %c0_i32, %c0_i32_0 : i32, i32, i32
  }
}

</mosaic_0001>

<bundles_post_ra>
// kernel: attention_projector_forward.2
= control target key start
LH: loop header
LB: loop body
LE: loop exit
PB: predicated region body
PF: predicated region fallthrough
CT: control target
= control target key end

     0   :  { %s2548_s18 = smov 0   ;;  %s3100_s0 = inlined_call_operand.vmem [shape: bf16[2,10,10,32], index: 0, kind: input, shape index: {}]   ;;  %s3101_s1 = inlined_call_operand.vmem [shape: bf16[9,32,32], index: 1, kind: input, shape index: {}]   ;;  %s3102_s2 = inlined_call_operand.vmem [shape: f32[1,32], index: 2, kind: input, shape index: {}]   ;;  %s3103_s3 = inlined_call_operand.vmem [shape: bf16[2,64,32], index: 3, kind: output, shape index: {0}]   ;;  %s3104_s4 = inlined_call_operand.vmem [shape: f32[2,1,32], index: 4, kind: output, shape index: {1}]   ;;  %s3105_s5 = inlined_call_operand.vmem [shape: f32[2,1,32], index: 5, kind: output, shape index: {2}]  }
   0x1 LB: > { %s2067_s19 = sadd.s32 4294967295, %s2516_s18   ;;  %p2071_p0 = scmp.ge.s32.totalorder %s2516_s18, 1  ;;  %s2516_s18 = sphi %s2548_s18, %s16_s18  }
   0x2   : > { %p192_p1 = scmp.lt.s32.totalorder %s2516_s18, 3 }
   0x4   : > { %p193_p2 = pnand %p2071_p0, %p192_p1 }
   0x5   : > { %p226_p3 = scmp.lt.s32.totalorder (!%p193_p2), %s2067_s19, 1 }
   0x6   : > { %196 = sbr.rel (%p193_p2) target bundleno = 335 (0x14f), region = 32 }
   0xb   : > { %v2480_v0 = vld [vmem:[%s3101_s1 + $0x18] sm:$0xff]   ;;  %v2481_v1 = vld [vmem:[%s3101_s1 + $0x10] sm:$0xff]   ;;  %s3111_s19 = smov (!%p226_p3, %s2067_s19), 1  ;;  %v2567_v2 = vld [vmem:[%s3101_s1 + $0x8] sm:$0xff]   ;;  %vm263_vm0 = vsmask.f32 3328 }
   0xc   : > { %2467 = vmatprep.subr.bf16.mxu1 %v2480_v0  ;;  %2359 = vmatprep.subr.bf16.mxu0 %v2480_v0  ;;  %s2471_s26 = smul.u32 80, %s3111_s19  ;;  %v2573_v3 = vld [vmem:[%s3101_s1 + $0x28] sm:$0xff]   ;;  %vm264_vm1 = vsmask.f32 7440  ;;  %vm407_vm2 = vcmask 261120   ;;  %vm618_vm4 = vcmask 1042432   ;;  %s238_s22 = scalar_lea.vmem %s3104_s4, %s3111_s19 }
   0xd   : > { %2469 = vmatpush3.bf16.msra.mxu1 %v2480_v0  ;;  %2360 = vmatpush3.bf16.msra.mxu0 %v2480_v0  ;;  %vm2619_vm3 = vmor %vm263_vm0, %vm264_vm1  ;;  %vm619_vm5 = vcmask 1046532   ;;  %s2296_s14 = sshll.u32 %s3111_s19, 5  ;;  %vm1900_vm7 = vcmask 257024   ;;  %vm1930_vm8 = vcmask 253952   ;;  %s241_s25 = scalar_lea.vmem %s3105_s5, %s3111_s19 }
   0xe   : > { %2468 = vmatprep.subr.bf16.mxu1 %v2481_v1  ;;  %2361 = vmatprep.subr.bf16.mxu0 %v2481_v1  ;;  %s2578_s6 = scalar_lea.vmem %s3100_s0, %s2471_s26  ;;  %vm2683_vm6 = vmor %vm618_vm4, %vm619_vm5  ;;  %s3044_s17 = scalar_lea.vmem %s3103_s3, %s2296_s14 }
   0xf   : > { %v2581_v4 = vld [vmem:[%s2578_s6] sm:$0xf]  ;;  %v2584_v5 = vld [vmem:[%s2578_s6 + $0x8] sm:$0xf]  ;;  %v2587_v6 = vld [vmem:[%s2578_s6 + $0x4] sm:$0x1] }
  0x10   : > { %v2590_v7 = vld [vmem:[%s2578_s6 + $0xc] sm:$0x1]  ;;  %v267_v8 = vshrl.u32 %v2581_v4, 16  ;;  %v270_v9 = vshll.u32 %v2581_v4, 16  ;;  %v276_v10 = vshll.u32 %v2587_v6, 16  ;;  %v281_v11 = vshrl.u32 %v2584_v5, 16 }
  0x11   : > { %2470 = vmatpush3.bf16.msra.mxu1 %v2481_v1  ;;  %2362 = vmatpush3.bf16.msra.mxu0 %v2481_v1  ;;  %v284_v12 = vshll.u32 %v2584_v5, 16  ;;  %v290_v13 = vshll.u32 %v2590_v7, 16  ;;  %v623_v14 = vrot.slane %v2587_v6, 5  ;;  %v627_v15 = vrot.slane %v2590_v7, 5  ;;  %v2603_v16 = vld [vmem:[%s2578_s6 + $0x20] sm:$0xf] }
  0x12   : > { %2371 = vmatprep.subr.bf16.mxu1 %v2567_v2  ;;  %2383 = vmatprep.subr.bf16.mxu0 %v2573_v3  ;;  %v269_v17 = vrot.slane %v267_v8, 4  ;;  %v272_v18 = vrot.slane %v270_v9, 5  ;;  %v278_v19 = vrot.slane %v276_v10, 5  ;;  %v283_v20 = vrot.slane %v281_v11, 4  ;;  %v2606_v21 = vld [vmem:[%s2578_s6 + $0x28] sm:$0xf] }
  0x13   : > { %v286_v22 = vrot.slane %v284_v12, 5  ;;  %v292_v23 = vrot.slane %v290_v13, 5  ;;  %v2609_v24 = vld [vmem:[%s2578_s6 + $0x24] sm:$0x1]  ;;  %v2612_v25 = vld [vmem:[%s2578_s6 + $0x2c] sm:$0x1] }
  0x14   : > { %v273_v26 = vor.u32 %v272_v18, %v269_v17  ;;  %v323_v27 = vshrl.u32 %v2603_v16, 16  ;;  %v326_v28 = vshll.u32 %v2603_v16, 16  ;;  %v332_v29 = vshll.u32 %v2609_v24, 16  ;;  %v2627_v35 = vld [vmem:[%s2578_s6 + $0x10] sm:$0xf]  ;;  %v2484_v7 = vld [vmem:[%s3101_s1] sm:$0xff]  }
  0x15   : > { %v287_v31 = vor.u32 %v286_v22, %v283_v20  ;;  %v337_v32 = vshrl.u32 %v2606_v21, 16  ;;  %v340_v33 = vshll.u32 %v2606_v21, 16  ;;  %v346_v34 = vshll.u32 %v2612_v25, 16  ;;  %v2630_v40 = vld [vmem:[%s2578_s6 + $0x18] sm:$0xf] }
  0x16   : > { %v274_v36 = vrot.slane %v273_v26, 4  ;;  %v325_v37 = vrot.slane %v323_v27, 4  ;;  %v328_v38 = vrot.slane %v326_v28, 5  ;;  %v334_v39 = vrot.slane %v332_v29, 5  ;;  %v2633_v45 = vld [vmem:[%s2578_s6 + $0x14] sm:$0x1] }
  0x17   : > { %v288_v41 = vrot.slane %v287_v31, 4  ;;  %v339_v42 = vrot.slane %v337_v32, 4  ;;  %v342_v43 = vrot.slane %v340_v33, 5  ;;  %v348_v44 = vrot.slane %v346_v34, 5  ;;  %v2642_v52 = vld [vmem:[%s2578_s6 + $0x1c] sm:$0x1] }
  0x18   : > { %v279_v46 = vsel %vm2619_vm3, %v274_v36, %v278_v19  ;;  %v329_v47 = vor.u32 %v328_v38, %v325_v37  ;;  %v639_v48 = vrot.slane %v2609_v24, 5  ;;  %v643_v49 = vrot.slane %v2612_v25, 5  ;;  %v2647_v55 = vld [vmem:[%s2578_s6 + $0x30] sm:$0xf]  ;;  %v2652_v60 = vld [vmem:[%s2578_s6 + $0x34] sm:$0x1] }
  0x19   : > { %v293_v50 = vsel %vm2619_vm3, %v288_v41, %v292_v23  ;;  %v343_v51 = vor.u32 %v342_v43, %v339_v42  ;;  %v295_v53 = vshrl.u32 %v2627_v35, 16  ;;  %v298_v54 = vshll.u32 %v2627_v35, 16  ;;  %v2656_v1 = vld [vmem:[%s2578_s6 + $0x38] sm:$0xf]  ;;  %v2659_v8 = vld [vmem:[%s2578_s6 + $0x3c] sm:$0x1] }
  0x1a   : > { %v2079_v56 = vcombine.low %v279_v46, %v293_v50  ;;  %v330_v57 = vrot.slane %v329_v47, 4  ;;  %v304_v58 = vshll.u32 %v2633_v45, 16  ;;  %v309_v59 = vshrl.u32 %v2630_v40, 16  ;;  %v594_v20 = vld [vmem:[%s2578_s6] sm:$0xe] }
  0x1b   : > { %v344_v61 = vrot.slane %v343_v51, 4  ;;  %v297_v62 = vrot.slane %v295_v53, 4  ;;  %v300_v63 = vrot.slane %v298_v54, 5  ;;  %v312_v0 = vshll.u32 %v2630_v40, 16  ;;  %v595_v28 = vld [vmem:[%s2578_s6 + $0x8] sm:$0xe] }
  0x1c   : > { %2363 = vmatprep.mubr.msk.bf16.mxu0 %vm407_vm2, %v2079_v56  ;;  %v335_v9 = vsel %vm2619_vm3, %v330_v57, %v334_v39  ;;  %v306_v10 = vrot.slane %v304_v58, 5  ;;  %v311_v11 = vrot.slane %v309_v59, 4  ;;  %v318_v12 = vshll.u32 %v2642_v52, 16  ;;  %v596_v34 = vld [vmem:[%s2578_s6 + $0x10] sm:$0xe] }
  0x1d   : > { %v349_v13 = vsel %vm2619_vm3, %v344_v61, %v348_v44  ;;  %v301_v17 = vor.u32 %v300_v63, %v297_v62  ;;  %v314_v18 = vrot.slane %v312_v0, 5  ;;  %v631_v19 = vrot.slane %v2633_v45, 5  ;;  %v597_v45 = vld [vmem:[%s2578_s6 + $0x18] sm:$0xe]  ;;  %v598_v46 = vld [vmem:[%s2578_s6 + $0x20] sm:$0xe] }
  0x1e   : > { %v2081_v22 = vcombine.low %v335_v9, %v349_v13  ;;  %v320_v23 = vrot.slane %v318_v12, 5  ;;  %v635_v26 = vrot.slane %v2642_v52, 5  ;;  %v351_v27 = vshrl.u32 %v2647_v55, 16  ;;  %v599_v53 = vld [vmem:[%s2578_s6 + $0x28] sm:$0xe]  ;;  %v2485_v62 = vld [vmem:[%s3101_s1 + $0x20] sm:$0xff]  }
  0x1f   : > { %v302_v29 = vrot.slane %v301_v17, 4  ;;  %v315_v31 = vor.u32 %v314_v18, %v311_v11  ;;  %v354_v32 = vshll.u32 %v2647_v55, 16  ;;  %v360_v33 = vshll.u32 %v2652_v60, 16  ;;  %v600_v9 = vld [vmem:[%s2578_s6 + $0x30] sm:$0xe] }
  0x20   : > { %2367 = vmatprep.mubr.msk.bf16.mxu1 %vm407_vm2, %v2081_v22  ;;  %v353_v36 = vrot.slane %v351_v27, 4  ;;  %v365_v37 = vshrl.u32 %v2656_v1, 16  ;;  %v368_v38 = vshll.u32 %v2656_v1, 16  ;;  %v374_v39 = vshll.u32 %v2659_v8, 16  ;;  %v2143_v27 = vld [vmem:[%s2578_s6 + $0x8] sm:$0xf] }
  0x21   : > { %v307_v41 = vsel %vm2619_vm3, %v302_v29, %v306_v10  ;;  %v316_v42 = vrot.slane %v315_v31, 4  ;;  %v356_v43 = vrot.slane %v354_v32, 5  ;;  %v362_v47 = vrot.slane %v360_v33, 5  ;;  %v601_v10 = vld [vmem:[%s2578_s6 + $0x38] sm:$0xe] }
  0x22   : > { %v367_v50 = vrot.slane %v365_v37, 4  ;;  %v370_v51 = vrot.slane %v368_v38, 5  ;;  %v2099_v52 = vrot.slane %v594_v20, 9  ;;  %v376_v57 = vrot.slane %v374_v39, 5  ;;  %v2145_v29 = vld [vmem:[%s2578_s6 + $0x10] sm:$0xf] }
  0x23   : > { %v321_v54 = vsel %vm2619_vm3, %v316_v42, %v320_v23  ;;  %v357_v56 = vor.u32 %v356_v43, %v353_v36  ;;  %v2100_v58 = vrot.slane %v595_v28, 9  ;;  %v2101_v0 = vrot.slane %v596_v34, 9  ;;  %v2734_v28 = vld [vmem:[%s2578_s6 + $0xc] sm:$0x1]  ;;  %v2739_v36 = vld [vmem:[%s2578_s6 + $0x14] sm:$0x1] }
  0x24   : > { %v2080_v59 = vcombine.low %v307_v41, %v321_v54  ;;  %v371_v61 = vor.u32 %v370_v51, %v367_v50  ;;  %v624_v63 = vsel %vm2683_vm6, %v2099_v52, %v623_v14  ;;  %v2102_v13 = vrot.slane %v597_v45, 9  ;;  %v2487_v45 = vld [vmem:[%s3101_s1 + $0x38] sm:$0xff]  }
  0x25   : > { %v358_v11 = vrot.slane %v357_v56, 4  ;;  %v628_v12 = vsel %vm2683_vm6, %v2100_v58, %v627_v15  ;;  %v2103_v17 = vrot.slane %v598_v46, 9  ;;  %v632_v6 = vsel %vm2683_vm6, %v2101_v0, %v631_v19  ;;  %v2764_v54 = vld [vmem:[%s2578_s6 + $0x1c] sm:$0x1]  ;;  %v2149_v56 = vld [vmem:[%s2578_s6 + $0x20] sm:$0xf] }
  0x26   : > { %2364 = vmatmul.mubr.msk.bf16.vlgmr.msra.gmra.mxu0 %vm407_vm2, %v2080_v59  ;;  %v372_v18 = vrot.slane %v371_v61, 4  ;;  %v2111_v20 = vcombine.low %v624_v63, %v628_v12  ;;  %v2104_v14 = vrot.slane %v599_v53, 9  ;;  %v2089_v15 = vcombine.low %v2581_v4, %v2584_v5  ;;  %v2147_v53 = vld [vmem:[%s2578_s6 + $0x18] sm:$0xf] }
  0x27   : > { %v363_v22 = vsel %vm2619_vm3, %v358_v11, %v362_v47  ;;  %2384 = vmatpush3.bf16.msra.mxu0 %v2573_v3  ;;  %v636_v23 = vsel %vm2683_vm6, %v2102_v13, %v635_v26  ;;  %v2489_v3 = vld [vmem:[%s3101_s1 + $0x48] sm:$0xff]   ;;  %v640_v4 = vsel %vm2683_vm6, %v2103_v17, %v639_v48  ;;  %v2105_v26 = vrot.slane %v600_v9, 9 }
  0x28   : > { %v377_v19 = vsel %vm2619_vm3, %v372_v18, %v376_v57  ;;  %2385 = vmatprep.subr.bf16.mxu0 %v2485_v62  ;;  %2387 = vmatprep.mubr.msk.bf16.mxu0 %vm407_vm2, %v2111_v20  ;;  %v644_v5 = vsel %vm2683_vm6, %v2104_v14, %v643_v49  ;;  %v2112_v32 = vcombine.low %v632_v6, %v636_v23  ;;  %v647_v33 = vrot.slane %v2652_v60, 5  ;;  %v2772_v57 = vld [vmem:[%s2578_s6 + $0x24] sm:$0x1]  ;;  %v2779_v13 = vld [vmem:[%s3101_s1 + $0x68] sm:$0xff]  }
  0x29   : > { %v2082_v31 = vcombine.low %v363_v22, %v377_v19  ;;  %v2106_v34 = vrot.slane %v601_v10, 9  ;;  %v651_v24 = vrot.slane %v2659_v8, 5  ;;  %v915_v37 = vshrl.u32 %v2143_v27, 16  ;;  %v2493_v8 = vld [vmem:[%s3101_s1 + $0x40] sm:$0xff]   ;;  %v2789_v22 = vld [vmem:[%s3101_s1 + $0x58] sm:$0xff]  }
  0x2a   : > { %v918_v48 = vshll.u32 %v2143_v27, 16  ;;  %v924_v25 = vshll.u32 %v2734_v28, 16  ;;  %v2113_v49 = vcombine.low %v640_v4, %v644_v5  ;;  %v929_v38 = vshrl.u32 %v2145_v29, 16  ;;  %v2151_v27 = vld [vmem:[%s2578_s6 + $0x28] sm:$0xf] }
  0x2b   : > { %2368 = vmatmul.mubr.msk.bf16.vlgmr.msra.gmra.mxu1 %vm407_vm2, %v2082_v31  ;;  %2386 = vmatpush3.bf16.msra.mxu0 %v2485_v62  ;;  %v932_v39 = vshll.u32 %v2145_v29, 16  ;;  %v938_v41 = vshll.u32 %v2739_v36, 16  ;;  %v2091_v60 = vcombine.low %v2603_v16, %v2606_v21  ;;  %v917_v42 = vrot.slane %v915_v37, 4  ;;  %v2794_v4 = vld [vmem:[%s2578_s6 + $0x2c] sm:$0x1] }
  0x2c   : > { %2372 = vmatpush3.bf16.msra.mxu1 %v2567_v2  ;;  %2375 = vmatprep.mubr.msk.bf16.mxu1 %vm407_vm2, %v2089_v15  ;;  %v920_v43 = vrot.slane %v918_v48, 5  ;;  %v926_v2 = vrot.slane %v924_v25, 5  ;;  %v931_v46 = vrot.slane %v929_v38, 4  ;;  %v2090_v21 = vcombine.low %v2627_v35, %v2630_v40  ;;  %v2491_v35 = vld [vmem:[%s3101_s1 + $0x30] sm:$0xff]  }
  0x2d   : > { %2373 = vmatprep.subr.bf16.mxu1 %v2484_v7  ;;  %2407 = vmatprep.subr.bf16.mxu0 %v2489_v3  ;;  %v934_v47 = vrot.slane %v932_v39, 5  ;;  %v940_v16 = vrot.slane %v938_v41, 5  ;;  %v648_v50 = vsel %vm2683_vm6, %v2105_v26, %v647_v33  ;;  %v652_v51 = vsel %vm2683_vm6, %v2106_v34, %v651_v24  ;;  %v2153_v5 = vld [vmem:[%s2578_s6 + $0x30] sm:$0xf]  ;;  %v2798_v26 = vld [vmem:[%s2578_s6 + $0x34] sm:$0x1] }
  0x2e   : > { %2388 = vmatmul.mubr.msk.bf16.vlgmr.msra.gmra.mxu0 %vm407_vm2, %v2112_v32  ;;  %v921_v52 = vor.u32 %v920_v43, %v917_v42  ;;  %v943_v58 = vshrl.u32 %v2147_v53, 16  ;;  %v946_v59 = vshll.u32 %v2147_v53, 16  ;;  %v952_v61 = vshll.u32 %v2764_v54, 16  ;;  %v2494_v41 = vld [vmem:[%s2578_s6 + $0x8] ss:$8 sps:$4 sm:$0xff]  }
  0x2f   : > { %2408 = vmatpush3.bf16.msra.mxu0 %v2489_v3  ;;  %2391 = vmatprep.mubr.msk.bf16.mxu0 %vm407_vm2, %v2113_v49  ;;  %v935_v40 = vor.u32 %v934_v47, %v931_v46  ;;  %v957_v63 = vshrl.u32 %v2149_v56, 16  ;;  %v960_v0 = vshll.u32 %v2149_v56, 16  ;;  %v966_v9 = vshll.u32 %v2772_v57, 16 }
  0x30   : > { %2374 = vmatpush3.bf16.msra.mxu1 %v2484_v7  ;;  %2409 = vmatprep.subr.bf16.mxu0 %v2493_v8  ;;  %v922_v62 = vrot.slane %v921_v52, 4  ;;  %v945_v11 = vrot.slane %v943_v58, 4  ;;  %v948_v12 = vrot.slane %v946_v59, 5  ;;  %v2114_v17 = vcombine.low %v648_v50, %v652_v51  ;;  %v2501_v52 = vld [vmem:[%s3101_s1 + $0x60] sm:$0xff]  }
  0x31   : > { %2395 = vmatprep.subr.bf16.mxu1 %v2487_v45  ;;  %v936_v10 = vrot.slane %v935_v40, 4  ;;  %v959_v20 = vrot.slane %v957_v63, 4  ;;  %v962_v6 = vrot.slane %v960_v0, 5  ;;  %v954_v15 = vrot.slane %v952_v61, 5  ;;  %v2496_v63 = vld [vmem:[%s2578_s6 + $0x18] ss:$8 sps:$4 sm:$0xff]  }
  0x32   : > { %v927_v18 = vsel %vm2619_vm3, %v922_v62, %v926_v2  ;;  %v949_v7 = vor.u32 %v948_v12, %v945_v11  ;;  %v968_v23 = vrot.slane %v966_v9, 5  ;;  %v971_v31 = vshrl.u32 %v2151_v27, 16  ;;  %v2815_v2 = vld [vmem:[%s2578_s6 + $0x3c] sm:$0x1]  ;;  %v2173_v12 = vld [vmem:[%s2578_s6 + $0x8] sm:$0xe] }
  0x33   : > { %2376 = vmatmul.mubr.msk.bf16.vlgmr.msra.gmra.mxu1 %vm407_vm2, %v2090_v21  ;;  %2410 = vmatpush3.bf16.msra.mxu0 %v2493_v8  ;;  %v941_v14 = vsel %vm2619_vm3, %v936_v10, %v940_v16  ;;  %v963_v3 = vor.u32 %v962_v6, %v959_v20  ;;  %v974_v32 = vshll.u32 %v2151_v27, 16  ;;  %v980_v33 = vshll.u32 %v2794_v4, 16  ;;  %v2157_v16 = vld [vmem:[%s2578_s6 + $0x40] sm:$0xf]  ;;  %v2819_v21 = vld [vmem:[%s2578_s6 + $0x44] sm:$0x1] }
  0x34   : > { %2396 = vmatpush3.bf16.msra.mxu1 %v2487_v45  ;;  %2379 = vmatprep.mubr.msk.bf16.mxu1 %vm407_vm2, %v2091_v60  ;;  %v2163_v19 = vcombine.low %v927_v18, %v941_v14  ;;  %v950_v29 = vrot.slane %v949_v7, 4  ;;  %v985_v24 = vshrl.u32 %v2153_v5, 16  ;;  %v988_v37 = vshll.u32 %v2153_v5, 16  ;;  %v2155_v45 = vld [vmem:[%s2578_s6 + $0x38] sm:$0xf] }
  0x35   : > { %2397 = vmatprep.subr.bf16.mxu1 %v2491_v35  ;;  %2431 = vmatprep.subr.bf16.mxu0 %v2779_v13  ;;  %v964_v34 = vrot.slane %v963_v3, 4  ;;  %v994_v48 = vshll.u32 %v2798_v26, 16  ;;  %v2092_v25 = vcombine.low %v2647_v55, %v2656_v1  ;;  %v973_v38 = vrot.slane %v971_v31, 4  ;;  %v2174_v6 = vld [vmem:[%s2578_s6 + $0x10] sm:$0xe] }
  0x36   : > { %2392 = vmatmul.mubr.msk.bf16.gmra.mxu0 %vm407_vm2, %v2114_v17  ;;  %v955_v49 = vsel %vm2619_vm3, %v950_v29, %v954_v15  ;;  %v976_v39 = vrot.slane %v974_v32, 5  ;;  %v987_v8 = vrot.slane %v985_v24, 4  ;;  %v990_v42 = vrot.slane %v988_v37, 5  ;;  %v2498_v7 = vld [vmem:[%s2578_s6 + $0x28] ss:$8 sps:$4 sm:$0xff]  }
  0x37   : > { %2411 = vmatprep.mubr.msk.bf16.mxu0 %vm407_vm2, %v2163_v19  ;;  %v969_v60 = vsel %vm2619_vm3, %v964_v34, %v968_v23  ;;  %v982_v55 = vrot.slane %v980_v33, 5  ;;  %v996_v1 = vrot.slane %v994_v48, 5  ;;  %v999_v50 = vshrl.u32 %v2155_v45, 16  ;;  %v2499_v23 = vld [vmem:[%s3101_s1 + $0x50] sm:$0xff]   ;;  %v2175_v33 = vld [vmem:[%s2578_s6 + $0x18] sm:$0xe] }
  0x38   : > { %2398 = vmatpush3.bf16.msra.mxu1 %v2491_v35  ;;  %v977_v43 = vor.u32 %v976_v39, %v973_v38  ;;  %v2164_v46 = vcombine.low %v955_v49, %v969_v60  ;;  %v991_v47 = vor.u32 %v990_v42, %v987_v8  ;;  %v1002_v51 = vshll.u32 %v2155_v45, 16  ;;  %v2502_v32 = vld [vmem:[%s2578_s6 + $0x10] ss:$8 sps:$4 sm:$0xff]   ;;  %v2850_v34 = vld [vmem:[%s3101_s1 + $0x88] sm:$0xff]  }
  0x39   : > { %2419 = vmatprep.subr.bf16.mxu1 %v2789_v22  ;;  %v1008_v56 = vshll.u32 %v2815_v2, 16  ;;  %v1013_v35 = vshrl.u32 %v2157_v16, 16  ;;  %v1016_v40 = vshll.u32 %v2157_v16, 16  ;;  %v1001_v59 = vrot.slane %v999_v50, 4  ;;  %v2178_v60 = vld [vmem:[%s2578_s6 + $0x30] sm:$0xe] }
  0x3a   : > { %v978_v53 = vrot.slane %v977_v43, 4  ;;  %v992_v58 = vrot.slane %v991_v47, 4  ;;  %v1004_v61 = vrot.slane %v1002_v51, 5  ;;  %v1022_v62 = vshll.u32 %v2819_v21, 16  ;;  %v2500_v42 = vld [vmem:[%s2578_s6 + $0x38] ss:$8 sps:$4 sm:$0xff]  }
  0x3b   : > { %2380 = vmatmul.mubr.msk.bf16.gmra.mxu1 %vm407_vm2, %v2092_v25  ;;  %v1010_v9 = vrot.slane %v1008_v56, 5  ;;  %v1015_v10 = vrot.slane %v1013_v35, 4  ;;  %v1018_v11 = vrot.slane %v1016_v40, 5  ;;  %v2181_v14 = vrot.slane %v2173_v12, 9  ;;  %v2504_v47 = vld [vmem:[%s2578_s6 + $0x20] ss:$8 sps:$4 sm:$0xff]  }
  0x3c   : > { %2399 = vmatprep.mubr.msk.bf16.mxu1 %vm407_vm2, %v2494_v41  ;;  %v983_v0 = vsel %vm2619_vm3, %v978_v53, %v982_v55  ;;  %v997_v17 = vsel %vm2619_vm3, %v992_v58, %v996_v1  ;;  %v1005_v18 = vor.u32 %v1004_v61, %v1001_v59  ;;  %v1024_v20 = vrot.slane %v1022_v62, 5  ;;  %v2177_v41 = vld [vmem:[%s2578_s6 + $0x28] sm:$0xe]  ;;  %v2506_v53 = vld [vmem:[%s2578_s6 + $0x30] ss:$8 sps:$4 sm:$0xff]  }
  0x3d   : > { %v2165_v15 = vcombine.low %v983_v0, %v997_v17  ;;  %v1019_v27 = vor.u32 %v1018_v11, %v1015_v10  ;;  %v1166_v19 = vrot.slane %v2734_v28, 5  ;;  %v2182_v3 = vrot.slane %v2174_v6, 9  ;;  %v2225_v40 = vld [vmem:[%s2578_s6 + $0x10] sm:$0xf]  ;;  %v2227_v61 = vld [vmem:[%s2578_s6 + $0x18] sm:$0xf] }
  0x3e   : > { %2412 = vmatmul.mubr.msk.bf16.vlgmr.msra.gmra.mxu0 %vm407_vm2, %v2164_v46  ;;  %v1006_v5 = vrot.slane %v1005_v18, 4  ;;  %v1170_v29 = vrot.slane %v2739_v36, 5  ;;  %v2183_v24 = vrot.slane %v2175_v33, 9  ;;  %v1174_v37 = vrot.slane %v2764_v54, 5  ;;  %v2180_v46 = vld [vmem:[%s2578_s6 + $0x40] sm:$0xe] }
  0x3f   : > { %2432 = vmatpush3.bf16.msra.mxu0 %v2779_v13  ;;  %2415 = vmatprep.mubr.msk.bf16.mxu0 %vm407_vm2, %v2165_v15  ;;  %v1020_v31 = vrot.slane %v1019_v27, 4  ;;  %v2176_v13 = vld [vmem:[%s2578_s6 + $0x20] sm:$0xe]  ;;  %v1178_v25 = vrot.slane %v2772_v57, 5  ;;  %v1182_v49 = vrot.slane %v2794_v4, 5  ;;  %v1167_v54 = vsel %vm2683_vm6, %v2181_v14, %v1166_v19  ;;  %v2871_v57 = vld [vmem:[%s3101_s1 + $0x78] sm:$0xff]  }
  0x40   : > { %2433 = vmatprep.subr.bf16.mxu0 %v2501_v52  ;;  %v1011_v28 = vsel %vm2619_vm3, %v1006_v5, %v1010_v9  ;;  %v2184_v48 = vrot.slane %v2176_v13, 9  ;;  %v1171_v39 = vsel %vm2683_vm6, %v2182_v3, %v1170_v29  ;;  %v2186_v4 = vrot.slane %v2178_v60, 9  ;;  %v2228_v62 = vld [vmem:[%s2578_s6 + $0x1c] sm:$0x1]  ;;  %v2509_v0 = vld [vmem:[%s3101_s1 + $0x80] sm:$0xff]  }
  0x41   : > { %v1025_v36 = vsel %vm2619_vm3, %v1020_v31, %v1024_v20  ;;  %v1186_v8 = vrot.slane %v2798_v26, 5  ;;  %v2193_v43 = vcombine.low %v1167_v54, %v1171_v39  ;;  %v2880_v55 = vsel %vm2683_vm6, %v2183_v24, %v1174_v37  ;;  %v2179_v26 = vld [vmem:[%s2578_s6 + $0x38] sm:$0xe]  ;;  %v2255_v12 = vld [vmem:[%s2578_s6 + $0x10] sm:$0xe] }
  0x42   : > { %v2166_v38 = vcombine.low %v1011_v28, %v1025_v36  ;;  %v2884_v1 = vsel %vm2683_vm6, %v2184_v48, %v1178_v25  ;;  %v2187_v50 = vrot.slane %v2179_v26, 9  ;;  %v1190_v51 = vrot.slane %v2815_v2, 5  ;;  %v2256_v6 = vld [vmem:[%s2578_s6 + $0x18] sm:$0xe]  ;;  %v2229_v19 = vld [vmem:[%s2578_s6 + $0x20] sm:$0xf] }
  0x43   : > { %2400 = vmatmul.mubr.msk.bf16.vlgmr.msra.gmra.mxu1 %vm407_vm2, %v2496_v63  ;;  %2434 = vmatpush3.bf16.msra.mxu0 %v2501_v52  ;;  %v2895_v16 = vsel %vm2683_vm6, %v2186_v4, %v1186_v8  ;;  %v2188_v52 = vrot.slane %v2180_v46, 9  ;;  %v1194_v56 = vrot.slane %v2819_v21, 5  ;;  %v2194_v58 = vcombine.low %v2880_v55, %v2884_v1  ;;  %v2226_v21 = vld [vmem:[%s2578_s6 + $0x14] sm:$0x1]  ;;  %v2508_v33 = vld [vmem:[%s2578_s6 + $0x40] ss:$8 sps:$4 sm:$0xff]  }
  0x44   : > { %2420 = vmatpush3.bf16.msra.mxu1 %v2789_v22  ;;  %2403 = vmatprep.mubr.msk.bf16.mxu1 %vm407_vm2, %v2498_v7  ;;  %v2185_v22 = vrot.slane %v2177_v41, 9  ;;  %v2903_v35 = vsel %vm2683_vm6, %v2187_v50, %v1190_v51  ;;  %v1458_v9 = vshrl.u32 %v2225_v40, 16  ;;  %v1461_v10 = vshll.u32 %v2225_v40, 16  ;;  %v2231_v37 = vld [vmem:[%s2578_s6 + $0x28] sm:$0xf] }
  0x45   : > { %2421 = vmatprep.subr.bf16.mxu1 %v2499_v23  ;;  %2455 = vmatprep.subr.bf16.mxu0 %v2850_v34  ;;  %v2913_v59 = vsel %vm2683_vm6, %v2188_v52, %v1194_v56  ;;  %v1467_v11 = vshll.u32 %v2226_v21, 16  ;;  %v1472_v17 = vshrl.u32 %v2227_v61, 16  ;;  %v1475_v18 = vshll.u32 %v2227_v61, 16  ;;  %v2232_v25 = vld [vmem:[%s2578_s6 + $0x2c] sm:$0x1] }
  0x46   : > { %2416 = vmatmul.mubr.msk.bf16.gmra.mxu0 %vm407_vm2, %v2166_v38  ;;  %v2888_v45 = vsel %vm2683_vm6, %v2185_v22, %v1182_v49  ;;  %v2196_v63 = vcombine.low %v2903_v35, %v2913_v59  ;;  %v1481_v20 = vshll.u32 %v2228_v62, 16  ;;  %v2263_v14 = vrot.slane %v2255_v12, 9  ;;  %v2257_v4 = vld [vmem:[%s2578_s6 + $0x20] sm:$0xe]  ;;  %v2258_v1 = vld [vmem:[%s2578_s6 + $0x28] sm:$0xe] }
  0x47   : > { %2435 = vmatprep.mubr.msk.bf16.mxu0 %vm407_vm2, %v2502_v32  ;;  %v2195_v2 = vcombine.low %v2888_v45, %v2895_v16  ;;  %v1460_v7 = vrot.slane %v1458_v9, 4  ;;  %v1463_v15 = vrot.slane %v1461_v10, 5  ;;  %v1709_v27 = vrot.slane %v2226_v21, 5  ;;  %v2230_v32 = vld [vmem:[%s2578_s6 + $0x24] sm:$0x1] }
  0x48   : > { %2422 = vmatpush3.bf16.msra.mxu1 %v2499_v23  ;;  %v1469_v23 = vrot.slane %v1467_v11, 5  ;;  %v1474_v3 = vrot.slane %v1472_v17, 4  ;;  %v1477_v5 = vrot.slane %v1475_v18, 5  ;;  %v1483_v29 = vrot.slane %v1481_v20, 5  ;;  %v2233_v16 = vld [vmem:[%s2578_s6 + $0x30] sm:$0xf] }
  0x49   : > { %2443 = vmatprep.subr.bf16.mxu1 %v2871_v57  ;;  %v2264_v31 = vrot.slane %v2256_v6, 9  ;;  %v1464_v13 = vor.u32 %v1463_v15, %v1460_v7  ;;  %v1710_v28 = vsel %vm2683_vm6, %v2263_v14, %v1709_v27  ;;  %v1713_v24 = vrot.slane %v2228_v62, 5  ;;  %v2234_v56 = vld [vmem:[%s2578_s6 + $0x34] sm:$0x1]  ;;  %v2235_v40 = vld [vmem:[%s2578_s6 + $0x38] sm:$0xf] }
  0x4a   : > { %v1486_v36 = vshrl.u32 %v2229_v19, 16  ;;  %v1478_v48 = vor.u32 %v1477_v5, %v1474_v3  ;;  %v1489_v49 = vshll.u32 %v2229_v19, 16  ;;  %v1495_v38 = vshll.u32 %v2230_v32, 16  ;;  %v2236_v11 = vld [vmem:[%s2578_s6 + $0x3c] sm:$0x1] }
  0x4b   : > { %2404 = vmatmul.mubr.msk.bf16.gmra.mxu1 %vm407_vm2, %v2500_v42  ;;  %v1500_v54 = vshrl.u32 %v2231_v37, 16  ;;  %v1465_v39 = vrot.slane %v1464_v13, 4  ;;  %v1714_v41 = vsel %vm2683_vm6, %v2264_v31, %v1713_v24  ;;  %v1503_v22 = vshll.u32 %v2231_v37, 16  ;;  %v2259_v15 = vld [vmem:[%s2578_s6 + $0x30] sm:$0xe] }
  0x4c   : > { %2423 = vmatprep.mubr.msk.bf16.mxu1 %vm407_vm2, %v2193_v43  ;;  %v1488_v60 = vrot.slane %v1486_v36, 4  ;;  %v1479_v8 = vrot.slane %v1478_v48, 4  ;;  %v2275_v42 = vcombine.low %v1710_v28, %v1714_v41  ;;  %v1491_v43 = vrot.slane %v1489_v49, 5  ;;  %v2238_v28 = vld [vmem:[%s2578_s6 + $0x44] sm:$0x1] }
  0x4d   : > { %v1497_v55 = vrot.slane %v1495_v38, 5  ;;  %v1470_v45 = vsel %vm2619_vm3, %v1465_v39, %v1469_v23  ;;  %v1502_v26 = vrot.slane %v1500_v54, 4  ;;  %v1505_v46 = vrot.slane %v1503_v22, 5  ;;  %v2260_v23 = vld [vmem:[%s2578_s6 + $0x38] sm:$0xe] }
  0x4e   : > { %2436 = vmatmul.mubr.msk.bf16.vlgmr.msra.gmra.mxu0 %vm407_vm2, %v2504_v47  ;;  %v1509_v47 = vshll.u32 %v2232_v25, 16  ;;  %v1484_v50 = vsel %vm2619_vm3, %v1479_v8, %v1483_v29  ;;  %v1492_v51 = vor.u32 %v1491_v43, %v1488_v60  ;;  %v2265_v52 = vrot.slane %v2257_v4, 9  ;;  %v2237_v29 = vld [vmem:[%s2578_s6 + $0x40] sm:$0xf]  ;;  %v2239_v48 = vld [vmem:[%s2578_s6 + $0x48] sm:$0xf] }
  0x4f   : > { %2456 = vmatpush3.bf16.msra.mxu0 %v2850_v34  ;;  %2439 = vmatprep.mubr.msk.bf16.mxu0 %vm407_vm2, %v2506_v53  ;;  %v2507_v34 = vld [vmem:[%s3101_s1 + $0x70] sm:$0xff]   ;;  %v1717_v53 = vrot.slane %v2230_v32, 5  ;;  %v2266_v21 = vrot.slane %v2258_v1, 9  ;;  %v1514_v9 = vshrl.u32 %v2233_v16, 16  ;;  %v1517_v12 = vshll.u32 %v2233_v16, 16 }
  0x50   : > { %2457 = vmatprep.subr.bf16.mxu0 %v2509_v0  ;;  %v1493_v61 = vrot.slane %v1492_v51, 4  ;;  %v1523_v17 = vshll.u32 %v2234_v56, 16  ;;  %v1528_v18 = vshrl.u32 %v2235_v40, 16  ;;  %v1531_v7 = vshll.u32 %v2235_v40, 16  ;;  %v2240_v54 = vld [vmem:[%s2578_s6 + $0x4c] sm:$0x1] }
  0x51   : > { %v1718_v62 = vsel %vm2683_vm6, %v2265_v52, %v1717_v53  ;;  %v1516_v14 = vrot.slane %v1514_v9, 4  ;;  %v1519_v3 = vrot.slane %v1517_v12, 5  ;;  %v1537_v13 = vshll.u32 %v2236_v11, 16 }
  0x52   : > { %v1498_v20 = vsel %vm2619_vm3, %v1493_v61, %v1497_v55  ;;  %v1525_v5 = vrot.slane %v1523_v17, 5  ;;  %v1530_v32 = vrot.slane %v1528_v18, 4  ;;  %v2267_v37 = vrot.slane %v2259_v15, 9 }
  0x53   : > { %2424 = vmatmul.mubr.msk.bf16.vlgmr.msra.gmra.mxu1 %vm407_vm2, %v2194_v58  ;;  %2458 = vmatpush3.bf16.msra.mxu0 %v2509_v0  ;;  %v1506_v58 = vor.u32 %v1505_v46, %v1502_v26  ;;  %v1721_v0 = vrot.slane %v2232_v25, 5  ;;  %v1520_v24 = vor.u32 %v1519_v3, %v1516_v14  ;;  %v1725_v36 = vrot.slane %v2234_v56, 5 }
  0x54   : > { %2444 = vmatpush3.bf16.msra.mxu1 %v2871_v57  ;;  %2427 = vmatprep.mubr.msk.bf16.mxu1 %vm407_vm2, %v2195_v2  ;;  %v2245_v57 = vcombine.low %v1470_v45, %v1484_v50  ;;  %v1511_v2 = vrot.slane %v1509_v47, 5  ;;  %v1539_v49 = vrot.slane %v1537_v13, 5  ;;  %v1729_v38 = vrot.slane %v2236_v11, 5  ;;  %v2262_v45 = vld [vmem:[%s2578_s6 + $0x48] sm:$0xe] }
  0x55   : > { %2445 = vmatprep.subr.bf16.mxu1 %v2507_v34  ;;  %v1507_v10 = vrot.slane %v1506_v58, 4  ;;  %v1722_v6 = vsel %vm2683_vm6, %v2266_v21, %v1721_v0  ;;  %v1542_v35 = vshrl.u32 %v2237_v29, 16  ;;  %v1521_v59 = vrot.slane %v1520_v24, 4 }
  0x56   : > { %2440 = vmatmul.mubr.msk.bf16.gmra.mxu0 %vm407_vm2, %v2508_v33  ;;  %v2276_v19 = vcombine.low %v1718_v62, %v1722_v6  ;;  %v1533_v33 = vrot.slane %v1531_v7, 5  ;;  %v1545_v39 = vshll.u32 %v2237_v29, 16  ;;  %v1551_v41 = vshll.u32 %v2238_v28, 16 }
  0x57   : > { %2459 = vmatprep.mubr.msk.bf16.mxu0 %vm407_vm2, %v2275_v42  ;;  %v1512_v27 = vsel %vm2619_vm3, %v1507_v10, %v1511_v2  ;;  %v1544_v4 = vrot.slane %v1542_v35, 4  ;;  %v1556_v8 = vshrl.u32 %v2239_v48, 16  ;;  %v2261_v42 = vld [vmem:[%s2578_s6 + $0x40] sm:$0xe]  ;;  %v1526_v43 = vsel %vm2619_vm3, %v1521_v59, %v1525_v5 }
  0x58   : > { %2446 = vmatpush3.bf16.msra.mxu1 %v2507_v34  ;;  %v2246_v31 = vcombine.low %v1498_v20, %v1512_v27  ;;  %v2268_v34 = vrot.slane %v2260_v23, 9  ;;  %v1534_v25 = vor.u32 %v1533_v33, %v1530_v32  ;;  %v1547_v1 = vrot.slane %v1545_v39, 5 }
  0x59   : > { %v1558_v46 = vrot.slane %v1556_v8, 4  ;;  %v1559_v47 = vshll.u32 %v2239_v48, 16  ;;  %v1565_v16 = vshll.u32 %v2240_v54, 16  ;;  %v2269_v52 = vrot.slane %v2261_v42, 9 }
  0x5a   : > { %v1535_v60 = vrot.slane %v1534_v25, 4  ;;  %v1730_v22 = vsel %vm2683_vm6, %v2268_v34, %v1729_v38  ;;  %v1548_v51 = vor.u32 %v1547_v1, %v1544_v4  ;;  %v1733_v53 = vrot.slane %v2238_v28, 5 }
  0x5b   : > { %2428 = vmatmul.mubr.msk.bf16.gmra.mxu1 %vm407_vm2, %v2196_v63  ;;  %v1726_v63 = vsel %vm2683_vm6, %v2267_v37, %v1725_v36  ;;  %v1553_v56 = vrot.slane %v1551_v41, 5  ;;  %v1561_v40 = vrot.slane %v1559_v47, 5  ;;  %v1737_v58 = vrot.slane %v2240_v54, 5 }
  0x5c   : > { %2447 = vmatprep.mubr.msk.bf16.mxu1 %vm407_vm2, %v2245_v57  ;;  %v2277_v55 = vcombine.low %v1726_v63, %v1730_v22  ;;  %v1540_v26 = vsel %vm2619_vm3, %v1535_v60, %v1539_v49  ;;  %v2270_v57 = vrot.slane %v2262_v45, 9  ;;  %v1549_v2 = vrot.slane %v1548_v51, 4 }
  0x5d   : > { %v2247_v50 = vcombine.low %v1526_v43, %v1540_v26  ;;  %v1734_v21 = vsel %vm2683_vm6, %v2269_v52, %v1733_v53  ;;  %v1562_v61 = vor.u32 %v1561_v40, %v1558_v46  ;;  %v1567_v62 = vrot.slane %v1565_v16, 5 }
  0x5e   : > { %2460 = vmatmul.mubr.msk.bf16.vlgmr.msra.gmra.mxu0 %vm407_vm2, %v2276_v19  ;;  %v1738_v0 = vsel %vm2683_vm6, %v2270_v57, %v1737_v58  ;;  %v1554_v10 = vsel %vm2619_vm3, %v1549_v2, %v1553_v56 }
  0x5f   : > { %2463 = vmatprep.mubr.msk.bf16.mxu0 %vm407_vm2, %v2277_v55  ;;  %v2278_v9 = vcombine.low %v1734_v21, %v1738_v0  ;;  %v1563_v11 = vrot.slane %v1562_v61, 4 }
  0x61   : > { %v1568_v12 = vsel %vm2619_vm3, %v1563_v11, %v1567_v62 }
  0x62   : > { %v2248_v17 = vcombine.low %v1554_v10, %v1568_v12 }
  0x63   : > { %2448 = vmatmul.mubr.msk.bf16.vlgmr.msra.gmra.mxu1 %vm407_vm2, %v2246_v31 }
  0x64   : > { %2451 = vmatprep.mubr.msk.bf16.mxu1 %vm407_vm2, %v2247_v50 }
  0x66   : > { %2464 = vmatmul.mubr.msk.bf16.gmra.mxu0 %vm407_vm2, %v2278_v9 }
  0x6b   : > { %2452 = vmatmul.mubr.msk.bf16.gmra.mxu1 %vm407_vm2, %v2248_v17 }
  0xe6   : > { %v2365_v18 = vpop.f32.mrf.mxu0 }
  0xe8   : > { %v454_v20 = vpop.f32.mrf.mxu0 }
  0xea   : > { %v2366_v6 = vpop.f32.mrf.mxu0 }
  0xeb   : > { %v2369_v14 = vpop.f32.mrf.mxu1 }
  0xec   : > { %v457_v7 = vpop.f32.mrf.mxu0 }
  0xed   : > { %v470_v44 = vpop.f32.mrf.mxu1 }
  0xee   : > { %v2389_v15 = vpop.f32.mrf.mxu0 }
  0xef   : > { %v2370_v23 = vpop.f32.mrf.mxu1 }
  0xf0   : > { %v728_v27 = vpop.f32.mrf.mxu0 }
  0xf1   : > { %v2999_v19 = vpop.f32.mrf.mxu1 }
  0xf2   : > { %v2390_v3 = vpop.f32.mrf.mxu0 }
  0xf3   : > { %v2377_v5 = vpop.f32.mrf.mxu1 }
  0xf4   : > { %v731_v29 = vpop.f32.mrf.mxu0  ;;  %v572_v26 = vadd.f32 %v2377_v5, %v2365_v18 }
  0xf5   : > { %v563_v31 = vpop.f32.mrf.mxu1 }
  0xf6   : > { %v2393_v30 = vpop.f32.mrf.mxu0  ;;  %v564_v16 = vadd.f32 %v563_v31, %v454_v20  ;;  %v761_v52 = vadd.f32 %v2389_v15, %v572_v26 }
  0xf7   : > { %v2378_v32 = vpop.f32.mrf.mxu1 }
  0xf8   : > { %v3001_v33 = vpop.f32.mrf.mxu0  ;;  %v575_v53 = vadd.f32 %v2378_v32, %v2366_v6  ;;  %v759_v57 = vadd.f32 %v728_v27, %v564_v16 }
  0xf9   : > { %v566_v13 = vpop.f32.mrf.mxu1 }
  0xfa   : > { %v3003_v28 = vpop.f32.mrf.mxu0  ;;  %v567_v21 = vadd.f32 %v566_v13, %v457_v7  ;;  %v762_v62 = vadd.f32 %v2390_v3, %v575_v53 }
  0xfb   : > { %v2381_v24 = vpop.f32.mrf.mxu1 }
  0xfc   : > { %v3005_v37 = vpop.f32.mrf.mxu0  ;;  %v588_v10 = vadd.f32 %v2381_v24, %v2369_v14  ;;  %v760_v20 = vadd.f32 %v731_v29, %v567_v21 }
  0xfd   : > { %v579_v36 = vpop.f32.mrf.mxu1 }
  0xfe   : > { %v2413_v34 = vpop.f32.mrf.mxu0  ;;  %v580_v6 = vadd.f32 %v579_v36, %v470_v44 }
  0xff   : > { %v2382_v48 = vpop.f32.mrf.mxu1 }
 0x100   : > { %v1101_v25 = vpop.f32.mrf.mxu0  ;;  %v591_v5 = vadd.f32 %v2382_v48, %v2370_v23  ;;  %v763_v24 = vadd.f32 %v3001_v33, %v580_v6 }
 0x101   : > { %v582_v49 = vpop.f32.mrf.mxu1 }
 0x102   : > { %v2414_v38 = vpop.f32.mrf.mxu0  ;;  %v583_v7 = vadd.f32 %v582_v49, %v2999_v19  ;;  %v766_v29 = vadd.f32 %v3003_v28, %v591_v5  ;;  %v3033_v28 = vld [vmem:[%s3102_s2] ss:$0 sm:$0xff] }
 0x103   : > { %v2401_v35 = vpop.f32.mrf.mxu1 }
 0x104   : > { %v1104_v59 = vpop.f32.mrf.mxu0  ;;  %v892_v58 = vadd.f32 %v2401_v35, %v761_v52  ;;  %v765_v35 = vadd.f32 %v2393_v30, %v588_v10  ;;  %v764_v48 = vadd.f32 %v3005_v37, %v583_v7 }
 0x105   : > { %v859_v63 = vpop.f32.mrf.mxu1 }
 0x106   : > { %v3007_v54 = vpop.f32.mrf.mxu0  ;;  %v890_v0 = vadd.f32 %v859_v63, %v759_v57  ;;  %v1134_v12 = vadd.f32 %v2413_v34, %v892_v58 }
 0x107   : > { %v2402_v39 = vpop.f32.mrf.mxu1 }
 0x108   : > { %v3009_v41 = vpop.f32.mrf.mxu0  ;;  %v893_v17 = vadd.f32 %v2402_v39, %v762_v62  ;;  %v1132_v27 = vadd.f32 %v1101_v25, %v890_v0 }
 0x109   : > { %v862_v60 = vpop.f32.mrf.mxu1 }
 0x10a   : > { %v3011_v22 = vpop.f32.mrf.mxu0  ;;  %v891_v3 = vadd.f32 %v862_v60, %v760_v20  ;;  %v1135_v63 = vadd.f32 %v2414_v38, %v893_v17 }
 0x10b   : > { %v2405_v4 = vpop.f32.mrf.mxu1 }
 0x10c   : > { %v3013_v8 = vpop.f32.mrf.mxu0  ;;  %v896_v34 = vadd.f32 %v2405_v4, %v765_v35  ;;  %v1133_v30 = vadd.f32 %v1104_v59, %v891_v3 }
 0x10d   : > { %v875_v42 = vpop.f32.mrf.mxu1 }
 0x10e   : > { %v2437_v43 = vpop.f32.mrf.mxu0  ;;  %v894_v25 = vadd.f32 %v875_v42, %v763_v24  ;;  %v1138_v16 = vadd.f32 %v3007_v54, %v896_v34 }
 0x10f   : > { %v2406_v55 = vpop.f32.mrf.mxu1 }
 0x110   : > { %v1402_v1 = vpop.f32.mrf.mxu0  ;;  %v897_v49 = vadd.f32 %v2406_v55, %v766_v29  ;;  %v1136_v42 = vadd.f32 %v3009_v41, %v894_v25 }
 0x111   : > { %v878_v45 = vpop.f32.mrf.mxu1 }
 0x112   : > { %v2438_v46 = vpop.f32.mrf.mxu0  ;;  %v895_v33 = vadd.f32 %v878_v45, %v764_v48  ;;  %v1139_v52 = vadd.f32 %v3011_v22, %v897_v49 }
 0x113   : > { %v2425_v47 = vpop.f32.mrf.mxu1 }
 0x114   : > { %v3015_v50 = vpop.f32.mrf.mxu0  ;;  %v1304_v31 = vadd.f32 %v2425_v47, %v1134_v12  ;;  %v1137_v57 = vadd.f32 %v3013_v8, %v895_v33 }
 0x115   : > { %v1271_v51 = vpop.f32.mrf.mxu1 }
 0x116   : > { %v3017_v56 = vpop.f32.mrf.mxu0  ;;  %v1302_v26 = vadd.f32 %v1271_v51, %v1132_v27  ;;  %v1435_v44 = vadd.f32 %v2437_v43, %v1304_v31 }
 0x117   : > { %v2426_v40 = vpop.f32.mrf.mxu1 }
 0x118   : > { %v3019_v2 = vpop.f32.mrf.mxu0  ;;  %v1305_v36 = vadd.f32 %v2426_v40, %v1135_v63  ;;  %v1433_v60 = vadd.f32 %v1402_v1, %v1302_v26 }
 0x119   : > { %v1274_v61 = vpop.f32.mrf.mxu1 }
 0x11a   : > { %v3021_v9 = vpop.f32.mrf.mxu0  ;;  %v1303_v4 = vadd.f32 %v1274_v61, %v1133_v30  ;;  %v1436_v51 = vadd.f32 %v2438_v46, %v1305_v36 }
 0x11b   : > { %v2429_v11 = vpop.f32.mrf.mxu1 }
 0x11c   : > { %v3023_v18 = vpop.f32.mrf.mxu0  ;;  %v1308_v55 = vadd.f32 %v2429_v11, %v1138_v16  ;;  %v1434_v58 = vadd.f32 %v3015_v50, %v1303_v4 }
 0x11d   : > { %v1287_v15 = vpop.f32.mrf.mxu1 }
 0x11e   : > { %v2461_v32 = vpop.f32.mrf.mxu0  ;;  %v1306_v46 = vadd.f32 %v1287_v15, %v1136_v42  ;;  %v1439_v62 = vadd.f32 %v3017_v56, %v1308_v55 }
 0x11f   : > { %v2430_v13 = vpop.f32.mrf.mxu1 }
 0x120   : > { %v1814_v14 = vpop.f32.mrf.mxu0  ;;  %v1309_v21 = vadd.f32 %v2430_v13, %v1139_v52  ;;  %v1437_v15 = vadd.f32 %v3019_v2, %v1306_v46 }
 0x121   : > { %v1290_v39 = vpop.f32.mrf.mxu1 }
 0x122   : > { %v2462_v23 = vpop.f32.mrf.mxu0  ;;  %v1307_v0 = vadd.f32 %v1290_v39, %v1137_v57  ;;  %v1440_v5 = vadd.f32 %v3021_v9, %v1309_v21 }
 0x123   : > { %v2449_v19 = vpop.f32.mrf.mxu1 }
 0x124   : > { %v1677_v38 = vadd.f32 %v2449_v19, %v1435_v44  ;;  %v1817_v47 = vpop.f32.mrf.mxu0  ;;  %v1438_v27 = vadd.f32 %v3023_v18, %v1307_v0 }
 0x125   : > { %v1644_v43 = vpop.f32.mrf.mxu1 }
 0x126   : > { %v1847_v37 = vadd.f32 %v2461_v32, %v1677_v38  ;;  %v1675_v59 = vadd.f32 %v1644_v43, %v1433_v60  ;;  %v2465_v40 = vpop.f32.mrf.mxu0 }
 0x127   : > { %v2450_v1 = vpop.f32.mrf.mxu1 }
 0x128   : > { %v1862_v54 = vadd.f32 %v3033_v28, %v1847_v37  ;;  %v1845_v45 = vadd.f32 %v1814_v14, %v1675_v59  ;;  %v1678_v53 = vadd.f32 %v2450_v1, %v1436_v51  ;;  %v1830_v12 = vpop.f32.mrf.mxu0 }
 0x129   : > { %v1647_v41 = vpop.f32.mrf.mxu1 }
 0x12a   : > { %v2299_v22 = vpack.c.bf16 %v1862_v54, %v1862_v54  ;;  %v1860_v61 = vadd.f32 %v3033_v28, %v1845_v45  ;;  %v1848_v8 = vadd.f32 %v2462_v23, %v1678_v53  ;;  %v1676_v10 = vadd.f32 %v1647_v41, %v1434_v58  ;;  %v2466_v14 = vpop.f32.mrf.mxu0 }
 0x12b   : > { %v2453_v11 = vpop.f32.mrf.mxu1  ;;  %v1912_v7 = vsel %vm407_vm2, %v1862_v54, 0.0  ;;  %v1934_v3 = vmul.f32 %v1862_v54, %v1862_v54 }
 0x12c   : > { %1903 = vst.msk [vmem:[%s3044_s17 + $0x8] sm:$0xf] %vm1900_vm7, %v2299_v22  ;;  %v2297_v50 = vpack.c.bf16 %v1860_v61, %v1860_v61  ;;  %v1863_v17 = vadd.f32 %v3033_v28, %v1848_v8  ;;  %v1846_v20 = vadd.f32 %v1817_v47, %v1676_v10  ;;  %v1681_v6 = vadd.f32 %v2453_v11, %v1439_v62  ;;  %v1833_v47 = vpop.f32.mrf.mxu0 }
 0x12d   : > { %v1660_v56 = vpop.f32.mrf.mxu1  ;;  %v1932_v31 = vmul.f32 %v1860_v61, %v1860_v61  ;;  %v1909_v2 = vsel %vm407_vm2, %v1860_v61, 0.0  ;;  %v1943_v19 = vsel %vm407_vm2, %v1934_v3, 0.0 }
 0x12e   : > { %1901 = vst.msk [vmem:[%s3044_s17] sm:$0xf] %vm1900_vm7, %v2297_v50  ;;  %v2300_v32 = vpack.c.bf16 %v1863_v17, %v1863_v17  ;;  %v1861_v35 = vadd.f32 %v3033_v28, %v1846_v20  ;;  %v1851_v13 = vadd.f32 %v2465_v40, %v1681_v6  ;;  %v1679_v63 = vadd.f32 %v1660_v56, %v1437_v15 }
 0x12f   : > { %v2454_v26 = vpop.f32.mrf.mxu1  ;;  %v1940_v23 = vsel %vm407_vm2, %v1932_v31, 0.0  ;;  %v1935_v48 = vmul.f32 %v1863_v17, %v1863_v17  ;;  %v1914_v16 = vsel %vm407_vm2, %v1863_v17, 0.0 }
 0x130   : > { %1904 = vst.msk [vmem:[%s3044_s17 + $0xc] sm:$0xf] %vm1900_vm7, %v2300_v32  ;;  %v2298_v9 = vpack.c.bf16 %v1861_v35, %v1861_v35  ;;  %v1910_v24 = vsel %vm407_vm2, %v1861_v35, 0.0  ;;  %v1933_v18 = vmul.f32 %v1861_v35, %v1861_v35  ;;  %v1866_v39 = vadd.f32 %v3033_v28, %v1851_v13 }
 0x131   : > { %v1911_v34 = vadd.f32 %v1910_v24, %v1909_v2  ;;  %v1849_v29 = vadd.f32 %v1830_v12, %v1679_v63  ;;  %v1682_v44 = vadd.f32 %v2454_v26, %v1440_v5  ;;  %v1663_v36 = vpop.f32.mrf.mxu1  ;;  %v1945_v59 = vsel %vm407_vm2, %v1935_v48, 0.0 }
 0x132   : > { %1902 = vst.msk [vmem:[%s3044_s17 + $0x4] sm:$0xf] %vm1900_vm7, %v2298_v9  ;;  %v1941_v30 = vsel %vm407_vm2, %v1933_v18, 0.0  ;;  %v1680_v25 = vadd.f32 %v1663_v36, %v1438_v27  ;;  %v2303_v38 = vpack.c.bf16 %v1866_v39, %v1866_v39  ;;  %v1938_v41 = vmul.f32 %v1866_v39, %v1866_v39 }
 0x133   : > { %v1913_v49 = vadd.f32 %v1912_v7, %v1911_v34  ;;  %v1942_v60 = vadd.f32 %v1941_v30, %v1940_v23  ;;  %v1864_v33 = vadd.f32 %v3033_v28, %v1849_v29  ;;  %v1852_v4 = vadd.f32 %v2466_v14, %v1682_v44 }
 0x134   : > { %v1850_v43 = vadd.f32 %v1833_v47, %v1680_v25  ;;  %1907 = vst.msk [vmem:[%s3044_s17 + $0x18] sm:$0xf] %vm1900_vm7, %v2303_v38  ;;  %v1920_v62 = vsel %vm407_vm2, %v1866_v39, 0.0  ;;  %v1951_v50 = vsel %vm407_vm2, %v1938_v41, 0.0 }
 0x135   : > { %v1944_v51 = vadd.f32 %v1943_v19, %v1942_v60  ;;  %v1915_v37 = vadd.f32 %v1914_v16, %v1913_v49  ;;  %v2301_v42 = vpack.c.bf16 %v1864_v33, %v1864_v33  ;;  %v1916_v55 = vsel %vm407_vm2, %v1864_v33, 0.0 }
 0x136   : > { %v1936_v1 = vmul.f32 %v1864_v33, %v1864_v33  ;;  %v1867_v45 = vadd.f32 %v3033_v28, %v1852_v4  ;;  %v1865_v53 = vadd.f32 %v3033_v28, %v1850_v43 }
 0x137   : > { %v1917_v52 = vadd.f32 %v1916_v55, %v1915_v37  ;;  %v1946_v54 = vadd.f32 %v1945_v59, %v1944_v51  ;;  %1905 = vst.msk [vmem:[%s3044_s17 + $0x10] sm:$0xf] %vm1900_vm7, %v2301_v42 }
 0x138   : > { %v1947_v40 = vsel %vm407_vm2, %v1936_v1, 0.0  ;;  %v2304_v58 = vpack.c.bf16 %v1867_v45, %v1867_v45  ;;  %v2302_v46 = vpack.c.bf16 %v1865_v53, %v1865_v53  ;;  %v1918_v21 = vsel %vm407_vm2, %v1865_v53, 0.0 }
 0x139   : > { %v1948_v57 = vadd.f32 %v1947_v40, %v1946_v54  ;;  %v1937_v22 = vmul.f32 %v1865_v53, %v1865_v53  ;;  %v1919_v61 = vadd.f32 %v1918_v21, %v1917_v52  ;;  %v1939_v0 = vmul.f32 %v1867_v45, %v1867_v45 }
 0x13a   : > { %1908 = vst.msk [vmem:[%s3044_s17 + $0x1c] sm:$0xf] %vm1900_vm7, %v2304_v58  ;;  %1906 = vst.msk [vmem:[%s3044_s17 + $0x14] sm:$0xf] %vm1900_vm7, %v2302_v46  ;;  %v1922_v11 = vsel %vm407_vm2, %v1867_v45, 0.0 }
 0x13b   : > { %v1949_v28 = vsel %vm407_vm2, %v1937_v22, 0.0  ;;  %v1921_v8 = vadd.f32 %v1920_v62, %v1919_v61  ;;  %v1953_v20 = vsel %vm407_vm2, %v1939_v0, 0.0 }
 0x13c   : > { %v1950_v10 = vadd.f32 %v1949_v28, %v1948_v57 }
 0x13d   : > { %v1923_v12 = vadd.f32 %v1922_v11, %v1921_v8 }
 0x13e   : > { %v1952_v17 = vadd.f32 %v1951_v50, %v1950_v10 }
 0x13f   : > { %v1924_v6 = vrot.slane %v1923_v12, 4 }
 0x140   : > { %v1954_v15 = vadd.f32 %v1953_v20, %v1952_v17 }
 0x141   : > { %v1925_v5 = vadd.f32 %v1924_v6, %v1923_v12 }
 0x142   : > { %v1955_v56 = vrot.slane %v1954_v15, 4 }
 0x143   : > { %v1926_v27 = vrot.slane %v1925_v5, 2 }
 0x144   : > { %v1956_v31 = vadd.f32 %v1955_v56, %v1954_v15 }
 0x145   : > { %v1927_v32 = vadd.f32 %v1926_v27, %v1925_v5 }
 0x146   : > { %v1957_v35 = vrot.slane %v1956_v31, 2 }
 0x147   : > { %v1928_v7 = vrot.slane %v1927_v32, 1 }
 0x148   : > { %v1958_v3 = vadd.f32 %v1957_v35, %v1956_v31 }
 0x149   : > { %v1929_v13 = vadd.f32 %v1928_v7, %v1927_v32 }
 0x14a   : > { %v1959_v63 = vrot.slane %v1958_v3, 1 }
 0x14b   : > { %1931 = vst.msk [vmem:[%s238_s22] sm:$0x1] %vm1930_vm8, %v1929_v13 }
 0x14c   : > { %v1960_v26 = vadd.f32 %v1959_v63, %v1958_v3 }
 0x14e   : > { %1961 = vst.msk [vmem:[%s241_s25] sm:$0x1] %vm1930_vm8, %v1960_v26 }
 0x14f PF: > { %s16_s18 = sadd.s32 1, %s2516_s18  }
 0x150   : > { %p13_p4 = scmp.ge.s32.totalorder %s16_s18, 4  }
 0x152   :  { %15 = sbr.rel (!%p13_p4) target bundleno = 1 (0x1), region = 96 }

// kernel: attention_projector_forward.3
= control target key start
LH: loop header
LB: loop body
LE: loop exit
PB: predicated region body
PF: predicated region fallthrough
CT: control target
= control target key end

     0   :  { %s7603_s0 = inlined_call_operand.vmem [shape: bf16[2,64,32], index: 0, kind: input, shape index: {}]   ;;  %s7604_s1 = inlined_call_operand.vmem [shape: f32[1,32], index: 1, kind: input, shape index: {}]   ;;  %s7605_s2 = inlined_call_operand.vmem [shape: f32[1,32], index: 2, kind: input, shape index: {}]   ;;  %s7606_s3 = inlined_call_operand.vmem [shape: f32[1,32], index: 3, kind: input, shape index: {}]   ;;  %s7607_s4 = inlined_call_operand.vmem [shape: f32[1,32], index: 4, kind: input, shape index: {}]   ;;  %s7608_s5 = inlined_call_operand.vmem [shape: f32[64,32], index: 5, kind: input, shape index: {}]   ;;  %s7609_s6 = inlined_call_operand.vmem [shape: bf16[64,64], index: 6, kind: input, shape index: {}]   ;;  %s7610_s7 = inlined_call_operand.vmem [shape: bf16[64,64], index: 7, kind: input, shape index: {}]   ;;  %s7611_s8 = inlined_call_operand.vmem [shape: f32[1,64], index: 8, kind: input, shape index: {}]   ;;  %s7612_s9 = inlined_call_operand.vmem [shape: bf16[64,64], index: 9, kind: input, shape index: {}]   ;;  %s7613_s10 = inlined_call_operand.vmem [shape: f32[1,64], index: 10, kind: input, shape index: {}]   ;;  %s7614_s11 = inlined_call_operand.vmem [shape: bf16[32,64], index: 11, kind: input, shape index: {}]   ;;  %s7615_s12 = inlined_call_operand.vmem [shape: f32[1,64], index: 12, kind: input, shape index: {}]   ;;  %s7616_s13 = inlined_call_operand.vmem [shape: bf16[32,64], index: 13, kind: input, shape index: {}]   ;;  %s7617_s14 = inlined_call_operand.vmem [shape: f32[1,64], index: 14, kind: input, shape index: {}]   ;;  %s7618_s15 = inlined_call_operand.vmem [shape: bf16[64,64], index: 15, kind: input, shape index: {}]   ;;  %s7619_s16 = inlined_call_operand.vmem [shape: f32[1,64], index: 16, kind: input, shape index: {}]   ;;  %s7620_s17 = inlined_call_operand.vmem [shape: f32[1,64], index: 17, kind: input, shape index: {}]   ;;  %s7621_s18 = inlined_call_operand.vmem [shape: f32[1,64], index: 18, kind: input, shape index: {}]   ;;  %s7622_s19 = inlined_call_operand.vmem [shape: bf16[64,256], index: 19, kind: input, shape index: {}]   ;;  %s7623_s20 = inlined_call_operand.vmem [shape: f32[1,256], index: 20, kind: input, shape index: {}]   ;;  %s7624_s21 = inlined_call_operand.vmem [shape: bf16[256,64], index: 21, kind: input, shape index: {}]   ;;  %s7625_s22 = inlined_call_operand.vmem [shape: f32[1,64], index: 22, kind: input, shape index: {}]   ;;  %s7626_s23 = inlined_call_operand.hbm [shape: f32[2,64,64], index: 23, kind: output, shape index: {}]  }
   0x1   :  { %7642 = sst [smem:[#allocation28_spill]] %s7603_s0 }
   0x2   :  { %7643 = sst [smem:[#allocation29_spill]] %s7604_s1 }
   0x3   :  { %7644 = sst [smem:[#allocation30_spill]] %s7605_s2 }
   0x4   :  { %7645 = sst [smem:[#allocation31_spill]] %s7606_s3 }
   0x5   :  { %7646 = sst [smem:[#allocation32_spill]] %s7607_s4 }
   0x6   :  { %7647 = sst [smem:[#allocation33_spill]] %s7608_s5 }
   0x7   :  { %7648 = sst [smem:[#allocation34_spill]] %s7609_s6 }
   0x8   :  { %7649 = sst [smem:[#allocation35_spill]] %s7610_s7 }
   0x9   :  { %7650 = sst [smem:[#allocation36_spill]] %s7611_s8 }
   0xa   :  { %7651 = sst [smem:[#allocation37_spill]] %s7626_s23 }
   0xb   :  { %28 = vsyncpa [#allocation4], 0 }
   0xc   :  { %30 = vsyncpa [#allocation4 + $0x1], 0  ;;  %s6253_s4 = smov 0   ;;  %s6255_s30 = smov 0  }
   0xd   :  { %s6257_s24 = smov 0   ;;  %s6259_s25 = smov 0  }
   0xe LB: > { %7652 = sst [smem:[#allocation6_spill]] %s6102_s4  ;;  %s6274_s5 = sadd.s32 4294967295, %s6114_s25   ;;  %s6114_s25 = sphi %s6259_s25, %s7706_s25   ;;  %s6110_s24 = sphi %s6257_s24, %s7708_s24   ;;  %s6106_s30 = sphi %s6255_s30, %s7710_s30   ;;  %s6102_s4 = sphi %s6253_s4, %s7709_s4  }
   0xf   : > { %7653 = sst [smem:[#allocation7_spill]] %s6110_s24  ;;  %s4803_s1 = sadd.s32 4294967294, %s6114_s25  }
  0x10   : > { %7654 = sst [smem:[#allocation8_spill]] %s6114_s25  ;;  %s6278_s26 = sadd.s32 1, %s6114_s25  }
  0x11   : > { %7655 = sst [smem:[#allocation9_spill]] %s6278_s26  ;;  %s531_s2 = sadd.s32 1, %s6110_s24 }
  0x12   : > { %s528_s6 = ssub.s32 %s6114_s25, %s6278_s26  ;;  %p541_p0 = scmp.ne.s32.totalorder %s6110_s24, %s6106_s30 }
  0x13   : > { %p529_p1 = scmp.eq.s32.totalorder %s528_s6, 0  ;;  %p542_p2 = scmp.eq.s32.totalorder %s6274_s5, 1 }
  0x14   : > { %p547_p3 = scmp.ne.s32.totalorder %s6106_s30, %s6102_s4  ;;  %p548_p4 = scmp.eq.s32.totalorder %s4803_s1, 1 }
  0x15   : > { %s6289_s27 = scalar_select %p529_p1, %s6110_s24, %s531_s2  }
  0x16   : > { %p6291_p5 = por %p542_p2, %p541_p0  ;;  %p6295_p6 = por %p548_p4, %p547_p3 }
  0x17   : > { %7656 = sst [smem:[#allocation10_spill]] %s6289_s27  ;;  %p4806_p7 = scmp.ge.s32.totalorder %s6114_s25, 1 }
  0x18   : > { %s7658_s28 = scalar_select %p6295_p6, 1, 0 }
  0x19   : > { %p640_p8 = scmp.lt.s32.totalorder %s6114_s25, 3 }
  0x1a   : > { %7659 = sst [smem:[#allocation11_spill]] %s7658_s28 }
  0x1b   : > { %p641_p9 = pnand %p4806_p7, %p640_p8 }
  0x1d   : > { %644 = sbr.rel (%p641_p9) target bundleno = 6218 (0x184a), region = 112 }
  0x22   : > { %s7660_s0 = sld [smem:[#allocation35_spill]]  ;;  %vm875_vm0 = vcmask 523264   ;;  %v5736_v5 = vld [vmem:[%s7614_s11 + $0x8] sm:$0xff]   ;;  %p704_p10 = scmp.lt.s32.totalorder %s6274_s5, 1  ;;  %v5737_v6 = vld [vmem:[%s7614_s11] sm:$0xff]   ;;  %v736_v11 = vlaneseq  ;;  %v5738_v17 = vld [vmem:[%s7612_s9 + $0x18] sm:$0xff]  }
  0x23   : > { %s7661_s28 = sld [smem:[#allocation34_spill]]  ;;  %5345 = vmatprep.subr.bf16.mxu0 %v5736_v5  ;;  %vm1108_vm1 = vcmask 261120   ;;  %vm1282_vm2 = vcmask 64512   ;;  %s6116_s27 = smov 120   ;;  %vm1581_vm3 = vcmask 60416   ;;  %vm1944_vm4 = vcmask 126016  }
  0x24   : > { %s7662_s4 = sld [smem:[#allocation29_spill]]  ;;  %5346 = vmatpush3.bf16.msra.mxu0 %v5736_v5  ;;  %v6337_v16 = vshrl.u32 %v736_v11, 7  ;;  %s6120_s6 = smov 88   ;;  %vm2295_vm5 = vcmask 191616   ;;  %vm2646_vm6 = vcmask 257216   ;;  %vm2997_vm7 = vcmask 322816  }
  0x25   : > { %s7663_s29 = sld [smem:[#allocation30_spill]]  ;;  %5347 = vmatprep.subr.bf16.mxu0 %v5737_v6  ;;  %s6122_s26 = smov 72   ;;  %vm3348_vm8 = vcmask 388416   ;;  %vm3699_vm9 = vcmask 454016   ;;  %vm4050_vm10 = vcmask 519616  }
  0x26   : > { %s705_s3 = scalar_select %p704_p10, %s6274_s5, 1  ;;  %7664 = vst [vmem:[#allocation12_spill] sm:$0xff] %v6337_v16  ;;  %v6351_v22 = vsub.s32 0, %v6337_v16 }
  0x27   : > { %s7667_s25 = sld [smem:[#allocation31_spill]] }
  0x28   : > { %v5728_v0 = vld [vmem:[%s7660_s0 + $0x18] sm:$0xff]   ;;  %v5729_v1 = vld [vmem:[%s7660_s0 + $0x10] sm:$0xff]   ;;  %v5730_v2 = vld [vmem:[%s7660_s0 + $0x8] sm:$0xff]   ;;  %5348 = vmatpush3.bf16.msra.mxu0 %v5737_v6  ;;  %s5024_s23 = sshll.u32 %s705_s3, 5  ;;  %s7665_s3 = sld [smem:[#allocation28_spill]]  ;;  %7666 = vst [vmem:[#allocation13_spill] sm:$0xff] %v6351_v22 }
  0x29   : > { %5313 = vmatprep.subr.bf16.mxu1 %v5728_v0  ;;  %v5732_v3 = vld [vmem:[%s7661_s28] sm:$0xff]   ;;  %v5733_v13 = vld [vmem:[%s7661_s28 + $0x8] sm:$0xff]   ;;  %v5734_v14 = vld [vmem:[%s7661_s28 + $0x10] sm:$0xff]   ;;  %s7668_s24 = sld [smem:[#allocation32_spill]] }
  0x2a   : > { %5314 = vmatpush3.bf16.msra.mxu1 %v5728_v0  ;;  %5321 = vmatprep.mubr.msk.bf16.mxu1 %vm875_vm0, %v5732_v3  ;;  %v5731_v4 = vld [vmem:[%s7660_s0] sm:$0xff]   ;;  %v5735_v20 = vld [vmem:[%s7661_s28 + $0x18] sm:$0xff]   ;;  %s7669_s1 = sld [smem:[#allocation33_spill]] }
  0x2b   : > { %5315 = vmatprep.subr.bf16.mxu1 %v5729_v1  ;;  %v710_v7 = vld [vmem:[%s7662_s4] sm:$0x1]  ;;  %s7670_s8 = sld [smem:[#allocation36_spill]]  ;;  %s6117_s4 = smov 112  }
  0x2c   : > { %v712_v8 = vld [vmem:[%s7663_s29] sm:$0x1]  ;;  %v711_v9 = vmul.f32 0.0078125, %v710_v7  ;;  %s7639_s29 = smov 8  }
  0x2d   : > { %v713_v10 = vmul.f32 0.0078125, %v712_v8  ;;  %v749_v28 = vld [vmem:[%s7667_s25] sm:$0x1]  ;;  %s6118_s25 = smov 104  }
  0x2e   : > { %5316 = vmatpush3.bf16.msra.mxu1 %v5729_v1  ;;  %v714_v12 = vmul.f32 %v711_v9, %v711_v9  ;;  %s708_s2 = scalar_lea.vmem %s7665_s3, %s5024_s23  ;;  %v739_v27 = vrot.slane %v711_v9, %v6351_v22  ;;  %s6119_s23 = smov 96  }
  0x2f   : > { %5317 = vmatprep.subr.bf16.mxu1 %v5730_v2  ;;  %v5091_v21 = vld [vmem:[%s708_s2] sm:$0xff]   ;;  %v5106_v23 = vld [vmem:[%s708_s2 + $0x8] sm:$0xff]   ;;  %v5107_v24 = vld [vmem:[%s708_s2 + $0x10] sm:$0xff]   ;;  %s6124_s3 = smov 16  }
  0x30   : > { %v715_v15 = vsub.f32 %v713_v10, %v714_v12  ;;  %v5108_v25 = vld [vmem:[%s708_s2 + $0x18] sm:$0xff]   ;;  %v5092_v26 = vunpack.c.l.bf16 %v5091_v21  ;;  %v5093_v29 = vunpack.c.h.bf16 %v5091_v21  ;;  %v5096_v30 = vunpack.c.l.bf16 %v5106_v23  ;;  %v4810_v47 = vld [vmem:[%s7668_s24] ss:$0 sm:$0xff]  ;;  %v789_v61 = vld [vmem:[%s7669_s1 + $0x8] sm:$0xff]  ;;  %s6121_s24 = smov 80   ;;  %s6125_s2 = smov 24  }
  0x31   : > { %v5097_v31 = vunpack.c.h.bf16 %v5106_v23  ;;  %v5100_v32 = vunpack.c.l.bf16 %v5107_v24  ;;  %v5101_v33 = vunpack.c.h.bf16 %v5107_v24  ;;  %v5104_v34 = vunpack.c.l.bf16 %v5108_v25  ;;  %v788_v58 = vld [vmem:[%s7669_s1] sm:$0xff]  ;;  %v790_v62 = vld [vmem:[%s7669_s1 + $0x10] sm:$0xff]  ;;  %v791_v63 = vld [vmem:[%s7669_s1 + $0x18] sm:$0xff] }
  0x32   : > { %5318 = vmatpush3.bf16.msra.mxu1 %v5730_v2  ;;  %v716_v18 = vmax.f32 %v715_v15, 0.0  ;;  %v5105_v35 = vunpack.c.h.bf16 %v5108_v25  ;;  %v741_v37 = vsub.f32 %v5092_v26, %v739_v27  ;;  %v742_v38 = vsub.f32 %v5093_v29, %v739_v27  ;;  %v792_v8 = vld [vmem:[%s7669_s1 + $0x20] sm:$0xff]  ;;  %v793_v9 = vld [vmem:[%s7669_s1 + $0x28] sm:$0xff]  ;;  %v794_v24 = vld [vmem:[%s7669_s1 + $0x30] sm:$0xff] }
  0x33   : > { %5319 = vmatprep.subr.bf16.mxu1 %v5731_v4  ;;  %v743_v40 = vsub.f32 %v5096_v30, %v739_v27  ;;  %v744_v41 = vsub.f32 %v5097_v31, %v739_v27  ;;  %v745_v42 = vsub.f32 %v5100_v32, %v739_v27  ;;  %v746_v43 = vsub.f32 %v5101_v33, %v739_v27  ;;  %v795_v25 = vld [vmem:[%s7669_s1 + $0x38] sm:$0xff]  ;;  %v5739_v30 = vld [vmem:[%s7612_s9 + $0x10] sm:$0xff]   ;;  %v5740_v31 = vld [vmem:[%s7612_s9 + $0x8] sm:$0xff]  }
  0x34   : > { %v717_v19 = vadd.f32 1e-05, %v716_v18  ;;  %v747_v44 = vsub.f32 %v5104_v34, %v739_v27  ;;  %v748_v45 = vsub.f32 %v5105_v35, %v739_v27  ;;  %v5741_v32 = vld [vmem:[%s7612_s9] sm:$0xff]  }
  0x35   : > { %v4811_v35 = vld [vmem:[%s7670_s8] ss:$0 sm:$0xff] }
  0x36   : > { %5320 = vmatpush3.bf16.msra.mxu1 %v5731_v4  ;;  %5780 = vrsqrt.f32 %v717_v19 }
  0x37   : > { %5329 = vmatprep.subr.bf16.mxu1 %v5738_v17 }
  0x39   : > { %5322 = vmatmul.mubr.msk.bf16.vlgmr.msra.gmra.mxu1 %vm875_vm0, %v5733_v13 }
  0x3a   : > { %5325 = vmatprep.mubr.msk.bf16.mxu1 %vm875_vm0, %v5734_v14  ;;  %5330 = vmatpush3.bf16.msra.mxu1 %v5738_v17 }
  0x3b   : > { %5331 = vmatprep.subr.bf16.mxu1 %v5739_v30 }
  0x3e   : > { %5332 = vmatpush3.bf16.msra.mxu1 %v5739_v30 }
  0x3f   : > { %5333 = vmatprep.subr.bf16.mxu1 %v5740_v31 }
  0x41   : > { %5326 = vmatmul.mubr.msk.bf16.gmra.mxu1 %vm875_vm0, %v5735_v20 }
  0x42   : > { %5334 = vmatpush3.bf16.msra.mxu1 %v5740_v31  ;;  %v4824_v31 = vld [vmem:[%s7613_s10] ss:$0 sm:$0xff] }
  0x43   : > { %v5781_v36 = vpop.eup %5780  ;;  %5335 = vmatprep.subr.bf16.mxu1 %v5741_v32 }
  0x44   : > { %v750_v39 = vmul.f32 %v5781_v36, %v749_v28 }
  0x46   : > { %v755_v46 = vrot.slane %v750_v39, %v6351_v22  ;;  %5336 = vmatpush3.bf16.msra.mxu1 %v5741_v32 }
  0x48   : > { %v757_v48 = vmul.f32 %v755_v46, %v741_v37  ;;  %v758_v49 = vmul.f32 %v755_v46, %v742_v38  ;;  %v759_v50 = vmul.f32 %v755_v46, %v743_v40  ;;  %v760_v51 = vmul.f32 %v755_v46, %v744_v41 }
  0x49   : > { %v761_v52 = vmul.f32 %v755_v46, %v745_v42  ;;  %v762_v53 = vmul.f32 %v755_v46, %v746_v43  ;;  %v763_v54 = vmul.f32 %v755_v46, %v747_v44  ;;  %v764_v55 = vmul.f32 %v755_v46, %v748_v45 }
  0x4a   : > { %v772_v56 = vadd.f32 %v4810_v47, %v757_v48  ;;  %v773_v57 = vadd.f32 %v4810_v47, %v758_v49  ;;  %v774_v59 = vadd.f32 %v4810_v47, %v759_v50  ;;  %v775_v60 = vadd.f32 %v4810_v47, %v760_v51 }
  0x4b   : > { %v776_v0 = vadd.f32 %v4810_v47, %v761_v52  ;;  %v777_v1 = vadd.f32 %v4810_v47, %v762_v53  ;;  %v778_v2 = vadd.f32 %v4810_v47, %v763_v54  ;;  %v779_v3 = vadd.f32 %v4810_v47, %v764_v55 }
  0x4c   : > { %v780_v4 = vmax.f32 %v772_v56, 0.0  ;;  %v781_v5 = vmax.f32 %v773_v57, 0.0  ;;  %v782_v6 = vmax.f32 %v774_v59, 0.0  ;;  %v783_v7 = vmax.f32 %v775_v60, 0.0 }
  0x4d   : > { %v784_v10 = vmax.f32 %v776_v0, 0.0  ;;  %v785_v11 = vmax.f32 %v777_v1, 0.0  ;;  %v786_v19 = vmax.f32 %v778_v2, 0.0  ;;  %v787_v20 = vmax.f32 %v779_v3, 0.0  ;;  %v4833_v2 = vld [vmem:[%s7615_s12] ss:$0 sm:$0xff] }
  0x4e   : > { %v796_v12 = vadd.f32 %v788_v58, %v780_v4  ;;  %v797_v13 = vadd.f32 %v789_v61, %v781_v5  ;;  %v798_v14 = vadd.f32 %v790_v62, %v782_v6  ;;  %v799_v15 = vadd.f32 %v791_v63, %v783_v7 }
  0x4f   : > { %v800_v17 = vadd.f32 %v792_v8, %v784_v10  ;;  %v801_v18 = vadd.f32 %v793_v9, %v785_v11  ;;  %v802_v27 = vadd.f32 %v794_v24, %v786_v19  ;;  %v803_v28 = vadd.f32 %v795_v25, %v787_v20 }
  0x50   : > { %v804_v21 = vpack.c.bf16 %v797_v13, %v796_v12  ;;  %v6380_v23 = vpack.c.bf16 %v799_v15, %v798_v14 }
  0x51   : > { %v6388_v26 = vpack.c.bf16 %v801_v18, %v800_v17  ;;  %v6395_v29 = vpack.c.bf16 %v803_v28, %v802_v27 }
  0x52   : > { %5349 = vmatprep.mubr.msk.bf16.mxu0 %vm1108_vm1, %v804_v21 }
  0x53   : > { %5350 = vmatmul.mubr.msk.bf16.vlgmr.msra.gmra.mxu0 %vm1108_vm1, %v6380_v23 }
  0x54   : > { %5353 = vmatprep.mubr.msk.bf16.mxu0 %vm1108_vm1, %v6388_v26 }
  0x5b   : > { %5354 = vmatmul.mubr.msk.bf16.gmra.mxu0 %vm1108_vm1, %v6395_v29 }
  0xf9   : > { %v5323_v33 = vpop.f32.mrf.mxu1 }
  0xfa   : > { %v931_v39 = vadd.f32 %v5323_v33, %v4811_v35 }
  0xfb   : > { %v922_v34 = vpop.f32.mrf.mxu1 }
  0xfc   : > { %v923_v37 = vadd.f32 %v4811_v35, %v922_v34  ;;  %v955_v46 = vmax.f32 %v931_v39, 0.0 }
  0xfd   : > { %v5324_v36 = vpop.f32.mrf.mxu1 }
  0xfe   : > { %v934_v38 = vadd.f32 %v5324_v36, %v4811_v35  ;;  %v953_v44 = vmax.f32 %v923_v37, 0.0 }
  0xff   : > { %v925_v40 = vpop.f32.mrf.mxu1 }
 0x100   : > { %v926_v41 = vadd.f32 %v4811_v35, %v925_v40  ;;  %v956_v42 = vmax.f32 %v934_v38, 0.0 }
 0x101   : > { %v5327_v43 = vpop.f32.mrf.mxu1 }
 0x102   : > { %v954_v45 = vmax.f32 %v926_v41, 0.0  ;;  %v947_v47 = vadd.f32 %v5327_v43, %v4811_v35  ;;  %v962_v51 = vpack.c.bf16 %v956_v42, %v955_v46 }
 0x103   : > { %v938_v48 = vpop.f32.mrf.mxu1 }
 0x104   : > { %v961_v49 = vpack.c.bf16 %v954_v45, %v953_v44  ;;  %v939_v50 = vadd.f32 %v4811_v35, %v938_v48  ;;  %v959_v54 = vmax.f32 %v947_v47, 0.0 }
 0x105   : > { %v5328_v52 = vpop.f32.mrf.mxu1 }
 0x106   : > { %v950_v53 = vadd.f32 %v5328_v52, %v4811_v35  ;;  %5337 = vmatprep.mubr.msk.bf16.mxu1 %vm875_vm0, %v961_v49  ;;  %v957_v56 = vmax.f32 %v939_v50, 0.0  ;;  %v5742_v49 = vld [vmem:[%s7616_s13 + $0x8] sm:$0xff]   ;;  %v5743_v50 = vld [vmem:[%s7616_s13] sm:$0xff]  }
 0x107   : > { %v941_v55 = vpop.f32.mrf.mxu1  ;;  %5338 = vmatmul.mubr.msk.bf16.vlgmr.msra.gmra.mxu1 %vm875_vm0, %v962_v51  ;;  %5357 = vmatprep.subr.bf16.mxu1 %v5742_v49 }
 0x108   : > { %v960_v57 = vmax.f32 %v950_v53, 0.0  ;;  %v942_v58 = vadd.f32 %v4811_v35, %v941_v55  ;;  %5358 = vmatpush3.bf16.msra.mxu1 %v5742_v49 }
 0x109   : > { %5359 = vmatprep.subr.bf16.mxu1 %v5743_v50 }
 0x10a   : > { %v958_v59 = vmax.f32 %v942_v58, 0.0  ;;  %v964_v60 = vpack.c.bf16 %v960_v57, %v959_v54 }
 0x10c   : > { %v963_v61 = vpack.c.bf16 %v958_v59, %v957_v56  ;;  %5360 = vmatpush3.bf16.msra.mxu1 %v5743_v50 }
 0x10e   : > { %5341 = vmatprep.mubr.msk.bf16.mxu1 %vm875_vm0, %v963_v61 }
 0x10f   : > { %5342 = vmatmul.mubr.msk.bf16.gmra.mxu1 %vm875_vm0, %v964_v60 }
 0x110   : > { %5361 = vmatprep.mubr.msk.bf16.mxu1 %vm1108_vm1, %v804_v21 }
 0x113   : > { %v5351_v62 = vpop.f32.mrf.mxu0 }
 0x114   : > { %v1164_v14 = vadd.f32 %v5351_v62, %v4833_v2 }
 0x115   : > { %v1155_v63 = vpop.f32.mrf.mxu0 }
 0x116   : > { %v1156_v19 = vadd.f32 %v4833_v2, %v1155_v63 }
 0x117   : > { %v5352_v0 = vpop.f32.mrf.mxu0  ;;  %5362 = vmatmul.mubr.msk.bf16.vlgmr.msra.gmra.mxu1 %vm1108_vm1, %v6380_v23 }
 0x118   : > { %v1167_v15 = vadd.f32 %v5352_v0, %v4833_v2  ;;  %5365 = vmatprep.mubr.msk.bf16.mxu1 %vm1108_vm1, %v6388_v26 }
 0x119   : > { %v1158_v1 = vpop.f32.mrf.mxu0 }
 0x11a   : > { %v6429_v17 = vpack.c.bf16 %v1167_v15, %v1164_v14  ;;  %v1159_v20 = vadd.f32 %v4833_v2, %v1158_v1 }
 0x11b   : > { %v5355_v3 = vpop.f32.mrf.mxu0 }
 0x11c   : > { %v1180_v5 = vadd.f32 %v5355_v3, %v4833_v2  ;;  %v6435_v21 = vpack.c.bf16 %v1159_v20, %v1156_v19  ;;  %v1299_v24 = vsel %vm1282_vm2, %v6429_v17, 0 }
 0x11d   : > { %v1171_v4 = vpop.f32.mrf.mxu0 }
 0x11e   : > { %v1172_v7 = vadd.f32 %v4833_v2, %v1171_v4  ;;  %v1296_v25 = vsel %vm1282_vm2, %v6435_v21, 0 }
 0x11f   : > { %v5356_v6 = vpop.f32.mrf.mxu0  ;;  %5366 = vmatmul.mubr.msk.bf16.gmra.mxu1 %vm1108_vm1, %v6395_v29 }
 0x120   : > { %v1183_v8 = vadd.f32 %v5356_v6, %v4833_v2 }
 0x121   : > { %v1174_v9 = vpop.f32.mrf.mxu0 }
 0x122   : > { %v6419_v10 = vpack.c.bf16 %v1183_v8, %v1180_v5  ;;  %v1175_v11 = vadd.f32 %v4833_v2, %v1174_v9 }
 0x124   : > { %5641 = vmatprep.subr.msk.bf16.mxu0 %vm1282_vm2, %v6419_v10  ;;  %v1305_v12 = vsel %vm1282_vm2, %v6419_v10, 0  ;;  %v6425_v13 = vpack.c.bf16 %v1175_v11, %v1172_v7 }
 0x125   : > { %5370 = vmatpush3.bf16.xpose.msra.mxu0 %v1305_v12 }
 0x126   : > { %5642 = vmatprep.subr.msk.bf16.mxu0 %vm1282_vm2, %v6425_v13  ;;  %v1302_v18 = vsel %vm1282_vm2, %v6425_v13, 0 }
 0x12d   : > { %5372 = vmatpush3.bf16.xpose.msra.mxu0 %v1302_v18 }
 0x12e   : > { %5643 = vmatprep.subr.msk.bf16.mxu0 %vm1282_vm2, %v6429_v17 }
 0x135   : > { %5374 = vmatpush3.bf16.xpose.msra.mxu0 %v1299_v24 }
 0x136   : > { %5644 = vmatprep.subr.msk.bf16.mxu0 %vm1282_vm2, %v6435_v21 }
 0x13d   : > { %5376 = vmatpush3.bf16.xpose.msra.mxu0 %v1296_v25 }
 0x1c7   : > { %v5339_v27 = vpop.f32.mrf.mxu1 }
 0x1c8   : > { %v1059_v36 = vadd.f32 %v5339_v27, %v4824_v31 }
 0x1c9   : > { %v1050_v28 = vpop.f32.mrf.mxu1 }
 0x1ca   : > { %v1051_v34 = vadd.f32 %v4824_v31, %v1050_v28 }
 0x1cb   : > { %v5340_v30 = vpop.f32.mrf.mxu1 }
 0x1cc   : > { %v1062_v32 = vadd.f32 %v5340_v30, %v4824_v31 }
 0x1cd   : > { %v1053_v33 = vpop.f32.mrf.mxu1 }
 0x1ce   : > { %v1054_v35 = vadd.f32 %v4824_v31, %v1053_v33  ;;  %v6448_v39 = vpack.c.bf16 %v1062_v32, %v1059_v36 }
 0x1cf   : > { %v5343_v37 = vpop.f32.mrf.mxu1 }
 0x1d0   : > { %v6446_v38 = vpack.c.bf16 %v1054_v35, %v1051_v34  ;;  %v1075_v41 = vadd.f32 %v5343_v37, %v4824_v31 }
 0x1d1   : > { %v1066_v40 = vpop.f32.mrf.mxu1 }
 0x1d2   : > { %5377 = vmatprep.mubr.msk.bf16.mxu0 %vm1282_vm2, %v6446_v38  ;;  %v1067_v43 = vadd.f32 %v4824_v31, %v1066_v40 }
 0x1d3   : > { %v5344_v42 = vpop.f32.mrf.mxu1  ;;  %5378 = vmatmul.mubr.msk.bf16.vlgmr.msra.gmra.mxu0 %vm1282_vm2, %v6448_v39 }
 0x1d4   : > { %v1078_v44 = vadd.f32 %v5344_v42, %v4824_v31 }
 0x1d5   : > { %v1069_v45 = vpop.f32.mrf.mxu1 }
 0x1d6   : > { %v1070_v46 = vadd.f32 %v4824_v31, %v1069_v45  ;;  %v6454_v47 = vpack.c.bf16 %v1078_v44, %v1075_v41 }
 0x1d7   : > { %v5363_v30 = vpop.f32.mrf.mxu1 }
 0x1d8   : > { %v6456_v48 = vpack.c.bf16 %v1070_v46, %v1067_v43 }
 0x1d9   : > { %v1247_v34 = vpop.f32.mrf.mxu1 }
 0x1da   : > { %5381 = vmatprep.mubr.msk.bf16.mxu0 %vm1282_vm2, %v6456_v48 }
 0x1db   : > { %5382 = vmatmul.mubr.msk.bf16.gmra.mxu0 %vm1282_vm2, %v6454_v47  ;;  %v5364_v42 = vpop.f32.mrf.mxu1 }
 0x1dd   : > { %v1250_v49 = vpop.f32.mrf.mxu1 }
 0x293   : > { %v5379_v51 = vpop.f32.mrf.mxu0 }
 0x294   : > { %v1374_v52 = vmul.f32 0.35355338, %v5379_v51  ;;  %v5367_v51 = vpop.f32.mrf.mxu1 }
 0x295   : > { %v1341_v53 = vpop.f32.mrf.mxu0 }
 0x296   : > { %v1372_v54 = vmul.f32 0.35355338, %v1341_v53  ;;  %v1386_v55 = vsel %vm875_vm0, %v1374_v52, -inf }
 0x297   : > { %1387 = vmax.xlane.f32.xlu1 %v1386_v55  ;;  %v5380_v56 = vpop.f32.mrf.mxu0 }
 0x298   : > { %v1375_v57 = vmul.f32 0.35355338, %v5380_v56  ;;  %v1380_v58 = vsel %vm875_vm0, %v1372_v54, -inf }
 0x299   : > { %1381 = vmax.xlane.f32.xlu0 %v1380_v58  ;;  %v1344_v59 = vpop.f32.mrf.mxu0 }
 0x29a   : > { %v1373_v23 = vmul.f32 0.35355338, %v1344_v59  ;;  %v1389_v60 = vsel %vm875_vm0, %v1375_v57, -inf }
 0x29b   : > { %1390 = vmax.xlane.f32.xlu1 %v1389_v60  ;;  %v5383_v26 = vpop.f32.mrf.mxu0 }
 0x29c   : > { %v1383_v29 = vsel %vm875_vm0, %v1373_v23, -inf  ;;  %v1378_v62 = vmul.f32 0.35355338, %v5383_v26 }
 0x29d   : > { %1384 = vmax.xlane.f32.xlu0 %v1383_v29  ;;  %v1357_v61 = vpop.f32.mrf.mxu0 }
 0x29e   : > { %v1376_v63 = vmul.f32 0.35355338, %v1357_v61  ;;  %v1398_v5 = vsel %vm875_vm0, %v1378_v62, -inf }
 0x29f   : > { %v5384_v0 = vpop.f32.mrf.mxu0 }
 0x2a0   : > { %v1392_v1 = vsel %vm875_vm0, %v1376_v63, -inf  ;;  %v6479_v3 = vmul.f32 0.35355338, %v5384_v0 }
 0x2a1   : > { %1393 = vmax.xlane.f32.xlu0 %v1392_v1  ;;  %v1360_v2 = vpop.f32.mrf.mxu0 }
 0x2a2   : > { %v6481_v4 = vmul.f32 0.35355338, %v1360_v2  ;;  %v1401_v7 = vsel %vm875_vm0, %v6479_v3, -inf }
 0x2a4   : > { %v1395_v6 = vsel %vm875_vm0, %v6481_v4, -inf }
 0x2a5   : > { %1399 = vmax.xlane.f32.xlu0 %v1398_v5  ;;  %1396 = vmax.xlane.f32.xlu1 %v1395_v6 }
 0x2a9   : > { %1402 = vmax.xlane.f32.xlu1 %v1401_v7 }
 0x320   : > { %v1388_v8 = vpop.xlane.xlu1 %1387 }
 0x321   : > { %v1406_v9 = vsub.f32 %v1374_v52, %v1388_v8  ;;  %v4840_v52 = vld [vmem:[%s7617_s14] ss:$0 sm:$0xff] }
 0x322   : > { %v1382_v11 = vpop.xlane.xlu0 %1381  ;;  %v1272_v56 = vadd.f32 %v5367_v51, %v4840_v52  ;;  %v1256_v60 = vadd.f32 %v5363_v30, %v4840_v52  ;;  %v1259_v26 = vadd.f32 %v5364_v42, %v4840_v52  ;;  %v1248_v0 = vadd.f32 %v4840_v52, %v1247_v34 }
 0x323   : > { %v1416_v12 = vmul.f32 1.442695, %v1406_v9  ;;  %v1404_v14 = vsub.f32 %v1372_v54, %v1382_v11  ;;  %v1263_v54 = vpop.f32.mrf.mxu1  ;;  %v1251_v2 = vadd.f32 %v4840_v52, %v1250_v49 }
 0x324   : > { %v1391_v15 = vpop.xlane.xlu1 %1390  ;;  %v6519_v1 = vpack.c.bf16 %v1259_v26, %v1256_v60 }
 0x325   : > { %5782 = vpow2.f32 %v1416_v12  ;;  %v1412_v18 = vmul.f32 1.442695, %v1404_v14  ;;  %v1407_v19 = vsub.f32 %v1375_v57, %v1391_v15  ;;  %v5368_v58 = vpop.f32.mrf.mxu1  ;;  %v6527_v6 = vpack.c.bf16 %v1251_v2, %v1248_v0 }
 0x326   : > { %v1385_v20 = vpop.xlane.xlu0 %1384  ;;  %v1275_v59 = vadd.f32 %v5368_v58, %v4840_v52 }
 0x327   : > { %5784 = vpow2.f32 %v1412_v18  ;;  %v1418_v24 = vmul.f32 1.442695, %v1407_v19  ;;  %v1405_v25 = vsub.f32 %v1373_v23, %v1385_v20  ;;  %v1266_v61 = vpop.f32.mrf.mxu1 }
 0x328   : > { %v6515_v29 = vpack.c.bf16 %v1275_v59, %v1272_v56 }
 0x329   : > { %5786 = vpow2.f32 %v1418_v24  ;;  %v1414_v27 = vmul.f32 1.442695, %v1405_v25 }
 0x32a   : > { %v1394_v28 = vpop.xlane.xlu0 %1393  ;;  %5385 = vmatprep.subr.bf16.mxu1 %v6515_v29 }
 0x32b   : > { %5788 = vpow2.f32 %v1414_v27  ;;  %v1408_v31 = vsub.f32 %v1376_v63, %v1394_v28  ;;  %v1267_v63 = vadd.f32 %v4840_v52, %v1266_v61  ;;  %5386 = vmatpush3.bf16.msra.mxu1 %v6515_v29 }
 0x32d   : > { %v1420_v35 = vmul.f32 1.442695, %v1408_v31 }
 0x32e   : > { %v1400_v32 = vpop.xlane.xlu0 %1399  ;;  %v1397_v7 = vpop.xlane.xlu1 %1396 }
 0x32f   : > { %v1410_v33 = vsub.f32 %v1378_v62, %v1400_v32  ;;  %v1264_v62 = vadd.f32 %v4840_v52, %v1263_v54  ;;  %v1409_v11 = vsub.f32 %v6481_v4, %v1397_v7 }
 0x331   : > { %v1424_v36 = vmul.f32 1.442695, %v1410_v33  ;;  %v6521_v5 = vpack.c.bf16 %v1267_v63, %v1264_v62  ;;  %v1422_v14 = vmul.f32 1.442695, %v1409_v11 }
 0x332   : > { %v6488_v37 = vpop.eup %5782  ;;  %v1403_v8 = vpop.xlane.xlu1 %1402 }
 0x333   : > { %5790 = vpow2.f32 %v1424_v36  ;;  %v1434_v40 = vsel %vm875_vm0, %v6488_v37, 0.0  ;;  %5387 = vmatprep.subr.bf16.mxu1 %v6521_v5  ;;  %v1411_v9 = vsub.f32 %v6479_v3, %v1403_v8 }
 0x334   : > { %v6492_v41 = vpop.eup %5784  ;;  %1435 = vadd.xlane.f32.xlu0 %v1434_v40  ;;  %5792 = vpow2.f32 %v1420_v35  ;;  %5388 = vmatpush3.bf16.msra.mxu1 %v6521_v5 }
 0x335   : > { %v1428_v44 = vsel %vm875_vm0, %v6492_v41, 0.0  ;;  %5389 = vmatprep.subr.bf16.mxu1 %v6519_v1  ;;  %v1426_v12 = vmul.f32 1.442695, %v1411_v9 }
 0x336   : > { %v6494_v43 = vpop.eup %5786 }
 0x337   : > { %v1437_v45 = vsel %vm875_vm0, %v6494_v43, 0.0  ;;  %5794 = vpow2.f32 %v1426_v12 }
 0x338   : > { %v6500_v46 = vpop.eup %5788  ;;  %1429 = vadd.xlane.f32.xlu0 %v1428_v44  ;;  %1438 = vadd.xlane.f32.xlu1 %v1437_v45  ;;  %5796 = vpow2.f32 %v1422_v14 }
 0x339   : > { %v1431_v50 = vsel %vm875_vm0, %v6500_v46, 0.0  ;;  %5390 = vmatpush3.bf16.msra.mxu1 %v6519_v1 }
 0x33a   : > { %5391 = vmatprep.subr.bf16.mxu1 %v6527_v6 }
 0x33c   : > { %1432 = vadd.xlane.f32.xlu1 %v1431_v50 }
 0x33d   : > { %5392 = vmatpush3.bf16.msra.mxu1 %v6527_v6 }
 0x340   : > { %v6507_v53 = vpop.eup %5790 }
 0x341   : > { %v1446_v55 = vsel %vm875_vm0, %v6507_v53, 0.0  ;;  %v6511_v57 = vpop.eup %5792 }
 0x342   : > { %1447 = vadd.xlane.f32.xlu0 %v1446_v55  ;;  %v1440_v23 = vsel %vm875_vm0, %v6511_v57, 0.0 }
 0x344   : > { %v5795_v15 = vpop.eup %5794 }
 0x345   : > { %v1449_v18 = vsel %vm875_vm0, %v5795_v15, 0.0  ;;  %v5797_v19 = vpop.eup %5796 }
 0x346   : > { %1441 = vadd.xlane.f32.xlu0 %v1440_v23  ;;  %v1443_v3 = vsel %vm875_vm0, %v5797_v19, 0.0 }
 0x34d   : > { %1610 = vrot.lane.b32.xlu1 %v6425_v13, %s6116_s27 }
 0x351   : > { %1608 = vrot.lane.b32.xlu1 %v6429_v17, %s6116_s27 }
 0x35c   : > { %1612 = vrot.lane.b32.xlu0 %v6419_v10, %s6116_s27 }
 0x360   : > { %1594 = vrot.lane.b32.xlu0 %v6446_v38, %s6116_s27 }
 0x364   : > { %1598 = vrot.lane.b32.xlu0 %v6456_v48, %s6116_s27 }
 0x375   : > { %1450 = vadd.xlane.f32.xlu1 %v1449_v18 }
 0x379   : > { %1444 = vadd.xlane.f32.xlu1 %v1443_v3 }
 0x38a   : > { %1606 = vrot.lane.b32.xlu1 %v6435_v21, %s6116_s27 }
 0x38e   : > { %1596 = vrot.lane.b32.xlu1 %v6448_v39, %s6116_s27 }
 0x392   : > { %1600 = vrot.lane.b32.xlu1 %v6454_v47, %s6116_s27 }
 0x3bd   : > { %v1436_v4 = vpop.xlane.xlu0 %1435 }
 0x3c1   : > { %v1430_v20 = vpop.xlane.xlu0 %1429  ;;  %v1439_v24 = vpop.xlane.xlu1 %1438 }
 0x3c2   : > { %5798 = vrcp.f32 %v1439_v24 }
 0x3c3   : > { %5800 = vrcp.f32 %v1430_v20 }
 0x3c4   : > { %5802 = vrcp.f32 %v1436_v4 }
 0x3c5   : > { %v1433_v25 = vpop.xlane.xlu1 %1432 }
 0x3c6   : > { %5804 = vrcp.f32 %v1433_v25 }
 0x3c9   : > { %v1611_v50 = vpop.permute.xlu1 %1610 }
 0x3cb   : > { %v1448_v27 = vpop.xlane.xlu0 %1447 }
 0x3cd   : > { %v1609_v51 = vpop.permute.xlu1 %1608 }
 0x3cf   : > { %v1442_v28 = vpop.xlane.xlu0 %1441  ;;  %v5799_v30 = vpop.eup %5798 }
 0x3d0   : > { %v5801_v31 = vpop.eup %5800  ;;  %v1463_v34 = vmul.f32 %v5799_v30, %v6494_v43  ;;  %v1633_v43 = vsel %vm1282_vm2, %v1611_v50, 0 }
 0x3d1   : > { %v5803_v32 = vpop.eup %5802  ;;  %v1460_v36 = vmul.f32 %v5801_v31, %v6492_v41 }
 0x3d2   : > { %v1462_v42 = vmul.f32 %v5803_v32, %v6488_v37  ;;  %v1630_v37 = vsel %vm1282_vm2, %v1609_v51, 0 }
 0x3d3   : > { %v5805_v33 = vpop.eup %5804  ;;  %v1613_v35 = vpop.permute.xlu0 %1612 }
 0x3d4   : > { %5645 = vmatprep.subr.msk.bf16.mxu1 %vm1282_vm2, %v1613_v35  ;;  %v1461_v40 = vmul.f32 %v5805_v33, %v6500_v46  ;;  %v1469_v45 = vpack.c.bf16 %v1463_v34, %v1462_v42  ;;  %v1636_v49 = vsel %vm1282_vm2, %v1613_v35, 0 }
 0x3d6   : > { %v1468_v44 = vpack.c.bf16 %v1461_v40, %v1460_v36 }
 0x3d7   : > { %v1595_v0 = vpop.permute.xlu0 %1594 }
 0x3d8   : > { %5393 = vmatprep.mubr.msk.bf16.mxu1 %vm875_vm0, %v1468_v44 }
 0x3d9   : > { %5394 = vmatmul.mubr.msk.bf16.vlgmr.msra.gmra.mxu1 %vm875_vm0, %v1469_v45 }
 0x3da   : > { %5402 = vmatpush3.bf16.xpose.msra.mxu1 %v1636_v49 }
 0x3db   : > { %5646 = vmatprep.subr.msk.bf16.mxu1 %vm1282_vm2, %v1611_v50  ;;  %v1599_v7 = vpop.permute.xlu0 %1598 }
 0x3e2   : > { %5404 = vmatpush3.bf16.xpose.msra.mxu1 %v1633_v43 }
 0x3e3   : > { %5647 = vmatprep.subr.msk.bf16.mxu1 %vm1282_vm2, %v1609_v51 }
 0x3ea   : > { %5406 = vmatpush3.bf16.xpose.msra.mxu1 %v1630_v37 }
 0x3fe   : > { %v1451_v41 = vpop.xlane.xlu1 %1450 }
 0x3ff   : > { %5806 = vrcp.f32 %v1451_v41 }
 0x400   : > { %5808 = vrcp.f32 %v1442_v28 }
 0x401   : > { %5810 = vrcp.f32 %v1448_v27 }
 0x402   : > { %v1445_v46 = vpop.xlane.xlu1 %1444 }
 0x403   : > { %5812 = vrcp.f32 %v1445_v46 }
 0x406   : > { %v1607_v52 = vpop.permute.xlu1 %1606 }
 0x407   : > { %5648 = vmatprep.subr.msk.bf16.mxu1 %vm1282_vm2, %v1607_v52  ;;  %v1627_v54 = vsel %vm1282_vm2, %v1607_v52, 0 }
 0x408   : > { %5408 = vmatpush3.bf16.xpose.msra.mxu1 %v1627_v54 }
 0x40a   : > { %v1597_v2 = vpop.permute.xlu1 %1596 }
 0x40c   : > { %v5807_v55 = vpop.eup %5806 }
 0x40d   : > { %v5809_v56 = vpop.eup %5808  ;;  %v1467_v23 = vmul.f32 %v5807_v55, %v5795_v15 }
 0x40e   : > { %v5811_v58 = vpop.eup %5810  ;;  %v1464_v60 = vmul.f32 %v5809_v56, %v6511_v57  ;;  %v1601_v8 = vpop.permute.xlu1 %1600 }
 0x40f   : > { %v1466_v61 = vmul.f32 %v5811_v58, %v6507_v53 }
 0x410   : > { %v5813_v59 = vpop.eup %5812 }
 0x411   : > { %v1465_v26 = vmul.f32 %v5813_v59, %v5797_v19  ;;  %v1471_v63 = vpack.c.bf16 %v1467_v23, %v1466_v61 }
 0x413   : > { %v1470_v62 = vpack.c.bf16 %v1465_v26, %v1464_v60 }
 0x415   : > { %5397 = vmatprep.mubr.msk.bf16.mxu1 %vm875_vm0, %v1470_v62 }
 0x416   : > { %5398 = vmatmul.mubr.msk.bf16.gmra.mxu1 %vm875_vm0, %v1471_v63 }
 0x417   : > { %5409 = vmatprep.mubr.msk.bf16.mxu1 %vm1282_vm2, %v1595_v0 }
 0x41e   : > { %5410 = vmatmul.mubr.msk.bf16.vlgmr.msra.gmra.mxu1 %vm1282_vm2, %v1597_v2 }
 0x41f   : > { %5413 = vmatprep.mubr.msk.bf16.mxu1 %vm1282_vm2, %v1599_v7 }
 0x426   : > { %5414 = vmatmul.mubr.msk.bf16.gmra.mxu1 %vm1282_vm2, %v1601_v8 }
 0x499   : > { %v5395_v57 = vpop.f32.mrf.mxu1 }
 0x49a   : > { %v5027_v53 = vpack.c.bf16 %v5395_v57, %v5395_v57 }
 0x49b   : > { %v1518_v9 = vpop.f32.mrf.mxu1 }
 0x49c   : > { %1584 = vst.msk [vmem:[#allocation2 + $0x8] sm:$0xf] %vm1581_vm3, %v5027_v53  ;;  %v5025_v11 = vpack.c.bf16 %v1518_v9, %v1518_v9 }
 0x49d   : > { %v5396_v12 = vpop.f32.mrf.mxu1 }
 0x49e   : > { %1582 = vst.msk [vmem:[#allocation2] sm:$0xf] %vm1581_vm3, %v5025_v11  ;;  %v5028_v14 = vpack.c.bf16 %v5396_v12, %v5396_v12 }
 0x49f   : > { %v1521_v15 = vpop.f32.mrf.mxu1 }
 0x4a0   : > { %1585 = vst.msk [vmem:[#allocation2 + $0xc] sm:$0xf] %vm1581_vm3, %v5028_v14  ;;  %v5026_v18 = vpack.c.bf16 %v1521_v15, %v1521_v15 }
 0x4a2   : > { %1583 = vst.msk [vmem:[#allocation2 + $0x4] sm:$0xf] %vm1581_vm3, %v5026_v18 }
 0x4d6   : > { %v5399_v19 = vpop.f32.mrf.mxu1 }
 0x4d7   : > { %v5031_v3 = vpack.c.bf16 %v5399_v19, %v5399_v19 }
 0x4d8   : > { %v1534_v4 = vpop.f32.mrf.mxu1 }
 0x4d9   : > { %1588 = vst.msk [vmem:[#allocation2 + $0x18] sm:$0xf] %vm1581_vm3, %v5031_v3  ;;  %v5029_v20 = vpack.c.bf16 %v1534_v4, %v1534_v4 }
 0x4da   : > { %v5400_v24 = vpop.f32.mrf.mxu1 }
 0x4db   : > { %1586 = vst.msk [vmem:[#allocation2 + $0x10] sm:$0xf] %vm1581_vm3, %v5029_v20  ;;  %v5032_v25 = vpack.c.bf16 %v5400_v24, %v5400_v24 }
 0x4dc   : > { %v1537_v27 = vpop.f32.mrf.mxu1 }
 0x4dd   : > { %1589 = vst.msk [vmem:[#allocation2 + $0x1c] sm:$0xf] %vm1581_vm3, %v5032_v25  ;;  %v5030_v28 = vpack.c.bf16 %v1537_v27, %v1537_v27 }
 0x4de   : > { %v5411_v30 = vpop.f32.mrf.mxu1 }
 0x4df   : > { %1587 = vst.msk [vmem:[#allocation2 + $0x14] sm:$0xf] %vm1581_vm3, %v5030_v28  ;;  %v1705_v34 = vmul.f32 0.35355338, %v5411_v30 }
 0x4e0   : > { %v1672_v31 = vpop.f32.mrf.mxu1 }
 0x4e1   : > { %v1703_v32 = vmul.f32 0.35355338, %v1672_v31  ;;  %v1717_v45 = vsel %vm875_vm0, %v1705_v34, -inf }
 0x4e2   : > { %v5412_v33 = vpop.f32.mrf.mxu1 }
 0x4e3   : > { %v1711_v35 = vsel %vm875_vm0, %v1703_v32, -inf  ;;  %v1706_v44 = vmul.f32 0.35355338, %v5412_v33 }
 0x4e4   : > { %1712 = vmax.xlane.f32.xlu0 %v1711_v35  ;;  %v1675_v36 = vpop.f32.mrf.mxu1 }
 0x4e5   : > { %v1704_v40 = vmul.f32 0.35355338, %v1675_v36  ;;  %v1720_v41 = vsel %vm875_vm0, %v1706_v44, -inf }
 0x4e6   : > { %v5415_v42 = vpop.f32.mrf.mxu1 }
 0x4e7   : > { %v1714_v49 = vsel %vm875_vm0, %v1704_v40, -inf  ;;  %v1709_v51 = vmul.f32 0.35355338, %v5415_v42 }
 0x4e8   : > { %1718 = vmax.xlane.f32.xlu0 %v1717_v45  ;;  %1715 = vmax.xlane.f32.xlu1 %v1714_v49  ;;  %v1688_v50 = vpop.f32.mrf.mxu1 }
 0x4e9   : > { %v1707_v55 = vmul.f32 0.35355338, %v1688_v50  ;;  %v1729_v56 = vsel %vm875_vm0, %v1709_v51, -inf }
 0x4ea   : > { %v5416_v43 = vpop.f32.mrf.mxu1 }
 0x4eb   : > { %v1710_v37 = vmul.f32 0.35355338, %v5416_v43  ;;  %v1723_v59 = vsel %vm875_vm0, %v1707_v55, -inf }
 0x4ec   : > { %1721 = vmax.xlane.f32.xlu0 %v1720_v41  ;;  %v1691_v46 = vpop.f32.mrf.mxu1 }
 0x4ed   : > { %v1708_v52 = vmul.f32 0.35355338, %v1691_v46  ;;  %v1732_v54 = vsel %vm875_vm0, %v1710_v37, -inf }
 0x4ee   : > { %1733 = vmax.xlane.f32.xlu1 %v1732_v54 }
 0x4ef   : > { %v1726_v58 = vsel %vm875_vm0, %v1708_v52, -inf }
 0x4f0   : > { %1730 = vmax.xlane.f32.xlu0 %v1729_v56 }
 0x4f2   : > { %1727 = vmax.xlane.f32.xlu1 %v1726_v58 }
 0x4f4   : > { %1724 = vmax.xlane.f32.xlu0 %v1723_v59 }
 0x503   : > { %1811 = vrot.lane.b32.xlu1 %v6521_v5, %s6116_s27 }
 0x507   : > { %1809 = vrot.lane.b32.xlu1 %v6519_v1, %s6116_s27 }
 0x50a   : > { %1813 = vrot.lane.b32.xlu0 %v6515_v29, %s6116_s27 }
 0x50b   : > { %1807 = vrot.lane.b32.xlu1 %v6527_v6, %s6116_s27  ;;  %s6126_s27 = smov 32  }
 0x56d   : > { %v1713_v23 = vpop.xlane.xlu0 %1712 }
 0x56e   : > { %v1735_v60 = vsub.f32 %v1703_v32, %v1713_v23 }
 0x570   : > { %v1743_v63 = vmul.f32 1.442695, %v1735_v60 }
 0x571   : > { %v1719_v26 = vpop.xlane.xlu0 %1718  ;;  %v1716_v61 = vpop.xlane.xlu1 %1715 }
 0x572   : > { %v1737_v62 = vsub.f32 %v1705_v34, %v1719_v26  ;;  %v1736_v2 = vsub.f32 %v1704_v40, %v1716_v61 }
 0x574   : > { %v1747_v0 = vmul.f32 1.442695, %v1737_v62  ;;  %v1745_v53 = vmul.f32 1.442695, %v1736_v2 }
 0x575   : > { %v1722_v7 = vpop.xlane.xlu0 %1721 }
 0x576   : > { %5814 = vpow2.f32 %v1747_v0  ;;  %v1738_v8 = vsub.f32 %v1706_v44, %v1722_v7 }
 0x577   : > { %v1734_v57 = vpop.xlane.xlu1 %1733  ;;  %5816 = vpow2.f32 %v1743_v63 }
 0x578   : > { %v1749_v9 = vmul.f32 1.442695, %v1738_v8  ;;  %v1742_v11 = vsub.f32 %v1710_v37, %v1734_v57 }
 0x579   : > { %v1731_v12 = vpop.xlane.xlu0 %1730 }
 0x57a   : > { %5818 = vpow2.f32 %v1749_v9  ;;  %v1741_v14 = vsub.f32 %v1709_v51, %v1731_v12  ;;  %v1757_v18 = vmul.f32 1.442695, %v1742_v11 }
 0x57b   : > { %v1728_v15 = vpop.xlane.xlu1 %1727  ;;  %5820 = vpow2.f32 %v1745_v53 }
 0x57c   : > { %v1755_v19 = vmul.f32 1.442695, %v1741_v14  ;;  %v1740_v3 = vsub.f32 %v1708_v52, %v1728_v15 }
 0x57d   : > { %v1725_v4 = vpop.xlane.xlu0 %1724 }
 0x57e   : > { %5822 = vpow2.f32 %v1755_v19  ;;  %v1739_v20 = vsub.f32 %v1707_v55, %v1725_v4  ;;  %v1753_v25 = vmul.f32 1.442695, %v1740_v3 }
 0x57f   : > { %v1812_v24 = vpop.permute.xlu1 %1811  ;;  %5824 = vpow2.f32 %v1757_v18 }
 0x580   : > { %v1751_v27 = vmul.f32 1.442695, %v1739_v20 }
 0x581   : > { %v1814_v28 = vpop.permute.xlu0 %1813 }
 0x582   : > { %5826 = vpow2.f32 %v1751_v27  ;;  %5417 = vmatprep.subr.bf16.mxu0 %v1814_v28 }
 0x583   : > { %v6597_v30 = vpop.eup %5814  ;;  %5418 = vmatpush3.bf16.msra.mxu0 %v1814_v28  ;;  %5828 = vpow2.f32 %v1753_v25  ;;  %v1810_v33 = vpop.permute.xlu1 %1809 }
 0x584   : > { %5419 = vmatprep.subr.bf16.mxu0 %v1812_v24  ;;  %v1765_v31 = vsel %vm875_vm0, %v6597_v30, 0.0  ;;  %v5817_v32 = vpop.eup %5816 }
 0x585   : > { %1766 = vadd.xlane.f32.xlu0 %v1765_v31  ;;  %v1759_v35 = vsel %vm875_vm0, %v5817_v32, 0.0 }
 0x587   : > { %v5819_v34 = vpop.eup %5818  ;;  %5420 = vmatpush3.bf16.msra.mxu0 %v1812_v24  ;;  %v1808_v44 = vpop.permute.xlu1 %1807 }
 0x588   : > { %5421 = vmatprep.subr.bf16.mxu0 %v1810_v33  ;;  %v1768_v36 = vsel %vm875_vm0, %v5819_v34, 0.0  ;;  %v5821_v40 = vpop.eup %5820 }
 0x589   : > { %1760 = vadd.xlane.f32.xlu0 %v1759_v35  ;;  %1769 = vadd.xlane.f32.xlu1 %v1768_v36  ;;  %v1762_v49 = vsel %vm875_vm0, %v5821_v40, 0.0 }
 0x58b   : > { %v6603_v42 = vpop.eup %5822  ;;  %5422 = vmatpush3.bf16.msra.mxu0 %v1810_v33 }
 0x58c   : > { %5423 = vmatprep.subr.bf16.mxu0 %v1808_v44  ;;  %v1777_v45 = vsel %vm875_vm0, %v6603_v42, 0.0  ;;  %v5825_v50 = vpop.eup %5824 }
 0x58d   : > { %1778 = vadd.xlane.f32.xlu0 %v1777_v45  ;;  %1763 = vadd.xlane.f32.xlu1 %v1762_v49  ;;  %v1780_v37 = vsel %vm875_vm0, %v5825_v50, 0.0 }
 0x58f   : > { %v5827_v43 = vpop.eup %5826  ;;  %5424 = vmatpush3.bf16.msra.mxu0 %v1808_v44 }
 0x590   : > { %v1771_v51 = vsel %vm875_vm0, %v5827_v43, 0.0  ;;  %v5829_v41 = vpop.eup %5828 }
 0x591   : > { %1772 = vadd.xlane.f32.xlu1 %v1771_v51  ;;  %1781 = vadd.xlane.f32.xlu0 %v1780_v37  ;;  %v1774_v46 = vsel %vm875_vm0, %v5829_v41, 0.0 }
 0x595   : > { %1775 = vadd.xlane.f32.xlu0 %v1774_v46 }
 0x5a2   : > { %1965 = vrot.lane.b32.xlu1 %v6425_v13, %s6117_s4 }
 0x5a6   : > { %1963 = vrot.lane.b32.xlu1 %v6429_v17, %s6117_s4 }
 0x5aa   : > { %1961 = vrot.lane.b32.xlu1 %v6435_v21, %s6117_s4 }
 0x5ab   : > { %1967 = vrot.lane.b32.xlu0 %v6419_v10, %s6117_s4 }
 0x5ae   : > { %1955 = vrot.lane.b32.xlu1 %v6448_v39, %s6117_s4 }
 0x5af   : > { %1953 = vrot.lane.b32.xlu0 %v6446_v38, %s6117_s4 }
 0x5b2   : > { %1959 = vrot.lane.b32.xlu1 %v6454_v47, %s6117_s4 }
 0x5b3   : > { %1957 = vrot.lane.b32.xlu0 %v6456_v48, %s6117_s4 }
 0x60e   : > { %v1767_v52 = vpop.xlane.xlu0 %1766 }
 0x612   : > { %v1761_v54 = vpop.xlane.xlu0 %1760  ;;  %v1770_v55 = vpop.xlane.xlu1 %1769 }
 0x613   : > { %5830 = vrcp.f32 %v1770_v55 }
 0x614   : > { %5832 = vrcp.f32 %v1761_v54 }
 0x615   : > { %5834 = vrcp.f32 %v1767_v52 }
 0x616   : > { %v1779_v56 = vpop.xlane.xlu0 %1778  ;;  %v1764_v58 = vpop.xlane.xlu1 %1763 }
 0x617   : > { %5836 = vrcp.f32 %v1764_v58 }
 0x61a   : > { %v1782_v59 = vpop.xlane.xlu0 %1781  ;;  %v1773_v23 = vpop.xlane.xlu1 %1772 }
 0x61b   : > { %5838 = vrcp.f32 %v1782_v59 }
 0x61c   : > { %5840 = vrcp.f32 %v1773_v23 }
 0x61d   : > { %5842 = vrcp.f32 %v1779_v56 }
 0x61e   : > { %v1776_v60 = vpop.xlane.xlu0 %1775  ;;  %v1966_v19 = vpop.permute.xlu1 %1965 }
 0x61f   : > { %5844 = vrcp.f32 %v1776_v60 }
 0x620   : > { %v5831_v26 = vpop.eup %5830 }
 0x621   : > { %v5833_v62 = vpop.eup %5832  ;;  %v1794_v2 = vmul.f32 %v5831_v26, %v5819_v34 }
 0x622   : > { %v1968_v61 = vpop.permute.xlu0 %1967  ;;  %v5835_v63 = vpop.eup %5834  ;;  %v1791_v7 = vmul.f32 %v5833_v62, %v5817_v32 }
 0x623   : > { %5649 = vmatprep.subr.msk.bf16.mxu0 %vm1282_vm2, %v1968_v61  ;;  %v1793_v57 = vmul.f32 %v5835_v63, %v6597_v30  ;;  %v1991_v15 = vsel %vm1282_vm2, %v1968_v61, 0  ;;  %v1988_v30 = vsel %vm1282_vm2, %v1966_v19, 0  ;;  %v1964_v31 = vpop.permute.xlu1 %1963 }
 0x624   : > { %v5837_v0 = vpop.eup %5836  ;;  %v1985_v32 = vsel %vm1282_vm2, %v1964_v31, 0 }
 0x625   : > { %v1792_v8 = vmul.f32 %v5837_v0, %v5821_v40  ;;  %v1800_v11 = vpack.c.bf16 %v1794_v2, %v1793_v57 }
 0x626   : > { %v1954_v28 = vpop.permute.xlu0 %1953 }
 0x627   : > { %v1799_v53 = vpack.c.bf16 %v1792_v8, %v1791_v7  ;;  %v1962_v33 = vpop.permute.xlu1 %1961 }
 0x628   : > { %v5839_v9 = vpop.eup %5838  ;;  %v1982_v34 = vsel %vm1282_vm2, %v1962_v33, 0 }
 0x629   : > { %v5841_v12 = vpop.eup %5840  ;;  %5425 = vmatprep.mubr.msk.bf16.mxu0 %vm875_vm0, %v1799_v53  ;;  %v1798_v20 = vmul.f32 %v5839_v9, %v5825_v50 }
 0x62a   : > { %v5843_v14 = vpop.eup %5842  ;;  %5426 = vmatmul.mubr.msk.bf16.vlgmr.msra.gmra.mxu0 %vm875_vm0, %v1800_v11  ;;  %v1795_v3 = vmul.f32 %v5841_v12, %v5827_v43  ;;  %v1958_v36 = vpop.permute.xlu0 %1957 }
 0x62b   : > { %5434 = vmatpush3.bf16.xpose.msra.mxu0 %v1991_v15  ;;  %v1797_v25 = vmul.f32 %v5843_v14, %v6603_v42  ;;  %v1956_v35 = vpop.permute.xlu1 %1955 }
 0x62c   : > { %v5845_v18 = vpop.eup %5844  ;;  %5650 = vmatprep.subr.msk.bf16.mxu0 %vm1282_vm2, %v1966_v19 }
 0x62d   : > { %v1796_v4 = vmul.f32 %v5845_v18, %v5829_v41  ;;  %v1802_v27 = vpack.c.bf16 %v1798_v20, %v1797_v25 }
 0x62f   : > { %v1801_v24 = vpack.c.bf16 %v1796_v4, %v1795_v3  ;;  %v1960_v40 = vpop.permute.xlu1 %1959 }
 0x631   : > { %5429 = vmatprep.mubr.msk.bf16.mxu0 %vm875_vm0, %v1801_v24 }
 0x632   : > { %5430 = vmatmul.mubr.msk.bf16.gmra.mxu0 %vm875_vm0, %v1802_v27 }
 0x633   : > { %5436 = vmatpush3.bf16.xpose.msra.mxu0 %v1988_v30  ;;  %5441 = vmatprep.mubr.msk.bf16.mxu0 %vm1282_vm2, %v1954_v28 }
 0x634   : > { %5651 = vmatprep.subr.msk.bf16.mxu0 %vm1282_vm2, %v1964_v31 }
 0x63b   : > { %5438 = vmatpush3.bf16.xpose.msra.mxu0 %v1985_v32 }
 0x63c   : > { %5652 = vmatprep.subr.msk.bf16.mxu0 %vm1282_vm2, %v1962_v33 }
 0x643   : > { %5440 = vmatpush3.bf16.xpose.msra.mxu0 %v1982_v34 }
 0x64a   : > { %5442 = vmatmul.mubr.msk.bf16.vlgmr.msra.gmra.mxu0 %vm1282_vm2, %v1956_v35 }
 0x64b   : > { %5445 = vmatprep.mubr.msk.bf16.mxu0 %vm1282_vm2, %v1958_v36 }
 0x652   : > { %5446 = vmatmul.mubr.msk.bf16.gmra.mxu0 %vm1282_vm2, %v1960_v40 }
 0x6ea   : > { %v6645_v42 = vpop.f32.mrf.mxu0 }
 0x6ec   : > { %v6647_v44 = vpop.f32.mrf.mxu0 }
 0x6ee   : > { %v6649_v45 = vpop.f32.mrf.mxu0 }
 0x6f0   : > { %v6651_v49 = vpop.f32.mrf.mxu0 }
 0x6f2   : > { %v6653_v50 = vpop.f32.mrf.mxu0 }
 0x6f4   : > { %v6655_v43 = vpop.f32.mrf.mxu0 }
 0x6f6   : > { %v6657_v51 = vpop.f32.mrf.mxu0 }
 0x6f8   : > { %v6659_v37 = vpop.f32.mrf.mxu0 }
 0x70a   : > { %v5443_v41 = vpop.f32.mrf.mxu0 }
 0x70b   : > { %v2060_v55 = vmul.f32 0.35355338, %v5443_v41 }
 0x70c   : > { %v2027_v46 = vpop.f32.mrf.mxu0 }
 0x70d   : > { %v2058_v52 = vmul.f32 0.35355338, %v2027_v46  ;;  %v2072_v26 = vsel %vm875_vm0, %v2060_v55, -inf }
 0x70e   : > { %v5444_v54 = vpop.f32.mrf.mxu0 }
 0x70f   : > { %v2066_v56 = vsel %vm875_vm0, %v2058_v52, -inf  ;;  %v2061_v60 = vmul.f32 0.35355338, %v5444_v54 }
 0x710   : > { %2067 = vmax.xlane.f32.xlu0 %v2066_v56  ;;  %v2030_v58 = vpop.f32.mrf.mxu0 }
 0x711   : > { %v2059_v59 = vmul.f32 0.35355338, %v2030_v58  ;;  %v2075_v7 = vsel %vm875_vm0, %v2061_v60, -inf }
 0x712   : > { %v5447_v23 = vpop.f32.mrf.mxu0 }
 0x713   : > { %v2069_v61 = vsel %vm875_vm0, %v2059_v59, -inf  ;;  %v2064_v0 = vmul.f32 0.35355338, %v5447_v23 }
 0x714   : > { %2073 = vmax.xlane.f32.xlu0 %v2072_v26  ;;  %2070 = vmax.xlane.f32.xlu1 %v2069_v61  ;;  %v2043_v62 = vpop.f32.mrf.mxu0 }
 0x715   : > { %v2062_v9 = vmul.f32 0.35355338, %v2043_v62  ;;  %v2084_v11 = vsel %vm875_vm0, %v2064_v0, -inf }
 0x716   : > { %v5448_v63 = vpop.f32.mrf.mxu0 }
 0x717   : > { %v2065_v2 = vmul.f32 0.35355338, %v5448_v63  ;;  %v2078_v14 = vsel %vm875_vm0, %v2062_v9, -inf }
 0x718   : > { %2076 = vmax.xlane.f32.xlu0 %v2075_v7  ;;  %v2046_v8 = vpop.f32.mrf.mxu0 }
 0x719   : > { %v2063_v57 = vmul.f32 0.35355338, %v2046_v8  ;;  %v2087_v53 = vsel %vm875_vm0, %v2065_v2, -inf }
 0x71a   : > { %2088 = vmax.xlane.f32.xlu1 %v2087_v53 }
 0x71b   : > { %v2081_v12 = vsel %vm875_vm0, %v2063_v57, -inf }
 0x71c   : > { %2085 = vmax.xlane.f32.xlu0 %v2084_v11 }
 0x71e   : > { %2082 = vmax.xlane.f32.xlu1 %v2081_v12 }
 0x720   : > { %2079 = vmax.xlane.f32.xlu0 %v2078_v14 }
 0x72f   : > { %2162 = vrot.lane.b32.xlu1 %v6521_v5, %s6117_s4 }
 0x733   : > { %2160 = vrot.lane.b32.xlu1 %v6519_v1, %s6117_s4 }
 0x736   : > { %2164 = vrot.lane.b32.xlu0 %v6515_v29, %s6117_s4 }
 0x737   : > { %2158 = vrot.lane.b32.xlu1 %v6527_v6, %s6117_s4  ;;  %s6127_s4 = smov 40  }
 0x799   : > { %v2068_v15 = vpop.xlane.xlu0 %2067 }
 0x79a   : > { %v2090_v18 = vsub.f32 %v2058_v52, %v2068_v15 }
 0x79c   : > { %v2098_v20 = vmul.f32 1.442695, %v2090_v18 }
 0x79d   : > { %v2074_v19 = vpop.xlane.xlu0 %2073  ;;  %v2071_v3 = vpop.xlane.xlu1 %2070 }
 0x79e   : > { %v2092_v4 = vsub.f32 %v2060_v55, %v2074_v19  ;;  %v2091_v25 = vsub.f32 %v2059_v59, %v2071_v3 }
 0x7a0   : > { %v2102_v24 = vmul.f32 1.442695, %v2092_v4  ;;  %v2100_v31 = vmul.f32 1.442695, %v2091_v25 }
 0x7a1   : > { %v2077_v27 = vpop.xlane.xlu0 %2076 }
 0x7a2   : > { %5846 = vpow2.f32 %v2102_v24  ;;  %v2093_v28 = vsub.f32 %v2061_v60, %v2077_v27 }
 0x7a3   : > { %v2089_v30 = vpop.xlane.xlu1 %2088  ;;  %5848 = vpow2.f32 %v2098_v20 }
 0x7a4   : > { %v2104_v32 = vmul.f32 1.442695, %v2093_v28  ;;  %v2097_v33 = vsub.f32 %v2065_v2, %v2089_v30 }
 0x7a5   : > { %v2086_v34 = vpop.xlane.xlu0 %2085 }
 0x7a6   : > { %5850 = vpow2.f32 %v2104_v32  ;;  %v2096_v35 = vsub.f32 %v2064_v0, %v2086_v34  ;;  %v2112_v40 = vmul.f32 1.442695, %v2097_v33 }
 0x7a7   : > { %v2083_v36 = vpop.xlane.xlu1 %2082  ;;  %5852 = vpow2.f32 %v2100_v31 }
 0x7a8   : > { %v2110_v41 = vmul.f32 1.442695, %v2096_v35  ;;  %v2095_v46 = vsub.f32 %v2063_v57, %v2083_v36 }
 0x7a9   : > { %v2080_v52 = vpop.xlane.xlu0 %2079 }
 0x7aa   : > { %5854 = vpow2.f32 %v2110_v41  ;;  %v2094_v54 = vsub.f32 %v2062_v9, %v2080_v52  ;;  %v2108_v56 = vmul.f32 1.442695, %v2095_v46 }
 0x7ab   : > { %v2163_v55 = vpop.permute.xlu1 %2162  ;;  %5856 = vpow2.f32 %v2112_v40 }
 0x7ac   : > { %v2106_v58 = vmul.f32 1.442695, %v2094_v54 }
 0x7ad   : > { %v2165_v59 = vpop.permute.xlu0 %2164 }
 0x7ae   : > { %5858 = vpow2.f32 %v2106_v58  ;;  %5449 = vmatprep.subr.bf16.mxu1 %v2165_v59 }
 0x7af   : > { %v6677_v23 = vpop.eup %5846  ;;  %5450 = vmatpush3.bf16.msra.mxu1 %v2165_v59  ;;  %5860 = vpow2.f32 %v2108_v56  ;;  %v2161_v61 = vpop.permute.xlu1 %2160 }
 0x7b0   : > { %5451 = vmatprep.subr.bf16.mxu1 %v2163_v55  ;;  %v2120_v60 = vsel %vm875_vm0, %v6677_v23, 0.0  ;;  %v5849_v26 = vpop.eup %5848 }
 0x7b1   : > { %2121 = vadd.xlane.f32.xlu0 %v2120_v60  ;;  %v2114_v63 = vsel %vm875_vm0, %v5849_v26, 0.0 }
 0x7b3   : > { %v5851_v62 = vpop.eup %5850  ;;  %5452 = vmatpush3.bf16.msra.mxu1 %v2163_v55  ;;  %v2159_v8 = vpop.permute.xlu1 %2158 }
 0x7b4   : > { %5453 = vmatprep.subr.bf16.mxu1 %v2161_v61  ;;  %v2123_v0 = vsel %vm875_vm0, %v5851_v62, 0.0  ;;  %v5853_v2 = vpop.eup %5852 }
 0x7b5   : > { %2115 = vadd.xlane.f32.xlu0 %v2114_v63  ;;  %2124 = vadd.xlane.f32.xlu1 %v2123_v0  ;;  %v2117_v53 = vsel %vm875_vm0, %v5853_v2, 0.0 }
 0x7b7   : > { %v6683_v7 = vpop.eup %5854  ;;  %5454 = vmatpush3.bf16.msra.mxu1 %v2161_v61 }
 0x7b8   : > { %5455 = vmatprep.subr.bf16.mxu1 %v2159_v8  ;;  %v2132_v57 = vsel %vm875_vm0, %v6683_v7, 0.0  ;;  %v5857_v9 = vpop.eup %5856 }
 0x7b9   : > { %2133 = vadd.xlane.f32.xlu0 %v2132_v57  ;;  %2118 = vadd.xlane.f32.xlu1 %v2117_v53  ;;  %v2135_v14 = vsel %vm875_vm0, %v5857_v9, 0.0 }
 0x7bb   : > { %v5859_v11 = vpop.eup %5858  ;;  %5456 = vmatpush3.bf16.msra.mxu1 %v2159_v8 }
 0x7bc   : > { %v2126_v12 = vsel %vm875_vm0, %v5859_v11, 0.0  ;;  %v5861_v15 = vpop.eup %5860 }
 0x7bd   : > { %2127 = vadd.xlane.f32.xlu1 %v2126_v12  ;;  %2136 = vadd.xlane.f32.xlu0 %v2135_v14  ;;  %v2129_v18 = vsel %vm875_vm0, %v5861_v15, 0.0 }
 0x7c1   : > { %2130 = vadd.xlane.f32.xlu0 %v2129_v18 }
 0x7ce   : > { %2316 = vrot.lane.b32.xlu1 %v6425_v13, %s6118_s25 }
 0x7d2   : > { %2314 = vrot.lane.b32.xlu1 %v6429_v17, %s6118_s25 }
 0x7d6   : > { %2312 = vrot.lane.b32.xlu1 %v6435_v21, %s6118_s25 }
 0x7d7   : > { %2318 = vrot.lane.b32.xlu0 %v6419_v10, %s6118_s25 }
 0x7da   : > { %2306 = vrot.lane.b32.xlu1 %v6448_v39, %s6118_s25 }
 0x7db   : > { %2304 = vrot.lane.b32.xlu0 %v6446_v38, %s6118_s25 }
 0x7de   : > { %2310 = vrot.lane.b32.xlu1 %v6454_v47, %s6118_s25 }
 0x7df   : > { %2308 = vrot.lane.b32.xlu0 %v6456_v48, %s6118_s25 }
 0x83a   : > { %v2122_v19 = vpop.xlane.xlu0 %2121 }
 0x83e   : > { %v2116_v3 = vpop.xlane.xlu0 %2115  ;;  %v2125_v4 = vpop.xlane.xlu1 %2124 }
 0x83f   : > { %5862 = vrcp.f32 %v2125_v4 }
 0x840   : > { %5864 = vrcp.f32 %v2116_v3 }
 0x841   : > { %5866 = vrcp.f32 %v2122_v19 }
 0x842   : > { %v2134_v20 = vpop.xlane.xlu0 %2133  ;;  %v2119_v24 = vpop.xlane.xlu1 %2118 }
 0x843   : > { %5868 = vrcp.f32 %v2119_v24 }
 0x846   : > { %v2137_v25 = vpop.xlane.xlu0 %2136  ;;  %v2128_v27 = vpop.xlane.xlu1 %2127 }
 0x847   : > { %5870 = vrcp.f32 %v2137_v25 }
 0x848   : > { %5872 = vrcp.f32 %v2128_v27 }
 0x849   : > { %5874 = vrcp.f32 %v2134_v20 }
 0x84a   : > { %v2131_v28 = vpop.xlane.xlu0 %2130  ;;  %v2317_v60 = vpop.permute.xlu1 %2316 }
 0x84b   : > { %5876 = vrcp.f32 %v2131_v28  ;;  %v2339_v8 = vsel %vm1282_vm2, %v2317_v60, 0 }
 0x84c   : > { %v5863_v30 = vpop.eup %5862 }
 0x84d   : > { %v5865_v32 = vpop.eup %5864  ;;  %v2149_v35 = vmul.f32 %v5863_v30, %v5851_v62 }
 0x84e   : > { %v2319_v31 = vpop.permute.xlu0 %2318  ;;  %v5867_v33 = vpop.eup %5866  ;;  %v2146_v36 = vmul.f32 %v5865_v32, %v5849_v26 }
 0x84f   : > { %5653 = vmatprep.subr.msk.bf16.mxu1 %vm1282_vm2, %v2319_v31  ;;  %v2148_v41 = vmul.f32 %v5867_v33, %v6677_v23  ;;  %v2342_v58 = vsel %vm1282_vm2, %v2319_v31, 0  ;;  %v2315_v57 = vpop.permute.xlu1 %2314 }
 0x850   : > { %v5869_v34 = vpop.eup %5868  ;;  %v2336_v53 = vsel %vm1282_vm2, %v2315_v57, 0 }
 0x851   : > { %v2147_v40 = vmul.f32 %v5869_v34, %v5853_v2  ;;  %v2155_v54 = vpack.c.bf16 %v2149_v35, %v2148_v41 }
 0x852   : > { %v2305_v2 = vpop.permute.xlu0 %2304 }
 0x853   : > { %v2154_v46 = vpack.c.bf16 %v2147_v40, %v2146_v36 }
 0x854   : > { %v5871_v52 = vpop.eup %5870 }
 0x855   : > { %v5873_v55 = vpop.eup %5872  ;;  %5457 = vmatprep.mubr.msk.bf16.mxu1 %vm875_vm0, %v2154_v46  ;;  %v2153_v62 = vmul.f32 %v5871_v52, %v5857_v9  ;;  %v2313_v9 = vpop.permute.xlu1 %2312 }
 0x856   : > { %v5875_v56 = vpop.eup %5874  ;;  %5458 = vmatmul.mubr.msk.bf16.vlgmr.msra.gmra.mxu1 %vm875_vm0, %v2155_v54  ;;  %v2150_v26 = vmul.f32 %v5873_v55, %v5859_v11  ;;  %v2309_v12 = vpop.permute.xlu0 %2308 }
 0x857   : > { %5466 = vmatpush3.bf16.xpose.msra.mxu1 %v2342_v58  ;;  %v2152_v63 = vmul.f32 %v5875_v56, %v6683_v7  ;;  %v2333_v7 = vsel %vm1282_vm2, %v2313_v9, 0 }
 0x858   : > { %v5877_v59 = vpop.eup %5876  ;;  %5654 = vmatprep.subr.msk.bf16.mxu1 %vm1282_vm2, %v2317_v60 }
 0x859   : > { %v2151_v61 = vmul.f32 %v5877_v59, %v5861_v15  ;;  %v2157_v0 = vpack.c.bf16 %v2153_v62, %v2152_v63  ;;  %v2307_v11 = vpop.permute.xlu1 %2306 }
 0x85b   : > { %v2156_v23 = vpack.c.bf16 %v2151_v61, %v2150_v26 }
 0x85d   : > { %5461 = vmatprep.mubr.msk.bf16.mxu1 %vm875_vm0, %v2156_v23  ;;  %v2311_v14 = vpop.permute.xlu1 %2310 }
 0x85e   : > { %5462 = vmatmul.mubr.msk.bf16.gmra.mxu1 %vm875_vm0, %v2157_v0 }
 0x85f   : > { %5468 = vmatpush3.bf16.xpose.msra.mxu1 %v2339_v8  ;;  %5473 = vmatprep.mubr.msk.bf16.mxu1 %vm1282_vm2, %v2305_v2 }
 0x860   : > { %5655 = vmatprep.subr.msk.bf16.mxu1 %vm1282_vm2, %v2315_v57 }
 0x867   : > { %5470 = vmatpush3.bf16.xpose.msra.mxu1 %v2336_v53 }
 0x868   : > { %5656 = vmatprep.subr.msk.bf16.mxu1 %vm1282_vm2, %v2313_v9 }
 0x86f   : > { %5472 = vmatpush3.bf16.xpose.msra.mxu1 %v2333_v7 }
 0x876   : > { %5474 = vmatmul.mubr.msk.bf16.vlgmr.msra.gmra.mxu1 %vm1282_vm2, %v2307_v11 }
 0x877   : > { %5477 = vmatprep.mubr.msk.bf16.mxu1 %vm1282_vm2, %v2309_v12 }
 0x87e   : > { %5478 = vmatmul.mubr.msk.bf16.gmra.mxu1 %vm1282_vm2, %v2311_v14 }
 0x916   : > { %v6725_v15 = vpop.f32.mrf.mxu1 }
 0x918   : > { %v6727_v18 = vpop.f32.mrf.mxu1 }
 0x91a   : > { %v6729_v19 = vpop.f32.mrf.mxu1 }
 0x91c   : > { %v6731_v3 = vpop.f32.mrf.mxu1 }
 0x91e   : > { %v6733_v4 = vpop.f32.mrf.mxu1 }
 0x920   : > { %v6735_v20 = vpop.f32.mrf.mxu1 }
 0x922   : > { %v6737_v24 = vpop.f32.mrf.mxu1 }
 0x923   : > { %7671 = vst [vmem:[#allocation14_spill] sm:$0xff] %v6737_v24 }
 0x924   : > { %v6739_v25 = vpop.f32.mrf.mxu1 }
 0x925   : > { %7672 = vst [vmem:[#allocation15_spill] sm:$0xff] %v6739_v25 }
 0x936   : > { %v5475_v27 = vpop.f32.mrf.mxu1 }
 0x937   : > { %v2411_v32 = vmul.f32 0.35355338, %v5475_v27 }
 0x938   : > { %v2378_v28 = vpop.f32.mrf.mxu1 }
 0x939   : > { %v2409_v30 = vmul.f32 0.35355338, %v2378_v28  ;;  %v2423_v41 = vsel %vm875_vm0, %v2411_v32, -inf }
 0x93a   : > { %v5476_v31 = vpop.f32.mrf.mxu1 }
 0x93b   : > { %v2417_v33 = vsel %vm875_vm0, %v2409_v30, -inf  ;;  %v2412_v40 = vmul.f32 0.35355338, %v5476_v31 }
 0x93c   : > { %2418 = vmax.xlane.f32.xlu0 %v2417_v33  ;;  %v2381_v34 = vpop.f32.mrf.mxu1 }
 0x93d   : > { %v2410_v35 = vmul.f32 0.35355338, %v2381_v34  ;;  %v2426_v58 = vsel %vm875_vm0, %v2412_v40, -inf }
 0x93e   : > { %v5479_v36 = vpop.f32.mrf.mxu1 }
 0x93f   : > { %v2420_v46 = vsel %vm875_vm0, %v2410_v35, -inf  ;;  %v2415_v55 = vmul.f32 0.35355338, %v5479_v36 }
 0x940   : > { %2424 = vmax.xlane.f32.xlu0 %v2423_v41  ;;  %2421 = vmax.xlane.f32.xlu1 %v2420_v46  ;;  %v2394_v52 = vpop.f32.mrf.mxu1 }
 0x941   : > { %v2413_v61 = vmul.f32 0.35355338, %v2394_v52  ;;  %v2435_v62 = vsel %vm875_vm0, %v2415_v55, -inf }
 0x942   : > { %v5480_v54 = vpop.f32.mrf.mxu1 }
 0x943   : > { %v2416_v56 = vmul.f32 0.35355338, %v5480_v54  ;;  %v2429_v63 = vsel %vm875_vm0, %v2413_v61, -inf }
 0x944   : > { %2427 = vmax.xlane.f32.xlu0 %v2426_v58  ;;  %v2397_v59 = vpop.f32.mrf.mxu1 }
 0x945   : > { %v2414_v60 = vmul.f32 0.35355338, %v2397_v59  ;;  %v2438_v26 = vsel %vm875_vm0, %v2416_v56, -inf }
 0x946   : > { %2439 = vmax.xlane.f32.xlu1 %v2438_v26 }
 0x947   : > { %v2432_v23 = vsel %vm875_vm0, %v2414_v60, -inf }
 0x948   : > { %2436 = vmax.xlane.f32.xlu0 %v2435_v62 }
 0x94a   : > { %2433 = vmax.xlane.f32.xlu1 %v2432_v23 }
 0x94c   : > { %2430 = vmax.xlane.f32.xlu0 %v2429_v63 }
 0x95b   : > { %2513 = vrot.lane.b32.xlu1 %v6521_v5, %s6118_s25 }
 0x95f   : > { %2511 = vrot.lane.b32.xlu1 %v6519_v1, %s6118_s25 }
 0x962   : > { %2515 = vrot.lane.b32.xlu0 %v6515_v29, %s6118_s25 }
 0x963   : > { %2509 = vrot.lane.b32.xlu1 %v6527_v6, %s6118_s25  ;;  %s6128_s25 = smov 48  }
 0x9c5   : > { %v2419_v0 = vpop.xlane.xlu0 %2418 }
 0x9c6   : > { %v2441_v2 = vsub.f32 %v2409_v30, %v2419_v0 }
 0x9c8   : > { %v2449_v9 = vmul.f32 1.442695, %v2441_v2 }
 0x9c9   : > { %v2425_v8 = vpop.xlane.xlu0 %2424  ;;  %v2422_v57 = vpop.xlane.xlu1 %2421 }
 0x9ca   : > { %v2443_v53 = vsub.f32 %v2411_v32, %v2425_v8  ;;  %v2442_v11 = vsub.f32 %v2410_v35, %v2422_v57 }
 0x9cc   : > { %v2453_v7 = vmul.f32 1.442695, %v2443_v53  ;;  %v2451_v28 = vmul.f32 1.442695, %v2442_v11 }
 0x9cd   : > { %v2428_v12 = vpop.xlane.xlu0 %2427 }
 0x9ce   : > { %5878 = vpow2.f32 %v2453_v7  ;;  %v2444_v14 = vsub.f32 %v2412_v40, %v2428_v12 }
 0x9cf   : > { %v2440_v27 = vpop.xlane.xlu1 %2439  ;;  %5880 = vpow2.f32 %v2449_v9 }
 0x9d0   : > { %v2455_v31 = vmul.f32 1.442695, %v2444_v14  ;;  %v2448_v33 = vsub.f32 %v2416_v56, %v2440_v27 }
 0x9d1   : > { %v2437_v34 = vpop.xlane.xlu0 %2436 }
 0x9d2   : > { %5882 = vpow2.f32 %v2455_v31  ;;  %v2447_v36 = vsub.f32 %v2415_v55, %v2437_v34  ;;  %v2463_v30 = vmul.f32 1.442695, %v2448_v33 }
 0x9d3   : > { %v2434_v41 = vpop.xlane.xlu1 %2433  ;;  %5884 = vpow2.f32 %v2451_v28 }
 0x9d4   : > { %v2461_v46 = vmul.f32 1.442695, %v2447_v36  ;;  %v2446_v52 = vsub.f32 %v2414_v60, %v2434_v41 }
 0x9d5   : > { %v2431_v32 = vpop.xlane.xlu0 %2430 }
 0x9d6   : > { %5886 = vpow2.f32 %v2461_v46  ;;  %v2445_v54 = vsub.f32 %v2413_v61, %v2431_v32  ;;  %v2459_v58 = vmul.f32 1.442695, %v2446_v52 }
 0x9d7   : > { %v2514_v35 = vpop.permute.xlu1 %2513  ;;  %5888 = vpow2.f32 %v2463_v30 }
 0x9d8   : > { %v2457_v40 = vmul.f32 1.442695, %v2445_v54 }
 0x9d9   : > { %v2516_v59 = vpop.permute.xlu0 %2515 }
 0x9da   : > { %5890 = vpow2.f32 %v2457_v40  ;;  %5481 = vmatprep.subr.bf16.mxu0 %v2516_v59 }
 0x9db   : > { %v6757_v26 = vpop.eup %5878  ;;  %5482 = vmatpush3.bf16.msra.mxu0 %v2516_v59  ;;  %5892 = vpow2.f32 %v2459_v58  ;;  %v2512_v60 = vpop.permute.xlu1 %2511 }
 0x9dc   : > { %5483 = vmatprep.subr.bf16.mxu0 %v2514_v35  ;;  %v2471_v55 = vsel %vm875_vm0, %v6757_v26, 0.0  ;;  %v5881_v56 = vpop.eup %5880 }
 0x9dd   : > { %2472 = vadd.xlane.f32.xlu0 %v2471_v55  ;;  %v2465_v61 = vsel %vm875_vm0, %v5881_v56, 0.0 }
 0x9df   : > { %v5883_v62 = vpop.eup %5882  ;;  %5484 = vmatpush3.bf16.msra.mxu0 %v2514_v35  ;;  %v2510_v2 = vpop.permute.xlu1 %2509 }
 0x9e0   : > { %5485 = vmatprep.subr.bf16.mxu0 %v2512_v60  ;;  %v2474_v23 = vsel %vm875_vm0, %v5883_v62, 0.0  ;;  %v5885_v63 = vpop.eup %5884 }
 0x9e1   : > { %2466 = vadd.xlane.f32.xlu0 %v2465_v61  ;;  %2475 = vadd.xlane.f32.xlu1 %v2474_v23  ;;  %v2468_v57 = vsel %vm875_vm0, %v5885_v63, 0.0 }
 0x9e3   : > { %v6763_v0 = vpop.eup %5886  ;;  %5486 = vmatpush3.bf16.msra.mxu0 %v2512_v60 }
 0x9e4   : > { %5487 = vmatprep.subr.bf16.mxu0 %v2510_v2  ;;  %v2483_v8 = vsel %vm875_vm0, %v6763_v0, 0.0  ;;  %v5889_v53 = vpop.eup %5888 }
 0x9e5   : > { %2484 = vadd.xlane.f32.xlu0 %v2483_v8  ;;  %2469 = vadd.xlane.f32.xlu1 %v2468_v57  ;;  %v2486_v11 = vsel %vm875_vm0, %v5889_v53, 0.0 }
 0x9e7   : > { %v5891_v9 = vpop.eup %5890  ;;  %5488 = vmatpush3.bf16.msra.mxu0 %v2510_v2 }
 0x9e8   : > { %v2477_v7 = vsel %vm875_vm0, %v5891_v9, 0.0  ;;  %v5893_v12 = vpop.eup %5892 }
 0x9e9   : > { %2478 = vadd.xlane.f32.xlu1 %v2477_v7  ;;  %2487 = vadd.xlane.f32.xlu0 %v2486_v11  ;;  %v2480_v14 = vsel %vm875_vm0, %v5893_v12, 0.0 }
 0x9ed   : > { %2481 = vadd.xlane.f32.xlu0 %v2480_v14 }
 0x9fa   : > { %2667 = vrot.lane.b32.xlu1 %v6425_v13, %s6119_s23 }
 0x9fe   : > { %2665 = vrot.lane.b32.xlu1 %v6429_v17, %s6119_s23 }
 0xa02   : > { %2663 = vrot.lane.b32.xlu1 %v6435_v21, %s6119_s23 }
 0xa03   : > { %2669 = vrot.lane.b32.xlu0 %v6419_v10, %s6119_s23 }
 0xa06   : > { %2657 = vrot.lane.b32.xlu1 %v6448_v39, %s6119_s23 }
 0xa07   : > { %2655 = vrot.lane.b32.xlu0 %v6446_v38, %s6119_s23 }
 0xa0a   : > { %2661 = vrot.lane.b32.xlu1 %v6454_v47, %s6119_s23 }
 0xa0b   : > { %2659 = vrot.lane.b32.xlu0 %v6456_v48, %s6119_s23 }
 0xa66   : > { %v2473_v27 = vpop.xlane.xlu0 %2472 }
 0xa6a   : > { %v2467_v28 = vpop.xlane.xlu0 %2466  ;;  %v2476_v31 = vpop.xlane.xlu1 %2475 }
 0xa6b   : > { %5894 = vrcp.f32 %v2476_v31 }
 0xa6c   : > { %5896 = vrcp.f32 %v2467_v28 }
 0xa6d   : > { %5898 = vrcp.f32 %v2473_v27 }
 0xa6e   : > { %v2485_v33 = vpop.xlane.xlu0 %2484  ;;  %v2470_v34 = vpop.xlane.xlu1 %2469 }
 0xa6f   : > { %5900 = vrcp.f32 %v2470_v34 }
 0xa72   : > { %v2488_v36 = vpop.xlane.xlu0 %2487  ;;  %v2479_v41 = vpop.xlane.xlu1 %2478 }
 0xa73   : > { %5902 = vrcp.f32 %v2488_v36 }
 0xa74   : > { %5904 = vrcp.f32 %v2479_v41 }
 0xa75   : > { %5906 = vrcp.f32 %v2485_v33 }
 0xa76   : > { %v2482_v30 = vpop.xlane.xlu0 %2481  ;;  %v2668_v11 = vpop.permute.xlu1 %2667 }
 0xa77   : > { %5908 = vrcp.f32 %v2482_v30  ;;  %v2690_v31 = vsel %vm1282_vm2, %v2668_v11, 0 }
 0xa78   : > { %v5895_v46 = vpop.eup %5894 }
 0xa79   : > { %v5897_v32 = vpop.eup %5896  ;;  %v2500_v58 = vmul.f32 %v5895_v46, %v5883_v62 }
 0xa7a   : > { %v2670_v52 = vpop.permute.xlu0 %2669  ;;  %v5899_v54 = vpop.eup %5898  ;;  %v2497_v40 = vmul.f32 %v5897_v32, %v5881_v56 }
 0xa7b   : > { %5657 = vmatprep.subr.msk.bf16.mxu0 %vm1282_vm2, %v2670_v52  ;;  %v2499_v55 = vmul.f32 %v5899_v54, %v6757_v26  ;;  %v2693_v57 = vsel %vm1282_vm2, %v2670_v52, 0  ;;  %v2666_v33 = vpop.permute.xlu1 %2665 }
 0xa7c   : > { %v5901_v35 = vpop.eup %5900 }
 0xa7d   : > { %v2498_v59 = vmul.f32 %v5901_v35, %v5885_v63  ;;  %v2506_v23 = vpack.c.bf16 %v2500_v58, %v2499_v55 }
 0xa7e   : > { %v2656_v28 = vpop.permute.xlu0 %2655 }
 0xa7f   : > { %v2505_v60 = vpack.c.bf16 %v2498_v59, %v2497_v40 }
 0xa80   : > { %v5903_v61 = vpop.eup %5902 }
 0xa81   : > { %v5905_v2 = vpop.eup %5904  ;;  %5489 = vmatprep.mubr.msk.bf16.mxu0 %vm875_vm0, %v2505_v60  ;;  %v2504_v63 = vmul.f32 %v5903_v61, %v5889_v53  ;;  %v2664_v53 = vpop.permute.xlu1 %2663 }
 0xa82   : > { %v5907_v8 = vpop.eup %5906  ;;  %5490 = vmatmul.mubr.msk.bf16.vlgmr.msra.gmra.mxu0 %vm875_vm0, %v2506_v23  ;;  %v2501_v56 = vmul.f32 %v5905_v2, %v5891_v9  ;;  %v2687_v9 = vsel %vm1282_vm2, %v2666_v33, 0  ;;  %v2660_v34 = vpop.permute.xlu0 %2659 }
 0xa83   : > { %5498 = vmatpush3.bf16.xpose.msra.mxu0 %v2693_v57  ;;  %v2503_v14 = vmul.f32 %v5907_v8, %v6763_v0  ;;  %v2684_v0 = vsel %vm1282_vm2, %v2664_v53, 0 }
 0xa84   : > { %v5909_v7 = vpop.eup %5908  ;;  %5658 = vmatprep.subr.msk.bf16.mxu0 %vm1282_vm2, %v2668_v11 }
 0xa85   : > { %v2502_v62 = vmul.f32 %v5909_v7, %v5893_v12  ;;  %v2508_v27 = vpack.c.bf16 %v2504_v63, %v2503_v14  ;;  %v2658_v12 = vpop.permute.xlu1 %2657 }
 0xa87   : > { %v2507_v26 = vpack.c.bf16 %v2502_v62, %v2501_v56 }
 0xa89   : > { %5493 = vmatprep.mubr.msk.bf16.mxu0 %vm875_vm0, %v2507_v26  ;;  %v2662_v36 = vpop.permute.xlu1 %2661 }
 0xa8a   : > { %5494 = vmatmul.mubr.msk.bf16.gmra.mxu0 %vm875_vm0, %v2508_v27 }
 0xa8b   : > { %5500 = vmatpush3.bf16.xpose.msra.mxu0 %v2690_v31  ;;  %5505 = vmatprep.mubr.msk.bf16.mxu0 %vm1282_vm2, %v2656_v28 }
 0xa8c   : > { %5659 = vmatprep.subr.msk.bf16.mxu0 %vm1282_vm2, %v2666_v33 }
 0xa93   : > { %5502 = vmatpush3.bf16.xpose.msra.mxu0 %v2687_v9 }
 0xa94   : > { %5660 = vmatprep.subr.msk.bf16.mxu0 %vm1282_vm2, %v2664_v53 }
 0xa9b   : > { %5504 = vmatpush3.bf16.xpose.msra.mxu0 %v2684_v0 }
 0xaa2   : > { %5506 = vmatmul.mubr.msk.bf16.vlgmr.msra.gmra.mxu0 %vm1282_vm2, %v2658_v12 }
 0xaa3   : > { %5509 = vmatprep.mubr.msk.bf16.mxu0 %vm1282_vm2, %v2660_v34 }
 0xaaa   : > { %5510 = vmatmul.mubr.msk.bf16.gmra.mxu0 %vm1282_vm2, %v2662_v36 }
 0xb42   : > { %v6805_v41 = vpop.f32.mrf.mxu0 }
 0xb44   : > { %v6807_v30 = vpop.f32.mrf.mxu0 }
 0xb46   : > { %v6809_v46 = vpop.f32.mrf.mxu0 }
 0xb48   : > { %v6811_v52 = vpop.f32.mrf.mxu0 }
 0xb4a   : > { %v6813_v32 = vpop.f32.mrf.mxu0 }
 0xb4b   : > { %7673 = vst [vmem:[#allocation16_spill] sm:$0xff] %v6813_v32 }
 0xb4c   : > { %v6815_v54 = vpop.f32.mrf.mxu0 }
 0xb4d   : > { %7674 = vst [vmem:[#allocation17_spill] sm:$0xff] %v6815_v54 }
 0xb4e   : > { %v6817_v35 = vpop.f32.mrf.mxu0 }
 0xb4f   : > { %7675 = vst [vmem:[#allocation18_spill] sm:$0xff] %v6817_v35 }
 0xb50   : > { %v6819_v58 = vpop.f32.mrf.mxu0 }
 0xb51   : > { %7676 = vst [vmem:[#allocation19_spill] sm:$0xff] %v6819_v58 }
 0xb62   : > { %v5507_v40 = vpop.f32.mrf.mxu0 }
 0xb63   : > { %v2762_v61 = vmul.f32 0.35355338, %v5507_v40 }
 0xb64   : > { %v2729_v59 = vpop.f32.mrf.mxu0 }
 0xb65   : > { %v2760_v55 = vmul.f32 0.35355338, %v2729_v59  ;;  %v2774_v11 = vsel %vm875_vm0, %v2762_v61, -inf }
 0xb66   : > { %v5508_v60 = vpop.f32.mrf.mxu0 }
 0xb67   : > { %v2768_v23 = vsel %vm875_vm0, %v2760_v55, -inf  ;;  %v2763_v7 = vmul.f32 0.35355338, %v5508_v60 }
 0xb68   : > { %2769 = vmax.xlane.f32.xlu0 %v2768_v23  ;;  %v2732_v2 = vpop.f32.mrf.mxu0 }
 0xb69   : > { %v2761_v8 = vmul.f32 0.35355338, %v2732_v2  ;;  %v2777_v27 = vsel %vm875_vm0, %v2763_v7, -inf }
 0xb6a   : > { %v5511_v57 = vpop.f32.mrf.mxu0 }
 0xb6b   : > { %v2771_v56 = vsel %vm875_vm0, %v2761_v8, -inf  ;;  %v2766_v26 = vmul.f32 0.35355338, %v5511_v57 }
 0xb6c   : > { %2775 = vmax.xlane.f32.xlu0 %v2774_v11  ;;  %2772 = vmax.xlane.f32.xlu1 %v2771_v56  ;;  %v2745_v62 = vpop.f32.mrf.mxu0 }
 0xb6d   : > { %v2764_v9 = vmul.f32 0.35355338, %v2745_v62  ;;  %v2786_v53 = vsel %vm875_vm0, %v2766_v26, -inf }
 0xb6e   : > { %v5512_v63 = vpop.f32.mrf.mxu0 }
 0xb6f   : > { %v2767_v14 = vmul.f32 0.35355338, %v5512_v63  ;;  %v2780_v12 = vsel %vm875_vm0, %v2764_v9, -inf }
 0xb70   : > { %2778 = vmax.xlane.f32.xlu0 %v2777_v27  ;;  %v2748_v28 = vpop.f32.mrf.mxu0 }
 0xb71   : > { %v2765_v31 = vmul.f32 0.35355338, %v2748_v28  ;;  %v2789_v33 = vsel %vm875_vm0, %v2767_v14, -inf }
 0xb72   : > { %2790 = vmax.xlane.f32.xlu1 %v2789_v33 }
 0xb73   : > { %v2783_v0 = vsel %vm875_vm0, %v2765_v31, -inf }
 0xb74   : > { %2787 = vmax.xlane.f32.xlu0 %v2786_v53 }
 0xb76   : > { %2784 = vmax.xlane.f32.xlu1 %v2783_v0 }
 0xb78   : > { %2781 = vmax.xlane.f32.xlu0 %v2780_v12 }
 0xb87   : > { %2864 = vrot.lane.b32.xlu1 %v6521_v5, %s6119_s23 }
 0xb8b   : > { %2862 = vrot.lane.b32.xlu1 %v6519_v1, %s6119_s23 }
 0xb8e   : > { %2866 = vrot.lane.b32.xlu0 %v6515_v29, %s6119_s23 }
 0xb8f   : > { %2860 = vrot.lane.b32.xlu1 %v6527_v6, %s6119_s23 }
 0xbf1   : > { %v2770_v34 = vpop.xlane.xlu0 %2769 }
 0xbf2   : > { %v2792_v36 = vsub.f32 %v2760_v55, %v2770_v34 }
 0xbf4   : > { %v2800_v23 = vmul.f32 1.442695, %v2792_v36 }
 0xbf5   : > { %v2776_v40 = vpop.xlane.xlu0 %2775  ;;  %v2773_v59 = vpop.xlane.xlu1 %2772 }
 0xbf6   : > { %v2794_v60 = vsub.f32 %v2762_v61, %v2776_v40  ;;  %v2793_v57 = vsub.f32 %v2761_v8, %v2773_v59 }
 0xbf8   : > { %v2804_v2 = vmul.f32 1.442695, %v2794_v60  ;;  %v2802_v63 = vmul.f32 1.442695, %v2793_v57 }
 0xbf9   : > { %v2779_v11 = vpop.xlane.xlu0 %2778 }
 0xbfa   : > { %5910 = vpow2.f32 %v2804_v2  ;;  %v2795_v56 = vsub.f32 %v2763_v7, %v2779_v11 }
 0xbfb   : > { %v2791_v62 = vpop.xlane.xlu1 %2790  ;;  %5912 = vpow2.f32 %v2800_v23 }
 0xbfc   : > { %v2806_v27 = vmul.f32 1.442695, %v2795_v56  ;;  %v2799_v28 = vsub.f32 %v2767_v14, %v2791_v62 }
 0xbfd   : > { %v2788_v33 = vpop.xlane.xlu0 %2787 }
 0xbfe   : > { %5914 = vpow2.f32 %v2806_v27  ;;  %v2798_v53 = vsub.f32 %v2766_v26, %v2788_v33  ;;  %v2814_v55 = vmul.f32 1.442695, %v2799_v28 }
 0xbff   : > { %v2785_v0 = vpop.xlane.xlu1 %2784  ;;  %5916 = vpow2.f32 %v2802_v63 }
 0xc00   : > { %v2812_v12 = vmul.f32 1.442695, %v2798_v53  ;;  %v2797_v34 = vsub.f32 %v2765_v31, %v2785_v0 }
 0xc01   : > { %v2782_v61 = vpop.xlane.xlu0 %2781 }
 0xc02   : > { %5918 = vpow2.f32 %v2812_v12  ;;  %v2796_v36 = vsub.f32 %v2764_v9, %v2782_v61  ;;  %v2810_v40 = vmul.f32 1.442695, %v2797_v34 }
 0xc03   : > { %v2865_v8 = vpop.permute.xlu1 %2864  ;;  %5920 = vpow2.f32 %v2814_v55 }
 0xc04   : > { %v2808_v7 = vmul.f32 1.442695, %v2796_v36 }
 0xc05   : > { %v2867_v59 = vpop.permute.xlu0 %2866 }
 0xc06   : > { %5922 = vpow2.f32 %v2808_v7  ;;  %5513 = vmatprep.subr.bf16.mxu1 %v2867_v59 }
 0xc07   : > { %v6837_v60 = vpop.eup %5910  ;;  %5514 = vmatpush3.bf16.msra.mxu1 %v2867_v59  ;;  %5924 = vpow2.f32 %v2810_v40  ;;  %v2863_v31 = vpop.permute.xlu1 %2862 }
 0xc08   : > { %5515 = vmatprep.subr.bf16.mxu1 %v2865_v8  ;;  %v2822_v26 = vsel %vm875_vm0, %v6837_v60, 0.0  ;;  %v5913_v14 = vpop.eup %5912 }
 0xc09   : > { %2823 = vadd.xlane.f32.xlu0 %v2822_v26  ;;  %v2816_v9 = vsel %vm875_vm0, %v5913_v14, 0.0 }
 0xc0b   : > { %v5915_v23 = vpop.eup %5914  ;;  %5516 = vmatpush3.bf16.msra.mxu1 %v2865_v8  ;;  %v2861_v56 = vpop.permute.xlu1 %2860 }
 0xc0c   : > { %5517 = vmatprep.subr.bf16.mxu1 %v2863_v31  ;;  %v2825_v2 = vsel %vm875_vm0, %v5915_v23, 0.0  ;;  %v5917_v57 = vpop.eup %5916 }
 0xc0d   : > { %2817 = vadd.xlane.f32.xlu0 %v2816_v9  ;;  %2826 = vadd.xlane.f32.xlu1 %v2825_v2  ;;  %v2819_v63 = vsel %vm875_vm0, %v5917_v57, 0.0 }
 0xc0f   : > { %v6843_v11 = vpop.eup %5918  ;;  %5518 = vmatpush3.bf16.msra.mxu1 %v2863_v31 }
 0xc10   : > { %5519 = vmatprep.subr.bf16.mxu1 %v2861_v56  ;;  %v2834_v62 = vsel %vm875_vm0, %v6843_v11, 0.0  ;;  %v5921_v27 = vpop.eup %5920 }
 0xc11   : > { %2835 = vadd.xlane.f32.xlu0 %v2834_v62  ;;  %2820 = vadd.xlane.f32.xlu1 %v2819_v63  ;;  %v2837_v53 = vsel %vm875_vm0, %v5921_v27, 0.0 }
 0xc13   : > { %v5923_v28 = vpop.eup %5922  ;;  %5520 = vmatpush3.bf16.msra.mxu1 %v2861_v56 }
 0xc14   : > { %v2828_v33 = vsel %vm875_vm0, %v5923_v28, 0.0  ;;  %v5925_v0 = vpop.eup %5924 }
 0xc15   : > { %2829 = vadd.xlane.f32.xlu1 %v2828_v33  ;;  %2838 = vadd.xlane.f32.xlu0 %v2837_v53  ;;  %v2831_v55 = vsel %vm875_vm0, %v5925_v0, 0.0 }
 0xc19   : > { %2832 = vadd.xlane.f32.xlu0 %v2831_v55 }
 0xc26   : > { %3018 = vrot.lane.b32.xlu1 %v6425_v13, %s6120_s6 }
 0xc2a   : > { %3016 = vrot.lane.b32.xlu1 %v6429_v17, %s6120_s6 }
 0xc2e   : > { %3014 = vrot.lane.b32.xlu1 %v6435_v21, %s6120_s6 }
 0xc2f   : > { %3020 = vrot.lane.b32.xlu0 %v6419_v10, %s6120_s6 }
 0xc32   : > { %3008 = vrot.lane.b32.xlu1 %v6448_v39, %s6120_s6 }
 0xc33   : > { %3006 = vrot.lane.b32.xlu0 %v6446_v38, %s6120_s6 }
 0xc36   : > { %3012 = vrot.lane.b32.xlu1 %v6454_v47, %s6120_s6 }
 0xc37   : > { %3010 = vrot.lane.b32.xlu0 %v6456_v48, %s6120_s6 }
 0xc92   : > { %v2824_v12 = vpop.xlane.xlu0 %2823 }
 0xc96   : > { %v2818_v34 = vpop.xlane.xlu0 %2817  ;;  %v2827_v61 = vpop.xlane.xlu1 %2826 }
 0xc97   : > { %5926 = vrcp.f32 %v2827_v61 }
 0xc98   : > { %5928 = vrcp.f32 %v2818_v34 }
 0xc99   : > { %5930 = vrcp.f32 %v2824_v12 }
 0xc9a   : > { %v2836_v36 = vpop.xlane.xlu0 %2835  ;;  %v2821_v8 = vpop.xlane.xlu1 %2820 }
 0xc9b   : > { %5932 = vrcp.f32 %v2821_v8 }
 0xc9e   : > { %v2839_v40 = vpop.xlane.xlu0 %2838  ;;  %v2830_v7 = vpop.xlane.xlu1 %2829 }
 0xc9f   : > { %5934 = vrcp.f32 %v2839_v40 }
 0xca0   : > { %5936 = vrcp.f32 %v2830_v7 }
 0xca1   : > { %5938 = vrcp.f32 %v2836_v36 }
 0xca2   : > { %v2833_v59 = vpop.xlane.xlu0 %2832  ;;  %v3019_v7 = vpop.permute.xlu1 %3018 }
 0xca3   : > { %5940 = vrcp.f32 %v2833_v59 }
 0xca4   : > { %v5927_v26 = vpop.eup %5926 }
 0xca5   : > { %v5929_v9 = vpop.eup %5928  ;;  %v2851_v62 = vmul.f32 %v5927_v26, %v5915_v23 }
 0xca6   : > { %v3021_v31 = vpop.permute.xlu0 %3020  ;;  %v5931_v2 = vpop.eup %5930  ;;  %v2848_v63 = vmul.f32 %v5929_v9, %v5913_v14 }
 0xca7   : > { %5661 = vmatprep.subr.msk.bf16.mxu1 %vm1282_vm2, %v3021_v31  ;;  %v2850_v53 = vmul.f32 %v5931_v2, %v6837_v60  ;;  %v3044_v8 = vsel %vm1282_vm2, %v3021_v31, 0  ;;  %v3041_v2 = vsel %vm1282_vm2, %v3019_v7, 0  ;;  %v3017_v31 = vpop.permute.xlu1 %3016 }
 0xca8   : > { %v5933_v56 = vpop.eup %5932 }
 0xca9   : > { %v2849_v33 = vmul.f32 %v5933_v56, %v5917_v57  ;;  %v2857_v34 = vpack.c.bf16 %v2851_v62, %v2850_v53 }
 0xcaa   : > { %v3007_v9 = vpop.permute.xlu0 %3006 }
 0xcab   : > { %v2856_v55 = vpack.c.bf16 %v2849_v33, %v2848_v63 }
 0xcac   : > { %v5935_v12 = vpop.eup %5934 }
 0xcad   : > { %v5937_v61 = vpop.eup %5936  ;;  %5521 = vmatprep.mubr.msk.bf16.mxu1 %vm875_vm0, %v2856_v55  ;;  %v2855_v57 = vmul.f32 %v5935_v12, %v5921_v27  ;;  %v3015_v27 = vpop.permute.xlu1 %3014 }
 0xcae   : > { %v5939_v36 = vpop.eup %5938  ;;  %5522 = vmatmul.mubr.msk.bf16.vlgmr.msra.gmra.mxu1 %vm875_vm0, %v2857_v34  ;;  %v2852_v14 = vmul.f32 %v5937_v61, %v5923_v28  ;;  %v3038_v28 = vsel %vm1282_vm2, %v3017_v31, 0  ;;  %v3011_v56 = vpop.permute.xlu0 %3010 }
 0xcaf   : > { %5530 = vmatpush3.bf16.xpose.msra.mxu1 %v3044_v8  ;;  %v2854_v59 = vmul.f32 %v5939_v36, %v6843_v11  ;;  %v3035_v11 = vsel %vm1282_vm2, %v3015_v27, 0 }
 0xcb0   : > { %v5941_v40 = vpop.eup %5940  ;;  %5662 = vmatprep.subr.msk.bf16.mxu1 %vm1282_vm2, %v3019_v7 }
 0xcb1   : > { %v2853_v23 = vmul.f32 %v5941_v40, %v5925_v0  ;;  %v2859_v26 = vpack.c.bf16 %v2855_v57, %v2854_v59  ;;  %v3009_v0 = vpop.permute.xlu1 %3008 }
 0xcb3   : > { %v2858_v60 = vpack.c.bf16 %v2853_v23, %v2852_v14 }
 0xcb5   : > { %5525 = vmatprep.mubr.msk.bf16.mxu1 %vm875_vm0, %v2858_v60  ;;  %v3013_v62 = vpop.permute.xlu1 %3012 }
 0xcb6   : > { %5526 = vmatmul.mubr.msk.bf16.gmra.mxu1 %vm875_vm0, %v2859_v26 }
 0xcb7   : > { %5532 = vmatpush3.bf16.xpose.msra.mxu1 %v3041_v2  ;;  %5537 = vmatprep.mubr.msk.bf16.mxu1 %vm1282_vm2, %v3007_v9 }
 0xcb8   : > { %5663 = vmatprep.subr.msk.bf16.mxu1 %vm1282_vm2, %v3017_v31 }
 0xcbf   : > { %5534 = vmatpush3.bf16.xpose.msra.mxu1 %v3038_v28 }
 0xcc0   : > { %5664 = vmatprep.subr.msk.bf16.mxu1 %vm1282_vm2, %v3015_v27 }
 0xcc7   : > { %5536 = vmatpush3.bf16.xpose.msra.mxu1 %v3035_v11 }
 0xcce   : > { %5538 = vmatmul.mubr.msk.bf16.vlgmr.msra.gmra.mxu1 %vm1282_vm2, %v3009_v0 }
 0xccf   : > { %5541 = vmatprep.mubr.msk.bf16.mxu1 %vm1282_vm2, %v3011_v56 }
 0xcd6   : > { %5542 = vmatmul.mubr.msk.bf16.gmra.mxu1 %vm1282_vm2, %v3013_v62 }
 0xd6e   : > { %v6885_v63 = vpop.f32.mrf.mxu1 }
 0xd70   : > { %v6887_v33 = vpop.f32.mrf.mxu1 }
 0xd72   : > { %v6889_v53 = vpop.f32.mrf.mxu1 }
 0xd74   : > { %v6891_v55 = vpop.f32.mrf.mxu1 }
 0xd76   : > { %v6893_v12 = vpop.f32.mrf.mxu1 }
 0xd77   : > { %7677 = vst [vmem:[#allocation20_spill] sm:$0xff] %v6893_v12 }
 0xd78   : > { %v6895_v34 = vpop.f32.mrf.mxu1 }
 0xd79   : > { %7678 = vst [vmem:[#allocation21_spill] sm:$0xff] %v6895_v34 }
 0xd7a   : > { %v6897_v61 = vpop.f32.mrf.mxu1 }
 0xd7b   : > { %7679 = vst [vmem:[#allocation22_spill] sm:$0xff] %v6897_v61 }
 0xd7c   : > { %v6899_v36 = vpop.f32.mrf.mxu1 }
 0xd7d   : > { %7680 = vst [vmem:[#allocation23_spill] sm:$0xff] %v6899_v36 }
 0xd8e   : > { %v5539_v8 = vpop.f32.mrf.mxu1 }
 0xd8f   : > { %v3113_v23 = vmul.f32 0.35355338, %v5539_v8 }
 0xd90   : > { %v3080_v40 = vpop.f32.mrf.mxu1 }
 0xd91   : > { %v3111_v7 = vmul.f32 0.35355338, %v3080_v40  ;;  %v3125_v2 = vsel %vm875_vm0, %v3113_v23, -inf }
 0xd92   : > { %v5540_v14 = vpop.f32.mrf.mxu1 }
 0xd93   : > { %v3119_v57 = vsel %vm875_vm0, %v3111_v7, -inf  ;;  %v3114_v9 = vmul.f32 0.35355338, %v5540_v14 }
 0xd94   : > { %3120 = vmax.xlane.f32.xlu0 %v3119_v57  ;;  %v3083_v60 = vpop.f32.mrf.mxu1 }
 0xd95   : > { %v3112_v59 = vmul.f32 0.35355338, %v3083_v60  ;;  %v3128_v56 = vsel %vm875_vm0, %v3114_v9, -inf }
 0xd96   : > { %v5543_v26 = vpop.f32.mrf.mxu1 }
 0xd97   : > { %v3122_v31 = vsel %vm875_vm0, %v3112_v59, -inf  ;;  %v3117_v11 = vmul.f32 0.35355338, %v5543_v26 }
 0xd98   : > { %3126 = vmax.xlane.f32.xlu0 %v3125_v2  ;;  %3123 = vmax.xlane.f32.xlu1 %v3122_v31  ;;  %v3096_v28 = vpop.f32.mrf.mxu1 }
 0xd99   : > { %v3115_v57 = vmul.f32 0.35355338, %v3096_v28  ;;  %v3137_v14 = vsel %vm875_vm0, %v3117_v11, -inf }
 0xd9a   : > { %v5544_v27 = vpop.f32.mrf.mxu1 }
 0xd9b   : > { %v3118_v0 = vmul.f32 0.35355338, %v5544_v27  ;;  %v3131_v2 = vsel %vm875_vm0, %v3115_v57, -inf }
 0xd9c   : > { %3129 = vmax.xlane.f32.xlu0 %v3128_v56  ;;  %v3099_v62 = vpop.f32.mrf.mxu1 }
 0xd9d   : > { %v3116_v8 = vmul.f32 0.35355338, %v3099_v62  ;;  %v3140_v40 = vsel %vm875_vm0, %v3118_v0, -inf }
 0xd9e   : > { %3141 = vmax.xlane.f32.xlu1 %v3140_v40 }
 0xd9f   : > { %v3134_v60 = vsel %vm875_vm0, %v3116_v8, -inf }
 0xda0   : > { %3138 = vmax.xlane.f32.xlu0 %v3137_v14 }
 0xda2   : > { %3135 = vmax.xlane.f32.xlu1 %v3134_v60 }
 0xda4   : > { %3132 = vmax.xlane.f32.xlu0 %v3131_v2 }
 0xdb3   : > { %3215 = vrot.lane.b32.xlu1 %v6521_v5, %s6120_s6 }
 0xdb7   : > { %3213 = vrot.lane.b32.xlu1 %v6519_v1, %s6120_s6 }
 0xdba   : > { %3217 = vrot.lane.b32.xlu0 %v6515_v29, %s6120_s6 }
 0xdbb   : > { %3211 = vrot.lane.b32.xlu1 %v6527_v6, %s6120_s6  ;;  %s6129_s6 = smov 56  }
 0xe1d   : > { %v3121_v26 = vpop.xlane.xlu0 %3120 }
 0xe1e   : > { %v3143_v31 = vsub.f32 %v3111_v7, %v3121_v26 }
 0xe20   : > { %v3151_v62 = vmul.f32 1.442695, %v3143_v31 }
 0xe21   : > { %v3127_v28 = vpop.xlane.xlu0 %3126  ;;  %v3124_v27 = vpop.xlane.xlu1 %3123 }
 0xe22   : > { %v3145_v56 = vsub.f32 %v3113_v23, %v3127_v28  ;;  %v3144_v14 = vsub.f32 %v3112_v59, %v3124_v27 }
 0xe24   : > { %v3155_v40 = vmul.f32 1.442695, %v3145_v56  ;;  %v3153_v16 = vmul.f32 1.442695, %v3144_v14 }
 0xe25   : > { %v3130_v60 = vpop.xlane.xlu0 %3129 }
 0xe26   : > { %5942 = vpow2.f32 %v3155_v40  ;;  %v3146_v2 = vsub.f32 %v3114_v9, %v3130_v60 }
 0xe27   : > { %v3142_v22 = vpop.xlane.xlu1 %3141  ;;  %5944 = vpow2.f32 %v3151_v62 }
 0xe28   : > { %v3157_v61 = vmul.f32 1.442695, %v3146_v2  ;;  %v3150_v36 = vsub.f32 %v3118_v0, %v3142_v22 }
 0xe29   : > { %v3139_v35 = vpop.xlane.xlu0 %3138 }
 0xe2a   : > { %5946 = vpow2.f32 %v3157_v61  ;;  %v3149_v12 = vsub.f32 %v3117_v11, %v3139_v35  ;;  %v3165_v7 = vmul.f32 1.442695, %v3150_v36 }
 0xe2b   : > { %v3136_v58 = vpop.xlane.xlu1 %3135  ;;  %5948 = vpow2.f32 %v3153_v16 }
 0xe2c   : > { %v3163_v26 = vmul.f32 1.442695, %v3149_v12  ;;  %v3148_v34 = vsub.f32 %v3116_v8, %v3136_v58 }
 0xe2d   : > { %v3133_v23 = vpop.xlane.xlu0 %3132 }
 0xe2e   : > { %5950 = vpow2.f32 %v3163_v26  ;;  %v3147_v31 = vsub.f32 %v3115_v57, %v3133_v23  ;;  %v3161_v28 = vmul.f32 1.442695, %v3148_v34 }
 0xe2f   : > { %v3216_v59 = vpop.permute.xlu1 %3215  ;;  %5952 = vpow2.f32 %v3165_v7 }
 0xe30   : > { %v3159_v9 = vmul.f32 1.442695, %v3147_v31 }
 0xe31   : > { %v3218_v27 = vpop.permute.xlu0 %3217 }
 0xe32   : > { %5954 = vpow2.f32 %v3159_v9  ;;  %5545 = vmatprep.subr.bf16.mxu0 %v3218_v27 }
 0xe33   : > { %v6917_v56 = vpop.eup %5942  ;;  %5546 = vmatpush3.bf16.msra.mxu0 %v3218_v27  ;;  %5956 = vpow2.f32 %v3161_v28  ;;  %v3214_v35 = vpop.permute.xlu1 %3213 }
 0xe34   : > { %5547 = vmatprep.subr.bf16.mxu0 %v3216_v59  ;;  %v3173_v16 = vsel %vm875_vm0, %v6917_v56, 0.0  ;;  %v5945_v22 = vpop.eup %5944 }
 0xe35   : > { %3174 = vadd.xlane.f32.xlu0 %v3173_v16  ;;  %v3167_v12 = vsel %vm875_vm0, %v5945_v22, 0.0 }
 0xe37   : > { %v5947_v58 = vpop.eup %5946  ;;  %5548 = vmatpush3.bf16.msra.mxu0 %v3216_v59  ;;  %v3212_v11 = vpop.permute.xlu1 %3211 }
 0xe38   : > { %5549 = vmatprep.subr.bf16.mxu0 %v3214_v35  ;;  %v3176_v34 = vsel %vm875_vm0, %v5947_v58, 0.0  ;;  %v5949_v61 = vpop.eup %5948 }
 0xe39   : > { %3168 = vadd.xlane.f32.xlu0 %v3167_v12  ;;  %3177 = vadd.xlane.f32.xlu1 %v3176_v34  ;;  %v3170_v8 = vsel %vm875_vm0, %v5949_v61, 0.0 }
 0xe3b   : > { %v6923_v36 = vpop.eup %5950  ;;  %5550 = vmatpush3.bf16.msra.mxu0 %v3214_v35 }
 0xe3c   : > { %5551 = vmatprep.subr.bf16.mxu0 %v3212_v11  ;;  %v3185_v0 = vsel %vm875_vm0, %v6923_v36, 0.0  ;;  %v5953_v57 = vpop.eup %5952 }
 0xe3d   : > { %3186 = vadd.xlane.f32.xlu0 %v3185_v0  ;;  %3171 = vadd.xlane.f32.xlu1 %v3170_v8  ;;  %v3188_v14 = vsel %vm875_vm0, %v5953_v57, 0.0 }
 0xe3f   : > { %v5955_v62 = vpop.eup %5954  ;;  %5552 = vmatpush3.bf16.msra.mxu0 %v3212_v11 }
 0xe40   : > { %v3179_v40 = vsel %vm875_vm0, %v5955_v62, 0.0  ;;  %v5957_v60 = vpop.eup %5956 }
 0xe41   : > { %3180 = vadd.xlane.f32.xlu1 %v3179_v40  ;;  %3189 = vadd.xlane.f32.xlu0 %v3188_v14  ;;  %v3182_v2 = vsel %vm875_vm0, %v5957_v60, 0.0 }
 0xe45   : > { %3183 = vadd.xlane.f32.xlu0 %v3182_v2 }
 0xe52   : > { %3369 = vrot.lane.b32.xlu1 %v6425_v13, %s6121_s24 }
 0xe56   : > { %3367 = vrot.lane.b32.xlu1 %v6429_v17, %s6121_s24 }
 0xe5a   : > { %3365 = vrot.lane.b32.xlu1 %v6435_v21, %s6121_s24 }
 0xe5b   : > { %3371 = vrot.lane.b32.xlu0 %v6419_v10, %s6121_s24 }
 0xe5e   : > { %3359 = vrot.lane.b32.xlu1 %v6448_v39, %s6121_s24 }
 0xe5f   : > { %3357 = vrot.lane.b32.xlu0 %v6446_v38, %s6121_s24 }
 0xe62   : > { %3363 = vrot.lane.b32.xlu1 %v6454_v47, %s6121_s24 }
 0xe63   : > { %3361 = vrot.lane.b32.xlu0 %v6456_v48, %s6121_s24 }
 0xebe   : > { %v3175_v7 = vpop.xlane.xlu0 %3174 }
 0xec2   : > { %v3169_v26 = vpop.xlane.xlu0 %3168  ;;  %v3178_v23 = vpop.xlane.xlu1 %3177 }
 0xec3   : > { %5958 = vrcp.f32 %v3178_v23 }
 0xec4   : > { %5960 = vrcp.f32 %v3169_v26 }
 0xec5   : > { %5962 = vrcp.f32 %v3175_v7 }
 0xec6   : > { %v3187_v31 = vpop.xlane.xlu0 %3186  ;;  %v3172_v59 = vpop.xlane.xlu1 %3171 }
 0xec7   : > { %5964 = vrcp.f32 %v3172_v59 }
 0xeca   : > { %v3190_v28 = vpop.xlane.xlu0 %3189  ;;  %v3181_v9 = vpop.xlane.xlu1 %3180 }
 0xecb   : > { %5966 = vrcp.f32 %v3190_v28 }
 0xecc   : > { %5968 = vrcp.f32 %v3181_v9 }
 0xecd   : > { %5970 = vrcp.f32 %v3187_v31 }
 0xece   : > { %v3184_v27 = vpop.xlane.xlu0 %3183  ;;  %v3370_v9 = vpop.permute.xlu1 %3369 }
 0xecf   : > { %5972 = vrcp.f32 %v3184_v27 }
 0xed0   : > { %v5959_v16 = vpop.eup %5958 }
 0xed1   : > { %v5961_v12 = vpop.eup %5960  ;;  %v3202_v0 = vmul.f32 %v5959_v16, %v5947_v58 }
 0xed2   : > { %v3372_v35 = vpop.permute.xlu0 %3371  ;;  %v5963_v34 = vpop.eup %5962  ;;  %v3199_v8 = vmul.f32 %v5961_v12, %v5945_v22 }
 0xed3   : > { %5665 = vmatprep.subr.msk.bf16.mxu0 %vm1282_vm2, %v3372_v35  ;;  %v3201_v14 = vmul.f32 %v5963_v34, %v6917_v56  ;;  %v3395_v59 = vsel %vm1282_vm2, %v3372_v35, 0  ;;  %v3392_v34 = vsel %vm1282_vm2, %v3370_v9, 0  ;;  %v3368_v35 = vpop.permute.xlu1 %3367 }
 0xed4   : > { %v5965_v11 = vpop.eup %5964 }
 0xed5   : > { %v3200_v40 = vmul.f32 %v5965_v11, %v5949_v61  ;;  %v3208_v26 = vpack.c.bf16 %v3202_v0, %v3201_v14 }
 0xed6   : > { %v3358_v12 = vpop.permute.xlu0 %3357 }
 0xed7   : > { %v3207_v2 = vpack.c.bf16 %v3200_v40, %v3199_v8 }
 0xed8   : > { %v5967_v7 = vpop.eup %5966 }
 0xed9   : > { %v5969_v23 = vpop.eup %5968  ;;  %5553 = vmatprep.mubr.msk.bf16.mxu0 %vm875_vm0, %v3207_v2  ;;  %v3206_v61 = vmul.f32 %v5967_v7, %v5953_v57  ;;  %v3366_v57 = vpop.permute.xlu1 %3365 }
 0xeda   : > { %v5971_v31 = vpop.eup %5970  ;;  %5554 = vmatmul.mubr.msk.bf16.vlgmr.msra.gmra.mxu0 %vm875_vm0, %v3208_v26  ;;  %v3203_v22 = vmul.f32 %v5969_v23, %v5955_v62  ;;  %v3389_v62 = vsel %vm1282_vm2, %v3368_v35, 0  ;;  %v3362_v11 = vpop.permute.xlu0 %3361 }
 0xedb   : > { %5562 = vmatpush3.bf16.xpose.msra.mxu0 %v3395_v59  ;;  %v3205_v27 = vmul.f32 %v5971_v31, %v6923_v36  ;;  %v3386_v36 = vsel %vm1282_vm2, %v3366_v57, 0 }
 0xedc   : > { %v5973_v28 = vpop.eup %5972  ;;  %5666 = vmatprep.subr.msk.bf16.mxu0 %vm1282_vm2, %v3370_v9 }
 0xedd   : > { %v3204_v58 = vmul.f32 %v5973_v28, %v5957_v60  ;;  %v3210_v16 = vpack.c.bf16 %v3206_v61, %v3205_v27  ;;  %v3360_v60 = vpop.permute.xlu1 %3359 }
 0xedf   : > { %v3209_v56 = vpack.c.bf16 %v3204_v58, %v3203_v22 }
 0xee1   : > { %5557 = vmatprep.mubr.msk.bf16.mxu0 %vm875_vm0, %v3209_v56  ;;  %v3364_v0 = vpop.permute.xlu1 %3363 }
 0xee2   : > { %5558 = vmatmul.mubr.msk.bf16.gmra.mxu0 %vm875_vm0, %v3210_v16 }
 0xee3   : > { %5564 = vmatpush3.bf16.xpose.msra.mxu0 %v3392_v34  ;;  %5569 = vmatprep.mubr.msk.bf16.mxu0 %vm1282_vm2, %v3358_v12 }
 0xee4   : > { %5667 = vmatprep.subr.msk.bf16.mxu0 %vm1282_vm2, %v3368_v35 }
 0xeeb   : > { %5566 = vmatpush3.bf16.xpose.msra.mxu0 %v3389_v62 }
 0xeec   : > { %5668 = vmatprep.subr.msk.bf16.mxu0 %vm1282_vm2, %v3366_v57 }
 0xef3   : > { %5568 = vmatpush3.bf16.xpose.msra.mxu0 %v3386_v36 }
 0xefa   : > { %5570 = vmatmul.mubr.msk.bf16.vlgmr.msra.gmra.mxu0 %vm1282_vm2, %v3360_v60 }
 0xefb   : > { %5573 = vmatprep.mubr.msk.bf16.mxu0 %vm1282_vm2, %v3362_v11 }
 0xf02   : > { %5574 = vmatmul.mubr.msk.bf16.gmra.mxu0 %vm1282_vm2, %v3364_v0 }
 0xf9a   : > { %v6965_v8 = vpop.f32.mrf.mxu0 }
 0xf9c   : > { %v6967_v40 = vpop.f32.mrf.mxu0 }
 0xf9e   : > { %v6969_v14 = vpop.f32.mrf.mxu0 }
 0xfa0   : > { %v6971_v2 = vpop.f32.mrf.mxu0 }
 0xfa2   : > { %v6973_v7 = vpop.f32.mrf.mxu0 }
 0xfa3   : > { %7681 = vst [vmem:[#allocation24_spill] sm:$0xff] %v6973_v7 }
 0xfa4   : > { %v6975_v26 = vpop.f32.mrf.mxu0 }
 0xfa5   : > { %7682 = vst [vmem:[#allocation25_spill] sm:$0xff] %v6975_v26 }
 0xfa6   : > { %v6977_v23 = vpop.f32.mrf.mxu0 }
 0xfa7   : > { %7683 = vst [vmem:[#allocation26_spill] sm:$0xff] %v6977_v23 }
 0xfa8   : > { %v6979_v31 = vpop.f32.mrf.mxu0 }
 0xfa9   : > { %7684 = vst [vmem:[#allocation27_spill] sm:$0xff] %v6979_v31 }
 0xfba   : > { %v5571_v59 = vpop.f32.mrf.mxu0 }
 0xfbb   : > { %v3464_v58 = vmul.f32 0.35355338, %v5571_v59 }
 0xfbc   : > { %v3431_v28 = vpop.f32.mrf.mxu0 }
 0xfbd   : > { %v3462_v9 = vmul.f32 0.35355338, %v3431_v28  ;;  %v3476_v34 = vsel %vm875_vm0, %v3464_v58, -inf }
 0xfbe   : > { %v5572_v22 = vpop.f32.mrf.mxu0 }
 0xfbf   : > { %v3470_v61 = vsel %vm875_vm0, %v3462_v9, -inf  ;;  %v3465_v12 = vmul.f32 0.35355338, %v5572_v22 }
 0xfc0   : > { %3471 = vmax.xlane.f32.xlu0 %v3470_v61  ;;  %v3434_v56 = vpop.f32.mrf.mxu0 }
 0xfc1   : > { %v3463_v27 = vmul.f32 0.35355338, %v3434_v56  ;;  %v3479_v11 = vsel %vm875_vm0, %v3465_v12, -inf }
 0xfc2   : > { %v5575_v16 = vpop.f32.mrf.mxu0 }
 0xfc3   : > { %v3473_v35 = vsel %vm875_vm0, %v3463_v27, -inf  ;;  %v3468_v36 = vmul.f32 0.35355338, %v5575_v16 }
 0xfc4   : > { %3477 = vmax.xlane.f32.xlu0 %v3476_v34  ;;  %3474 = vmax.xlane.f32.xlu1 %v3473_v35  ;;  %v3447_v62 = vpop.f32.mrf.mxu0 }
 0xfc5   : > { %v3466_v61 = vmul.f32 0.35355338, %v3447_v62  ;;  %v3488_v22 = vsel %vm875_vm0, %v3468_v36, -inf }
 0xfc6   : > { %v5576_v57 = vpop.f32.mrf.mxu0 }
 0xfc7   : > { %v3469_v60 = vmul.f32 0.35355338, %v5576_v57  ;;  %v3482_v34 = vsel %vm875_vm0, %v3466_v61, -inf }
 0xfc8   : > { %3480 = vmax.xlane.f32.xlu0 %v3479_v11  ;;  %v3450_v0 = vpop.f32.mrf.mxu0 }
 0xfc9   : > { %v3467_v59 = vmul.f32 0.35355338, %v3450_v0  ;;  %v3491_v28 = vsel %vm875_vm0, %v3469_v60, -inf }
 0xfca   : > { %3492 = vmax.xlane.f32.xlu1 %v3491_v28 }
 0xfcb   : > { %v3485_v56 = vsel %vm875_vm0, %v3467_v59, -inf }
 0xfcc   : > { %3489 = vmax.xlane.f32.xlu0 %v3488_v22 }
 0xfce   : > { %3486 = vmax.xlane.f32.xlu1 %v3485_v56 }
 0xfd0   : > { %3483 = vmax.xlane.f32.xlu0 %v3482_v34 }
 0xfdf   : > { %3566 = vrot.lane.b32.xlu1 %v6521_v5, %s6121_s24 }
 0xfe3   : > { %3564 = vrot.lane.b32.xlu1 %v6519_v1, %s6121_s24 }
 0xfe6   : > { %3568 = vrot.lane.b32.xlu0 %v6515_v29, %s6121_s24 }
 0xfe7   : > { %3562 = vrot.lane.b32.xlu1 %v6527_v6, %s6121_s24  ;;  %s5089_s24 = sshll.u32 %s6274_s5, 10 }
0x1049   : > { %v3472_v16 = vpop.xlane.xlu0 %3471 }
0x104a   : > { %v3494_v35 = vsub.f32 %v3462_v9, %v3472_v16 }
0x104c   : > { %v3502_v0 = vmul.f32 1.442695, %v3494_v35 }
0x104d   : > { %v3478_v62 = vpop.xlane.xlu0 %3477  ;;  %v3475_v57 = vpop.xlane.xlu1 %3474 }
0x104e   : > { %v3496_v11 = vsub.f32 %v3464_v58, %v3478_v62  ;;  %v3495_v22 = vsub.f32 %v3463_v27, %v3475_v57 }
0x1050   : > { %v3506_v28 = vmul.f32 1.442695, %v3496_v11  ;;  %v3504_v7 = vmul.f32 1.442695, %v3495_v22 }
0x1051   : > { %v3481_v56 = vpop.xlane.xlu0 %3480 }
0x1052   : > { %5974 = vpow2.f32 %v3506_v28  ;;  %v3497_v34 = vsub.f32 %v3465_v12, %v3481_v56 }
0x1053   : > { %v3493_v23 = vpop.xlane.xlu1 %3492  ;;  %5976 = vpow2.f32 %v3502_v0 }
0x1054   : > { %v3508_v31 = vmul.f32 1.442695, %v3497_v34  ;;  %v3501_v26 = vsub.f32 %v3469_v60, %v3493_v23 }
0x1055   : > { %v3490_v24 = vpop.xlane.xlu0 %3489 }
0x1056   : > { %5978 = vpow2.f32 %v3508_v31  ;;  %v3500_v32 = vsub.f32 %v3468_v36, %v3490_v24  ;;  %v3516_v9 = vmul.f32 1.442695, %v3501_v26 }
0x1057   : > { %v3487_v25 = vpop.xlane.xlu1 %3486  ;;  %5980 = vpow2.f32 %v3504_v7 }
0x1058   : > { %v3514_v16 = vmul.f32 1.442695, %v3500_v32  ;;  %v3499_v54 = vsub.f32 %v3467_v59, %v3487_v25 }
0x1059   : > { %v3484_v58 = vpop.xlane.xlu0 %3483 }
0x105a   : > { %5982 = vpow2.f32 %v3514_v16  ;;  %v3498_v35 = vsub.f32 %v3466_v61, %v3484_v58  ;;  %v3512_v62 = vmul.f32 1.442695, %v3499_v54 }
0x105b   : > { %v3567_v27 = vpop.permute.xlu1 %3566  ;;  %5984 = vpow2.f32 %v3516_v9 }
0x105c   : > { %v3510_v12 = vmul.f32 1.442695, %v3498_v35 }
0x105d   : > { %v3569_v57 = vpop.permute.xlu0 %3568 }
0x105e   : > { %5986 = vpow2.f32 %v3510_v12  ;;  %5577 = vmatprep.subr.bf16.mxu1 %v3569_v57 }
0x105f   : > { %v6997_v11 = vpop.eup %5974  ;;  %5578 = vmatpush3.bf16.msra.mxu1 %v3569_v57  ;;  %5988 = vpow2.f32 %v3512_v62  ;;  %v3565_v25 = vpop.permute.xlu1 %3564 }
0x1060   : > { %5579 = vmatprep.subr.bf16.mxu1 %v3567_v27  ;;  %v3524_v24 = vsel %vm875_vm0, %v6997_v11, 0.0  ;;  %v5977_v32 = vpop.eup %5976 }
0x1061   : > { %3525 = vadd.xlane.f32.xlu0 %v3524_v24  ;;  %v3518_v54 = vsel %vm875_vm0, %v5977_v32, 0.0 }
0x1063   : > { %v5979_v7 = vpop.eup %5978  ;;  %5580 = vmatpush3.bf16.msra.mxu1 %v3567_v27  ;;  %v3563_v36 = vpop.permute.xlu1 %3562 }
0x1064   : > { %5581 = vmatprep.subr.bf16.mxu1 %v3565_v25  ;;  %v3527_v26 = vsel %vm875_vm0, %v5979_v7, 0.0  ;;  %v5981_v23 = vpop.eup %5980 }
0x1065   : > { %3519 = vadd.xlane.f32.xlu0 %v3518_v54  ;;  %3528 = vadd.xlane.f32.xlu1 %v3527_v26  ;;  %v3521_v59 = vsel %vm875_vm0, %v5981_v23, 0.0 }
0x1067   : > { %v7003_v31 = vpop.eup %5982  ;;  %5582 = vmatpush3.bf16.msra.mxu1 %v3565_v25 }
0x1068   : > { %5583 = vmatprep.subr.bf16.mxu1 %v3563_v36  ;;  %v3536_v60 = vsel %vm875_vm0, %v7003_v31, 0.0  ;;  %v5985_v61 = vpop.eup %5984 }
0x1069   : > { %3537 = vadd.xlane.f32.xlu0 %v3536_v60  ;;  %3522 = vadd.xlane.f32.xlu1 %v3521_v59  ;;  %v3539_v22 = vsel %vm875_vm0, %v5985_v61, 0.0 }
0x106b   : > { %v5987_v0 = vpop.eup %5986  ;;  %5584 = vmatpush3.bf16.msra.mxu1 %v3563_v36 }
0x106c   : > { %v3530_v28 = vsel %vm875_vm0, %v5987_v0, 0.0  ;;  %v5989_v56 = vpop.eup %5988 }
0x106d   : > { %3531 = vadd.xlane.f32.xlu1 %v3530_v28  ;;  %3540 = vadd.xlane.f32.xlu0 %v3539_v22  ;;  %v3533_v34 = vsel %vm875_vm0, %v5989_v56, 0.0 }
0x1071   : > { %3534 = vadd.xlane.f32.xlu0 %v3533_v34 }
0x107e   : > { %3720 = vrot.lane.b32.xlu1 %v6425_v13, %s6122_s26 }
0x1082   : > { %3718 = vrot.lane.b32.xlu1 %v6429_v17, %s6122_s26 }
0x1086   : > { %3716 = vrot.lane.b32.xlu1 %v6435_v21, %s6122_s26 }
0x1087   : > { %3722 = vrot.lane.b32.xlu0 %v6419_v10, %s6122_s26 }
0x108a   : > { %3710 = vrot.lane.b32.xlu1 %v6448_v39, %s6122_s26 }
0x108b   : > { %3708 = vrot.lane.b32.xlu0 %v6446_v38, %s6122_s26 }
0x108e   : > { %3714 = vrot.lane.b32.xlu1 %v6454_v47, %s6122_s26 }
0x108f   : > { %3712 = vrot.lane.b32.xlu0 %v6456_v48, %s6122_s26 }
0x10ea   : > { %v3526_v13 = vpop.xlane.xlu0 %3525 }
0x10ee   : > { %v3520_v17 = vpop.xlane.xlu0 %3519  ;;  %v3529_v9 = vpop.xlane.xlu1 %3528 }
0x10ef   : > { %5990 = vrcp.f32 %v3529_v9 }
0x10f0   : > { %5992 = vrcp.f32 %v3520_v17 }
0x10f1   : > { %5994 = vrcp.f32 %v3526_v13 }
0x10f2   : > { %v3538_v21 = vpop.xlane.xlu0 %3537  ;;  %v3523_v16 = vpop.xlane.xlu1 %3522 }
0x10f3   : > { %5996 = vrcp.f32 %v3523_v16 }
0x10f6   : > { %v3541_v10 = vpop.xlane.xlu0 %3540  ;;  %v3532_v39 = vpop.xlane.xlu1 %3531 }
0x10f7   : > { %5998 = vrcp.f32 %v3541_v10 }
0x10f8   : > { %6000 = vrcp.f32 %v3532_v39 }
0x10f9   : > { %6002 = vrcp.f32 %v3538_v21 }
0x10fa   : > { %v3535_v38 = vpop.xlane.xlu0 %3534  ;;  %v3721_v22 = vpop.permute.xlu1 %3720 }
0x10fb   : > { %6004 = vrcp.f32 %v3535_v38  ;;  %v3743_v9 = vsel %vm1282_vm2, %v3721_v22, 0 }
0x10fc   : > { %v5991_v47 = vpop.eup %5990 }
0x10fd   : > { %v5993_v35 = vpop.eup %5992  ;;  %v3553_v62 = vmul.f32 %v5991_v47, %v5979_v7 }
0x10fe   : > { %v3723_v58 = vpop.permute.xlu0 %3722  ;;  %v5995_v48 = vpop.eup %5994  ;;  %v3550_v12 = vmul.f32 %v5993_v35, %v5977_v32 }
0x10ff   : > { %5669 = vmatprep.subr.msk.bf16.mxu1 %vm1282_vm2, %v3723_v58  ;;  %v3552_v24 = vmul.f32 %v5995_v48, %v6997_v11  ;;  %v3746_v59 = vsel %vm1282_vm2, %v3723_v58, 0  ;;  %v3719_v21 = vpop.permute.xlu1 %3718 }
0x1100   : > { %v5997_v27 = vpop.eup %5996 }
0x1101   : > { %v3551_v57 = vmul.f32 %v5997_v27, %v5981_v23  ;;  %v3559_v26 = vpack.c.bf16 %v3553_v62, %v3552_v24 }
0x1102   : > { %v3709_v17 = vpop.permute.xlu0 %3708 }
0x1103   : > { %v3558_v25 = vpack.c.bf16 %v3551_v57, %v3550_v12 }
0x1104   : > { %v5999_v54 = vpop.eup %5998 }
0x1105   : > { %v6001_v36 = vpop.eup %6000  ;;  %5585 = vmatprep.mubr.msk.bf16.mxu1 %vm875_vm0, %v3558_v25  ;;  %v3557_v23 = vmul.f32 %v5999_v54, %v5985_v61  ;;  %v3717_v61 = vpop.permute.xlu1 %3716 }
0x1106   : > { %v6003_v60 = vpop.eup %6002  ;;  %5586 = vmatmul.mubr.msk.bf16.vlgmr.msra.gmra.mxu1 %vm875_vm0, %v3559_v26  ;;  %v3554_v32 = vmul.f32 %v6001_v36, %v5987_v0  ;;  %v3740_v0 = vsel %vm1282_vm2, %v3719_v21, 0  ;;  %v3713_v16 = vpop.permute.xlu0 %3712 }
0x1107   : > { %5594 = vmatpush3.bf16.xpose.msra.mxu1 %v3746_v59  ;;  %v3556_v34 = vmul.f32 %v6003_v60, %v7003_v31  ;;  %v3737_v31 = vsel %vm1282_vm2, %v3717_v61, 0 }
0x1108   : > { %v6005_v28 = vpop.eup %6004  ;;  %5670 = vmatprep.subr.msk.bf16.mxu1 %vm1282_vm2, %v3721_v22 }
0x1109   : > { %v3555_v7 = vmul.f32 %v6005_v28, %v5989_v56  ;;  %v3561_v13 = vpack.c.bf16 %v3557_v23, %v3556_v34  ;;  %v3711_v56 = vpop.permute.xlu1 %3710 }
0x110b   : > { %v3560_v11 = vpack.c.bf16 %v3555_v7, %v3554_v32 }
0x110d   : > { %5589 = vmatprep.mubr.msk.bf16.mxu1 %vm875_vm0, %v3560_v11  ;;  %v3715_v10 = vpop.permute.xlu1 %3714 }
0x110e   : > { %5590 = vmatmul.mubr.msk.bf16.gmra.mxu1 %vm875_vm0, %v3561_v13 }
0x110f   : > { %5596 = vmatpush3.bf16.xpose.msra.mxu1 %v3743_v9  ;;  %5601 = vmatprep.mubr.msk.bf16.mxu1 %vm1282_vm2, %v3709_v17 }
0x1110   : > { %5671 = vmatprep.subr.msk.bf16.mxu1 %vm1282_vm2, %v3719_v21 }
0x1117   : > { %5598 = vmatpush3.bf16.xpose.msra.mxu1 %v3740_v0 }
0x1118   : > { %5672 = vmatprep.subr.msk.bf16.mxu1 %vm1282_vm2, %v3717_v61 }
0x111f   : > { %5600 = vmatpush3.bf16.xpose.msra.mxu1 %v3737_v31 }
0x1126   : > { %5602 = vmatmul.mubr.msk.bf16.vlgmr.msra.gmra.mxu1 %vm1282_vm2, %v3711_v56 }
0x1127   : > { %5605 = vmatprep.mubr.msk.bf16.mxu1 %vm1282_vm2, %v3713_v16 }
0x112e   : > { %5606 = vmatmul.mubr.msk.bf16.gmra.mxu1 %vm1282_vm2, %v3715_v10 }
0x11c6   : > { %v7045_v39 = vpop.f32.mrf.mxu1 }
0x11c8   : > { %v7047_v38 = vpop.f32.mrf.mxu1 }
0x11ca   : > { %v7049_v47 = vpop.f32.mrf.mxu1 }
0x11cc   : > { %v7051_v58 = vpop.f32.mrf.mxu1 }
0x11ce   : > { %v7053_v35 = vpop.f32.mrf.mxu1 }
0x11d0   : > { %v7055_v48 = vpop.f32.mrf.mxu1 }
0x11d2   : > { %v7057_v27 = vpop.f32.mrf.mxu1 }
0x11d4   : > { %v7059_v62 = vpop.f32.mrf.mxu1 }
0x11e6   : > { %v5603_v12 = vpop.f32.mrf.mxu1 }
0x11e7   : > { %v3815_v54 = vmul.f32 0.35355338, %v5603_v12 }
0x11e8   : > { %v3782_v57 = vpop.f32.mrf.mxu1 }
0x11e9   : > { %v3813_v24 = vmul.f32 0.35355338, %v3782_v57  ;;  %v3827_v22 = vsel %vm875_vm0, %v3815_v54, -inf }
0x11ea   : > { %v5604_v25 = vpop.f32.mrf.mxu1 }
0x11eb   : > { %v3821_v26 = vsel %vm875_vm0, %v3813_v24, -inf  ;;  %v3816_v28 = vmul.f32 0.35355338, %v5604_v25 }
0x11ec   : > { %3822 = vmax.xlane.f32.xlu0 %v3821_v26  ;;  %v3785_v36 = vpop.f32.mrf.mxu1 }
0x11ed   : > { %v3814_v60 = vmul.f32 0.35355338, %v3785_v36  ;;  %v3830_v34 = vsel %vm875_vm0, %v3816_v28, -inf }
0x11ee   : > { %v5607_v59 = vpop.f32.mrf.mxu1 }
0x11ef   : > { %v3824_v32 = vsel %vm875_vm0, %v3814_v60, -inf  ;;  %v3819_v9 = vmul.f32 0.35355338, %v5607_v59 }
0x11f0   : > { %3828 = vmax.xlane.f32.xlu0 %v3827_v22  ;;  %3825 = vmax.xlane.f32.xlu1 %v3824_v32  ;;  %v3798_v7 = vpop.f32.mrf.mxu1 }
0x11f1   : > { %v3817_v11 = vmul.f32 0.35355338, %v3798_v7  ;;  %v3839_v31 = vsel %vm875_vm0, %v3819_v9, -inf }
0x11f2   : > { %v5608_v23 = vpop.f32.mrf.mxu1 }
0x11f3   : > { %v3820_v21 = vmul.f32 0.35355338, %v5608_v23  ;;  %v3833_v0 = vsel %vm875_vm0, %v3817_v11, -inf }
0x11f4   : > { %3831 = vmax.xlane.f32.xlu0 %v3830_v34  ;;  %v3801_v13 = vpop.f32.mrf.mxu1 }
0x11f5   : > { %v3818_v17 = vmul.f32 0.35355338, %v3801_v13  ;;  %v3842_v56 = vsel %vm875_vm0, %v3820_v21, -inf }
0x11f7   : > { %v3836_v61 = vsel %vm875_vm0, %v3818_v17, -inf }
0x11f8   : > { %3834 = vmax.xlane.f32.xlu0 %v3833_v0  ;;  %3837 = vmax.xlane.f32.xlu1 %v3836_v61 }
0x11fc   : > { %3840 = vmax.xlane.f32.xlu0 %v3839_v31  ;;  %3843 = vmax.xlane.f32.xlu1 %v3842_v56 }
0x1212   : > { %3919 = vrot.lane.b32.xlu0 %v6515_v29, %s6122_s26 }
0x1275   : > { %v3823_v16 = vpop.xlane.xlu0 %3822 }
0x1276   : > { %v3845_v10 = vsub.f32 %v3813_v24, %v3823_v16 }
0x1278   : > { %v3853_v26 = vmul.f32 1.442695, %v3845_v10 }
0x1279   : > { %v3829_v12 = vpop.xlane.xlu0 %3828  ;;  %v3826_v57 = vpop.xlane.xlu1 %3825 }
0x127a   : > { %v3847_v25 = vsub.f32 %v3815_v54, %v3829_v12  ;;  %v3846_v59 = vsub.f32 %v3814_v60, %v3826_v57 }
0x127c   : > { %v3857_v36 = vmul.f32 1.442695, %v3847_v25  ;;  %v3855_v7 = vmul.f32 1.442695, %v3846_v59 }
0x127d   : > { %v3832_v22 = vpop.xlane.xlu0 %3831 }
0x127e   : > { %6006 = vpow2.f32 %v3857_v36  ;;  %v3848_v32 = vsub.f32 %v3816_v28, %v3832_v22 }
0x127f   : > { %6008 = vpow2.f32 %v3853_v26 }
0x1280   : > { %v3859_v23 = vmul.f32 1.442695, %v3848_v32 }
0x1281   : > { %v3835_v34 = vpop.xlane.xlu0 %3834  ;;  %v3838_v13 = vpop.xlane.xlu1 %3837 }
0x1282   : > { %6010 = vpow2.f32 %v3859_v23  ;;  %v3849_v0 = vsub.f32 %v3817_v11, %v3835_v34  ;;  %v3850_v28 = vsub.f32 %v3818_v17, %v3838_v13 }
0x1283   : > { %6012 = vpow2.f32 %v3855_v7 }
0x1284   : > { %v3861_v31 = vmul.f32 1.442695, %v3849_v0  ;;  %v5033_v0 = vpack.c.bf16 %v6647_v44, %v6647_v44  ;;  %v5049_v44 = vpack.c.bf16 %v6807_v30, %v6807_v30  ;;  %v5058_v30 = vpack.c.bf16 %v6891_v55, %v6891_v55 }
0x1285   : > { %v3841_v29 = vpop.xlane.xlu0 %3840  ;;  %v3844_v61 = vpop.xlane.xlu1 %3843  ;;  %v5075_v55 = vpack.c.bf16 %v7045_v39, %v7045_v39  ;;  %v5038_v39 = vpack.c.bf16 %v6659_v37, %v6659_v37 }
0x1286   : > { %v3851_v24 = vsub.f32 %v3819_v9, %v3841_v29  ;;  %v3852_v54 = vsub.f32 %v3820_v21, %v3844_v61  ;;  %v3863_v9 = vmul.f32 1.442695, %v3850_v28  ;;  %v5035_v29 = vpack.c.bf16 %v6645_v42, %v6645_v42 }
0x1287   : > { %v5041_v61 = vpack.c.bf16 %v6727_v18, %v6727_v18  ;;  %v5036_v42 = vpack.c.bf16 %v6649_v45, %v6649_v45  ;;  %v5044_v45 = vpack.c.bf16 %v6729_v19, %v6729_v19  ;;  %v5050_v18 = vpack.c.bf16 %v6811_v52, %v6811_v52 }
0x1288   : > { %v3865_v56 = vmul.f32 1.442695, %v3851_v24  ;;  %v3867_v10 = vmul.f32 1.442695, %v3852_v54  ;;  %v5052_v19 = vpack.c.bf16 %v6809_v46, %v6809_v46  ;;  %v5067_v52 = vpack.c.bf16 %v6965_v8, %v6965_v8  ;;  %v7687_v24 = vld [vmem:[#allocation16_spill] sm:$0xff] }
0x1289   : > { %v3920_v16 = vpop.permute.xlu0 %3919  ;;  %v5060_v46 = vpack.c.bf16 %v6889_v53, %v6889_v53  ;;  %v5068_v53 = vpack.c.bf16 %v6969_v14, %v6969_v14  ;;  %v5037_v8 = vpack.c.bf16 %v6655_v43, %v6655_v43  ;;  %v5076_v14 = vpack.c.bf16 %v7049_v47, %v7049_v47  ;;  %v7685_v47 = vld [vmem:[#allocation17_spill] sm:$0xff] }
0x128a   : > { %6014 = vpow2.f32 %v3865_v56  ;;  %5609 = vmatprep.subr.bf16.mxu0 %v3920_v16  ;;  %v5045_v43 = vpack.c.bf16 %v6735_v20, %v6735_v20  ;;  %v5053_v20 = vpack.c.bf16 %v7685_v47, %v7685_v47  ;;  %v7689_v56 = vld [vmem:[#allocation21_spill] sm:$0xff] }
0x128b   : > { %v7071_v60 = vpop.eup %6006  ;;  %5610 = vmatpush3.bf16.msra.mxu0 %v3920_v16  ;;  %6016 = vpow2.f32 %v3861_v31  ;;  %v7688_v31 = vld [vmem:[#allocation14_spill] sm:$0xff]  ;;  %v5061_v54 = vpack.c.bf16 %v7689_v56, %v7689_v56  ;;  %v7690_v16 = vld [vmem:[#allocation19_spill] sm:$0xff] }
0x128c   : > { %v3875_v12 = vsel %vm875_vm0, %v7071_v60, 0.0  ;;  %v7075_v57 = vpop.eup %6008  ;;  %6018 = vpow2.f32 %v3867_v10  ;;  %v5054_v28 = vpack.c.bf16 %v7690_v16, %v7690_v16  ;;  %v7691_v10 = vld [vmem:[#allocation20_spill] sm:$0xff] }
0x128d   : > { %3876 = vadd.xlane.f32.xlu0 %v3875_v12  ;;  %v3869_v21 = vsel %vm875_vm0, %v7075_v57, 0.0  ;;  %6020 = vpow2.f32 %v3863_v9  ;;  %v5063_v12 = vpack.c.bf16 %v7691_v10, %v7691_v10  ;;  %v7692_v9 = vld [vmem:[#allocation18_spill] sm:$0xff] }
0x128f   : > { %v7077_v11 = vpop.eup %6010 }
0x1290   : > { %v3878_v25 = vsel %vm875_vm0, %v7077_v11, 0.0  ;;  %v7083_v26 = vpop.eup %6012 }
0x1291   : > { %3870 = vadd.xlane.f32.xlu0 %v3869_v21  ;;  %3879 = vadd.xlane.f32.xlu1 %v3878_v25  ;;  %v3872_v17 = vsel %vm875_vm0, %v7083_v26, 0.0  ;;  %v5056_v21 = vpack.c.bf16 %v7692_v9, %v7692_v9  ;;  %v7693_v25 = vld [vmem:[#allocation25_spill] sm:$0xff] }
0x1295   : > { %3873 = vadd.xlane.f32.xlu1 %v3872_v17  ;;  %v5069_v17 = vpack.c.bf16 %v7693_v25, %v7693_v25 }
0x1297   : > { %v7087_v36 = vpop.eup %6014 }
0x1298   : > { %v3887_v59 = vsel %vm875_vm0, %v7087_v36, 0.0  ;;  %v7091_v22 = vpop.eup %6016 }
0x1299   : > { %3888 = vadd.xlane.f32.xlu1 %v3887_v59  ;;  %v3881_v32 = vsel %vm875_vm0, %v7091_v22, 0.0  ;;  %v7095_v7 = vpop.eup %6018  ;;  %v7694_v59 = vld [vmem:[#allocation23_spill] sm:$0xff] }
0x129a   : > { %v3890_v23 = vsel %vm875_vm0, %v7095_v7, 0.0  ;;  %v7099_v34 = vpop.eup %6020 }
0x129b   : > { %v3884_v13 = vsel %vm875_vm0, %v7099_v34, 0.0 }
0x129d   : > { %3882 = vadd.xlane.f32.xlu1 %v3881_v32  ;;  %v5062_v32 = vpack.c.bf16 %v7694_v59, %v7694_v59 }
0x12a1   : > { %3891 = vadd.xlane.f32.xlu1 %v3890_v23  ;;  %v7695_v23 = vld [vmem:[#allocation22_spill] sm:$0xff] }
0x12a5   : > { %3885 = vadd.xlane.f32.xlu1 %v3884_v13  ;;  %v5064_v13 = vpack.c.bf16 %v7695_v23, %v7695_v23 }
0x12a7   : > { %3915 = vrot.lane.b32.xlu0 %v6519_v1, %s6122_s26  ;;  %v5034_v1 = vpack.c.bf16 %v6651_v49, %v6651_v49  ;;  %v5051_v49 = vpack.c.bf16 %v6805_v41, %v6805_v41  ;;  %v5065_v41 = vpack.c.bf16 %v6967_v40, %v6967_v40  ;;  %v5074_v40 = vpack.c.bf16 %v7051_v58, %v7051_v58  ;;  %v7686_v58 = vld [vmem:[#allocation15_spill] sm:$0xff] }
0x12a8   : > { %v5046_v37 = vpack.c.bf16 %v7686_v58, %v7686_v58 }
0x12ab   : > { %3913 = vrot.lane.b32.xlu0 %v6527_v6, %s6122_s26  ;;  %v5043_v6 = vpack.c.bf16 %v6725_v15, %v6725_v15  ;;  %v5057_v15 = vpack.c.bf16 %v6887_v33, %v6887_v33  ;;  %v5066_v33 = vpack.c.bf16 %v6971_v2, %v6971_v2  ;;  %v5039_v2 = vpack.c.bf16 %v6653_v50, %v6653_v50 }
0x12ac   : > { %v5047_v50 = vpack.c.bf16 %v6733_v4, %v6733_v4  ;;  %v5055_v4 = vpack.c.bf16 %v7687_v24, %v7687_v24 }
0x12af   : > { %1920 = vrot.lane.b32.xlu0 %v5033_v0, %s7639_s29  ;;  %v7696_v0 = vld [vmem:[#allocation27_spill] sm:$0xff] }
0x12b3   : > { %1924 = vrot.lane.b32.xlu0 %v5035_v29, %s7639_s29  ;;  %v5070_v29 = vpack.c.bf16 %v7696_v0, %v7696_v0 }
0x12b6   : > { %3917 = vrot.lane.b32.xlu1 %v6521_v5, %s6122_s26  ;;  %v5042_v5 = vpack.c.bf16 %v6731_v3, %v6731_v3  ;;  %v5059_v3 = vpack.c.bf16 %v6885_v63, %v6885_v63  ;;  %v5073_v63 = vpack.c.bf16 %v7047_v38, %v7047_v38  ;;  %v5040_v38 = vpack.c.bf16 %v6657_v51, %v6657_v51 }
0x12b7   : > { %2271 = vrot.lane.b32.xlu0 %v5041_v61, %s6124_s3  ;;  %v5048_v51 = vpack.c.bf16 %v7688_v31, %v7688_v31 }
0x12ba   : > { %1922 = vrot.lane.b32.xlu1 %v5034_v1, %s7639_s29 }
0x12bb   : > { %2275 = vrot.lane.b32.xlu0 %v5043_v6, %s6124_s3 }
0x12be   : > { %1926 = vrot.lane.b32.xlu1 %v5036_v42, %s7639_s29 }
0x12bf   : > { %2622 = vrot.lane.b32.xlu0 %v5049_v44, %s6125_s2 }
0x12c2   : > { %2273 = vrot.lane.b32.xlu1 %v5042_v5, %s6124_s3 }
0x12c3   : > { %2626 = vrot.lane.b32.xlu0 %v5051_v49, %s6125_s2 }
0x12c6   : > { %2277 = vrot.lane.b32.xlu1 %v5044_v45, %s6124_s3 }
0x12c7   : > { %2973 = vrot.lane.b32.xlu0 %v5057_v15, %s6126_s27 }
0x12ca   : > { %2624 = vrot.lane.b32.xlu1 %v5050_v18, %s6125_s2 }
0x12cb   : > { %2977 = vrot.lane.b32.xlu0 %v5059_v3, %s6126_s27 }
0x12ce   : > { %2628 = vrot.lane.b32.xlu1 %v5052_v19, %s6125_s2 }
0x12cf   : > { %3324 = vrot.lane.b32.xlu0 %v5065_v41, %s6127_s4 }
0x12d2   : > { %2975 = vrot.lane.b32.xlu1 %v5058_v30, %s6126_s27 }
0x12d3   : > { %3328 = vrot.lane.b32.xlu0 %v5067_v52, %s6127_s4 }
0x12d6   : > { %2979 = vrot.lane.b32.xlu1 %v5060_v46, %s6126_s27 }
0x12d7   : > { %3675 = vrot.lane.b32.xlu0 %v5073_v63, %s6128_s25 }
0x12da   : > { %3326 = vrot.lane.b32.xlu1 %v5066_v33, %s6127_s4 }
0x12db   : > { %3679 = vrot.lane.b32.xlu0 %v5075_v55, %s6128_s25 }
0x12de   : > { %3330 = vrot.lane.b32.xlu1 %v5068_v53, %s6127_s4 }
0x12df   : > { %1928 = vrot.lane.b32.xlu0 %v5037_v8, %s7639_s29 }
0x12e2   : > { %3677 = vrot.lane.b32.xlu1 %v5074_v40, %s6128_s25 }
0x12e3   : > { %1932 = vrot.lane.b32.xlu0 %v5039_v2, %s7639_s29 }
0x12e6   : > { %3681 = vrot.lane.b32.xlu1 %v5076_v14, %s6128_s25 }
0x12e7   : > { %2279 = vrot.lane.b32.xlu0 %v5045_v43, %s6124_s3 }
0x12ea   : > { %1930 = vrot.lane.b32.xlu1 %v5038_v39, %s7639_s29 }
0x12eb   : > { %2283 = vrot.lane.b32.xlu0 %v5047_v50, %s6124_s3 }
0x12ee   : > { %1934 = vrot.lane.b32.xlu1 %v5040_v38, %s7639_s29 }
0x12ef   : > { %2630 = vrot.lane.b32.xlu0 %v5053_v20, %s6125_s2 }
0x12f2   : > { %2281 = vrot.lane.b32.xlu1 %v5046_v37, %s6124_s3 }
0x12f3   : > { %2634 = vrot.lane.b32.xlu0 %v5055_v4, %s6125_s2 }
0x12f6   : > { %2285 = vrot.lane.b32.xlu1 %v5048_v51, %s6124_s3 }
0x12f7   : > { %2981 = vrot.lane.b32.xlu0 %v5061_v54, %s6126_s27 }
0x12fa   : > { %2632 = vrot.lane.b32.xlu1 %v5054_v28, %s6125_s2 }
0x12fb   : > { %2985 = vrot.lane.b32.xlu0 %v5063_v12, %s6126_s27 }
0x12fe   : > { %2636 = vrot.lane.b32.xlu1 %v5056_v21, %s6125_s2  ;;  %s7701_s2 = sld [smem:[#allocation37_spill]] }
0x12ff   : > { %3332 = vrot.lane.b32.xlu0 %v5069_v17, %s6127_s4 }
0x1302   : > { %2983 = vrot.lane.b32.xlu1 %v5062_v32, %s6126_s27 }
0x1304   : > { %s7553_s23 = scalar_lea.hbm %s7701_s2, %s5089_s24 }
0x1306   : > { %2987 = vrot.lane.b32.xlu1 %v5064_v13, %s6126_s27  ;;  %s701_s27 = sand.u32 1, %s6106_s30  }
0x1307   : > { %s7562_s5 = scalar_lea.sflag [#allocation4], %s701_s27 }
0x130a   : > { %3334 = vrot.lane.b32.xlu1 %v5070_v29, %s6127_s4 }
0x1316   : > { %v3877_v61 = vpop.xlane.xlu0 %3876 }
0x131a   : > { %v3871_v1 = vpop.xlane.xlu0 %3870  ;;  %v3880_v6 = vpop.xlane.xlu1 %3879 }
0x131b   : > { %6022 = vrcp.f32 %v3871_v1 }
0x131e   : > { %v3916_v42 = vpop.permute.xlu0 %3915  ;;  %v3874_v44 = vpop.xlane.xlu1 %3873 }
0x131f   : > { %6024 = vrcp.f32 %v3874_v44 }
0x1320   : > { %6026 = vrcp.f32 %v3880_v6 }
0x1321   : > { %6028 = vrcp.f32 %v3877_v61 }
0x1322   : > { %v3914_v5 = vpop.permute.xlu0 %3913  ;;  %v3889_v49 = vpop.xlane.xlu1 %3888 }
0x1326   : > { %v1921_v45 = vpop.permute.xlu0 %1920  ;;  %v3883_v15 = vpop.xlane.xlu1 %3882 }
0x1327   : > { %1945 = vst.msk [vmem:[#allocation2] sm:$0xf] %vm1944_vm4, %v1921_v45  ;;  %6030 = vrcp.f32 %v3883_v15 }
0x1328   : > { %v6023_v18 = vpop.eup %6022 }
0x1329   : > { %v3901_v30 = vmul.f32 %v6023_v18, %v7075_v57 }
0x132a   : > { %v1925_v3 = vpop.permute.xlu0 %1924  ;;  %v3892_v19 = vpop.xlane.xlu1 %3891 }
0x132b   : > { %1947 = vst.msk [vmem:[#allocation2 + $0x8] sm:$0xf] %vm1944_vm4, %v1925_v3 }
0x132c   : > { %v6025_v41 = vpop.eup %6024 }
0x132d   : > { %v3902_v52 = vmul.f32 %v6025_v41, %v7083_v26  ;;  %v6027_v57 = vpop.eup %6026 }
0x132e   : > { %v2272_v46 = vpop.permute.xlu0 %2271  ;;  %v3886_v63 = vpop.xlane.xlu1 %3885  ;;  %v3904_v2 = vmul.f32 %v6027_v57, %v7077_v11 }
0x132f   : > { %2296 = vst.msk [vmem:[#allocation2] sm:$0xf] %vm2295_vm5, %v2272_v46  ;;  %6032 = vrcp.f32 %v3886_v63  ;;  %v3909_v33 = vpack.c.bf16 %v3902_v52, %v3901_v30  ;;  %v6029_v40 = vpop.eup %6028  ;;  %v5744_v30 = vld [vmem:[%s7618_s15 + $0x18] sm:$0xff]   ;;  %v5745_v52 = vld [vmem:[%s7618_s15 + $0x10] sm:$0xff]   ;;  %v5746_v46 = vld [vmem:[%s7618_s15 + $0x8] sm:$0xff]  }
0x1330   : > { %6034 = vrcp.f32 %v3892_v19  ;;  %v3903_v50 = vmul.f32 %v6029_v40, %v7071_v60 }
0x1331   : > { %5617 = vmatprep.mubr.msk.bf16.mxu0 %vm875_vm0, %v3909_v33  ;;  %6036 = vrcp.f32 %v3889_v49 }
0x1332   : > { %v2276_v55 = vpop.permute.xlu0 %2275  ;;  %v3918_v53 = vpop.permute.xlu1 %3917  ;;  %v3910_v47 = vpack.c.bf16 %v3904_v2, %v3903_v50  ;;  %v7697_v2 = vld [vmem:[#allocation24_spill] sm:$0xff]  ;;  %v7698_v50 = vld [vmem:[#allocation26_spill] sm:$0xff] }
0x1333   : > { %2298 = vst.msk [vmem:[#allocation2 + $0x8] sm:$0xf] %vm2295_vm5, %v2276_v55  ;;  %5611 = vmatprep.subr.bf16.mxu0 %v3918_v53 }
0x1334   : > { %5612 = vmatpush3.bf16.msra.mxu0 %v3918_v53  ;;  %v6031_v14 = vpop.eup %6030  ;;  %v5747_v53 = vld [vmem:[%s7618_s15] sm:$0xff]  }
0x1335   : > { %5613 = vmatprep.subr.bf16.mxu0 %v3916_v42  ;;  %v3905_v20 = vmul.f32 %v6031_v14, %v7091_v22  ;;  %v5071_v14 = vpack.c.bf16 %v7697_v2, %v7697_v2 }
0x1336   : > { %v2623_v26 = vpop.permute.xlu0 %2622  ;;  %v1923_v8 = vpop.permute.xlu1 %1922 }
0x1337   : > { %2647 = vst.msk [vmem:[#allocation2] sm:$0xf] %vm2646_vm6, %v2623_v26 }
0x1338   : > { %1946 = vst.msk [vmem:[#allocation2 + $0x4] sm:$0xf] %vm1944_vm4, %v1923_v8  ;;  %5614 = vmatpush3.bf16.msra.mxu0 %v3916_v42 }
0x1339   : > { %5615 = vmatprep.subr.bf16.mxu0 %v3914_v5 }
0x133a   : > { %v2627_v43 = vpop.permute.xlu0 %2626  ;;  %v1927_v39 = vpop.permute.xlu1 %1926 }
0x133b   : > { %2649 = vst.msk [vmem:[#allocation2 + $0x8] sm:$0xf] %vm2646_vm6, %v2627_v43 }
0x133c   : > { %1948 = vst.msk [vmem:[#allocation2 + $0xc] sm:$0xf] %vm1944_vm4, %v1927_v39  ;;  %v6033_v38 = vpop.eup %6032  ;;  %5616 = vmatpush3.bf16.msra.mxu0 %v3914_v5 }
0x133d   : > { %v3906_v58 = vmul.f32 %v6033_v38, %v7099_v34  ;;  %v6035_v37 = vpop.eup %6034  ;;  %5625 = vmatprep.subr.bf16.mxu0 %v5744_v30  ;;  %v5072_v38 = vpack.c.bf16 %v7698_v50, %v7698_v50 }
0x133e   : > { %v2974_v11 = vpop.permute.xlu0 %2973  ;;  %v2274_v24 = vpop.permute.xlu1 %2273  ;;  %v3908_v31 = vmul.f32 %v6035_v37, %v7095_v7  ;;  %v5078_v37 = vpack.c.bf16 %v7059_v62, %v7059_v62 }
0x133f   : > { %2998 = vst.msk [vmem:[#allocation2] sm:$0xf] %vm2997_vm7, %v2974_v11  ;;  %5618 = vmatmul.mubr.msk.bf16.vlgmr.msra.gmra.mxu0 %vm875_vm0, %v3910_v47  ;;  %v3911_v60 = vpack.c.bf16 %v3906_v58, %v3905_v20  ;;  %v6037_v4 = vpop.eup %6036  ;;  %v5077_v47 = vpack.c.bf16 %v7055_v48, %v7055_v48  ;;  %v5079_v58 = vpack.c.bf16 %v7053_v35, %v7053_v35 }
0x1340   : > { %2297 = vst.msk [vmem:[#allocation2 + $0x4] sm:$0xf] %vm2295_vm5, %v2274_v24  ;;  %v3907_v22 = vmul.f32 %v6037_v4, %v7087_v36  ;;  %5626 = vmatpush3.bf16.msra.mxu0 %v5744_v30  ;;  %v5080_v24 = vpack.c.bf16 %v7057_v27, %v7057_v27 }
0x1341   : > { %5621 = vmatprep.mubr.msk.bf16.mxu0 %vm875_vm0, %v3911_v60  ;;  %5627 = vmatprep.subr.bf16.mxu0 %v5745_v52 }
0x1342   : > { %v2978_v51 = vpop.permute.xlu0 %2977  ;;  %v2278_v56 = vpop.permute.xlu1 %2277  ;;  %v3912_v34 = vpack.c.bf16 %v3908_v31, %v3907_v22 }
0x1343   : > { %3000 = vst.msk [vmem:[#allocation2 + $0x8] sm:$0xf] %vm2997_vm7, %v2978_v51 }
0x1344   : > { %2299 = vst.msk [vmem:[#allocation2 + $0xc] sm:$0xf] %vm2295_vm5, %v2278_v56  ;;  %5628 = vmatpush3.bf16.msra.mxu0 %v5745_v52 }
0x1345   : > { %5629 = vmatprep.subr.bf16.mxu0 %v5746_v46 }
0x1346   : > { %v3325_v54 = vpop.permute.xlu0 %3324  ;;  %v2625_v16 = vpop.permute.xlu1 %2624 }
0x1347   : > { %3349 = vst.msk [vmem:[#allocation2] sm:$0xf] %vm3348_vm8, %v3325_v54  ;;  %5622 = vmatmul.mubr.msk.bf16.gmra.mxu0 %vm875_vm0, %v3912_v34 }
0x1348   : > { %2648 = vst.msk [vmem:[#allocation2 + $0x4] sm:$0xf] %vm2646_vm6, %v2625_v16  ;;  %5630 = vmatpush3.bf16.msra.mxu0 %v5746_v46 }
0x1349   : > { %5631 = vmatprep.subr.bf16.mxu0 %v5747_v53 }
0x134a   : > { %v3329_v28 = vpop.permute.xlu0 %3328  ;;  %v2629_v7 = vpop.permute.xlu1 %2628 }
0x134b   : > { %3351 = vst.msk [vmem:[#allocation2 + $0x8] sm:$0xf] %vm3348_vm8, %v3329_v28 }
0x134c   : > { %2650 = vst.msk [vmem:[#allocation2 + $0xc] sm:$0xf] %vm2646_vm6, %v2629_v7  ;;  %5632 = vmatpush3.bf16.msra.mxu0 %v5747_v53 }
0x134e   : > { %v3676_v10 = vpop.permute.xlu0 %3675  ;;  %v2976_v12 = vpop.permute.xlu1 %2975 }
0x134f   : > { %3700 = vst.msk [vmem:[#allocation2] sm:$0xf] %vm3699_vm9, %v3676_v10 }
0x1350   : > { %2999 = vst.msk [vmem:[#allocation2 + $0x4] sm:$0xf] %vm2997_vm7, %v2976_v12 }
0x1352   : > { %v3680_v36 = vpop.permute.xlu0 %3679  ;;  %v2980_v9 = vpop.permute.xlu1 %2979 }
0x1353   : > { %3702 = vst.msk [vmem:[#allocation2 + $0x8] sm:$0xf] %vm3699_vm9, %v3680_v36 }
0x1354   : > { %3001 = vst.msk [vmem:[#allocation2 + $0xc] sm:$0xf] %vm2997_vm7, %v2980_v9 }
0x1356   : > { %v1929_v21 = vpop.permute.xlu0 %1928  ;;  %v3327_v25 = vpop.permute.xlu1 %3326 }
0x1357   : > { %1949 = vst.msk [vmem:[#allocation2 + $0x10] sm:$0xf] %vm1944_vm4, %v1929_v21 }
0x1358   : > { %3350 = vst.msk [vmem:[#allocation2 + $0x4] sm:$0xf] %vm3348_vm8, %v3327_v25 }
0x135a   : > { %v1933_v17 = vpop.permute.xlu0 %1932  ;;  %v3331_v59 = vpop.permute.xlu1 %3330 }
0x135b   : > { %1951 = vst.msk [vmem:[#allocation2 + $0x18] sm:$0xf] %vm1944_vm4, %v1933_v17 }
0x135c   : > { %3352 = vst.msk [vmem:[#allocation2 + $0xc] sm:$0xf] %vm3348_vm8, %v3331_v59 }
0x135e   : > { %v2280_v32 = vpop.permute.xlu0 %2279  ;;  %v3678_v23 = vpop.permute.xlu1 %3677 }
0x135f   : > { %2300 = vst.msk [vmem:[#allocation2 + $0x10] sm:$0xf] %vm2295_vm5, %v2280_v32 }
0x1360   : > { %3701 = vst.msk [vmem:[#allocation2 + $0x4] sm:$0xf] %vm3699_vm9, %v3678_v23  ;;  %v4975_v23 = vld [vmem:[%s7619_s16] ss:$0 sm:$0xff] }
0x1362   : > { %v2284_v13 = vpop.permute.xlu0 %2283  ;;  %v3682_v0 = vpop.permute.xlu1 %3681 }
0x1363   : > { %2302 = vst.msk [vmem:[#allocation2 + $0x18] sm:$0xf] %vm2295_vm5, %v2284_v13 }
0x1364   : > { %3703 = vst.msk [vmem:[#allocation2 + $0xc] sm:$0xf] %vm3699_vm9, %v3682_v0 }
0x1366   : > { %v2631_v29 = vpop.permute.xlu0 %2630  ;;  %v1931_v61 = vpop.permute.xlu1 %1930 }
0x1367   : > { %2651 = vst.msk [vmem:[#allocation2 + $0x10] sm:$0xf] %vm2646_vm6, %v2631_v29 }
0x1368   : > { %1950 = vst.msk [vmem:[#allocation2 + $0x14] sm:$0xf] %vm1944_vm4, %v1931_v61 }
0x136a   : > { %v2635_v1 = vpop.permute.xlu0 %2634  ;;  %v1935_v6 = vpop.permute.xlu1 %1934 }
0x136b   : > { %2653 = vst.msk [vmem:[#allocation2 + $0x18] sm:$0xf] %vm2646_vm6, %v2635_v1 }
0x136c   : > { %1952 = vst.msk [vmem:[#allocation2 + $0x1c] sm:$0xf] %vm1944_vm4, %v1935_v6 }
0x136e   : > { %v2982_v42 = vpop.permute.xlu0 %2981  ;;  %v2282_v44 = vpop.permute.xlu1 %2281 }
0x136f   : > { %3002 = vst.msk [vmem:[#allocation2 + $0x10] sm:$0xf] %vm2997_vm7, %v2982_v42 }
0x1370   : > { %2301 = vst.msk [vmem:[#allocation2 + $0x14] sm:$0xf] %vm2295_vm5, %v2282_v44 }
0x1372   : > { %v2986_v5 = vpop.permute.xlu0 %2985  ;;  %v2286_v49 = vpop.permute.xlu1 %2285 }
0x1373   : > { %3004 = vst.msk [vmem:[#allocation2 + $0x18] sm:$0xf] %vm2997_vm7, %v2986_v5 }
0x1374   : > { %2303 = vst.msk [vmem:[#allocation2 + $0x1c] sm:$0xf] %vm2295_vm5, %v2286_v49 }
0x1376   : > { %v3333_v45 = vpop.permute.xlu0 %3332  ;;  %v2633_v15 = vpop.permute.xlu1 %2632 }
0x1377   : > { %3353 = vst.msk [vmem:[#allocation2 + $0x10] sm:$0xf] %vm3348_vm8, %v3333_v45 }
0x1378   : > { %2652 = vst.msk [vmem:[#allocation2 + $0x14] sm:$0xf] %vm2646_vm6, %v2633_v15 }
0x137a   : > { %v2637_v18 = vpop.permute.xlu1 %2636 }
0x137b   : > { %2654 = vst.msk [vmem:[#allocation2 + $0x1c] sm:$0xf] %vm2646_vm6, %v2637_v18 }
0x137e   : > { %v2984_v3 = vpop.permute.xlu1 %2983 }
0x137f   : > { %3003 = vst.msk [vmem:[#allocation2 + $0x14] sm:$0xf] %vm2997_vm7, %v2984_v3 }
0x1382   : > { %v2988_v19 = vpop.permute.xlu1 %2987 }
0x1383   : > { %3005 = vst.msk [vmem:[#allocation2 + $0x1c] sm:$0xf] %vm2997_vm7, %v2988_v19 }
0x1386   : > { %v3335_v41 = vpop.permute.xlu1 %3334 }
0x1387   : > { %3354 = vst.msk [vmem:[#allocation2 + $0x14] sm:$0xf] %vm3348_vm8, %v3335_v41 }
0x13ff   : > { %v5619_v63 = vpop.f32.mrf.mxu0 }
0x1400   : > { %v5083_v33 = vpack.c.bf16 %v5619_v63, %v5619_v63 }
0x1401   : > { %v3971_v55 = vpop.f32.mrf.mxu0 }
0x1402   : > { %4030 = vrot.lane.b32.xlu0 %v5083_v33, %s6129_s6  ;;  %v5081_v26 = vpack.c.bf16 %v3971_v55, %v3971_v55 }
0x1403   : > { %v5620_v57 = vpop.f32.mrf.mxu0 }
0x1404   : > { %v5084_v8 = vpack.c.bf16 %v5620_v57, %v5620_v57 }
0x1405   : > { %v3974_v40 = vpop.f32.mrf.mxu0 }
0x1406   : > { %4026 = vrot.lane.b32.xlu0 %v5081_v26, %s6129_s6  ;;  %4032 = vrot.lane.b32.xlu1 %v5084_v8, %s6129_s6  ;;  %v5082_v43 = vpack.c.bf16 %v3974_v40, %v3974_v40 }
0x1407   : > { %v5623_v39 = vpop.f32.mrf.mxu0 }
0x1408   : > { %v5087_v4 = vpack.c.bf16 %v5623_v39, %v5623_v39 }
0x1409   : > { %v3987_v20 = vpop.f32.mrf.mxu0 }
0x140a   : > { %3336 = vrot.lane.b32.xlu0 %v5071_v14, %s6127_s4  ;;  %4028 = vrot.lane.b32.xlu1 %v5082_v43, %s6129_s6  ;;  %v5085_v48 = vpack.c.bf16 %v3987_v20, %v3987_v20 }
0x140b   : > { %v5624_v11 = vpop.f32.mrf.mxu0 }
0x140c   : > { %v5088_v35 = vpack.c.bf16 %v5624_v11, %v5624_v11 }
0x140d   : > { %v3990_v60 = vpop.f32.mrf.mxu0 }
0x140e   : > { %3683 = vrot.lane.b32.xlu0 %v5077_v47, %s6128_s25  ;;  %3338 = vrot.lane.b32.xlu1 %v5072_v38, %s6127_s4  ;;  %v5086_v31 = vpack.c.bf16 %v3990_v60, %v3990_v60  ;;  %s4807_s4 = sshll.u32 %s701_s27, 6 }
0x1412   : > { %3687 = vrot.lane.b32.xlu0 %v5079_v58, %s6128_s25  ;;  %3685 = vrot.lane.b32.xlu1 %v5078_v37, %s6128_s25 }
0x1416   : > { %3689 = vrot.lane.b32.xlu1 %v5080_v24, %s6128_s25  ;;  %4034 = vrot.lane.b32.xlu0 %v5085_v48, %s6129_s6  ;;  %s7526_s25 = scalar_lea.vmem [#allocation3], %s4807_s4  ;;  %s6131_s4 = smov [#allocation3]  }
0x1417   : > { %s4741_s26 = sshll.u32 %s7526_s25, 4  ;;  %s6058_s24 = sshll.u32 %s6131_s4, 4  ;;  %s7556_s26 = int_to_ptr.vmem [resolvable:$true] %s4741_s26  ;;  %s6059_s24 = int_to_ptr.vmem [resolvable:$false] %s6058_s24 }
0x1418   : > { %s6060_s29 = scalar_lea.vmem %s6059_s24, 2048  ;;  %p6061_p0 = scmp.lt.s32.totalorder %s7556_s26, %s6059_s24 }
0x141a   : > { %4038 = vrot.lane.b32.xlu0 %v5087_v4, %s6129_s6  ;;  %4036 = vrot.lane.b32.xlu1 %v5086_v31, %s6129_s6 }
0x141e   : > { %4040 = vrot.lane.b32.xlu1 %v5088_v35, %s6129_s6  ;;  %s6054_s6 = scalar_lea.vmem %s7556_s26, 1024 }
0x141f   : > { %p6055_p11 = scmp.ne.s32.totalorder %s7556_s26, %s6054_s6  ;;  %p6062_p1 = scmp.lt.s32.totalorder %s6060_s29, %s6054_s6 }
0x1421   : > { %p6056_p12 = pnand %p6055_p11, %p6291_p5  ;;  %p6063_p2 = por %p6062_p1, %p6061_p0 }
0x1423   : > { %p6057_p13 = pneg %p6056_p12 }
0x1425   : > { %p6064_p3 = pnand %p6063_p2, %p6057_p13 }
0x1474   : > { %v4031_v62 = vpop.permute.xlu0 %4030 }
0x1475   : > { %4053 = vst.msk [vmem:[#allocation2 + $0x8] sm:$0xf] %vm4050_vm10, %v4031_v62 }
0x1478   : > { %v4027_v27 = vpop.permute.xlu0 %4026  ;;  %v4033_v51 = vpop.permute.xlu1 %4032 }
0x1479   : > { %4051 = vst.msk [vmem:[#allocation2] sm:$0xf] %vm4050_vm10, %v4027_v27  ;;  %4054 = vst.msk [vmem:[#allocation2 + $0xc] sm:$0xf] %vm4050_vm10, %v4033_v51 }
0x147c   : > { %v3337_v56 = vpop.permute.xlu0 %3336  ;;  %v4029_v22 = vpop.permute.xlu1 %4028 }
0x147d   : > { %3355 = vst.msk [vmem:[#allocation2 + $0x18] sm:$0xf] %vm3348_vm8, %v3337_v56 }
0x147e   : > { %4052 = vst.msk [vmem:[#allocation2 + $0x4] sm:$0xf] %vm4050_vm10, %v4029_v22 }
0x1480   : > { %v3684_v34 = vpop.permute.xlu0 %3683  ;;  %v3339_v54 = vpop.permute.xlu1 %3338  ;;  %v5749_v10 = vld [vmem:[#allocation2 + $0x8] sm:$0xff]  }
0x1481   : > { %3704 = vst.msk [vmem:[#allocation2 + $0x10] sm:$0xf] %vm3699_vm9, %v3684_v34 }
0x1482   : > { %3356 = vst.msk [vmem:[#allocation2 + $0x1c] sm:$0xf] %vm3348_vm8, %v3339_v54 }
0x1484   : > { %v3688_v16 = vpop.permute.xlu0 %3687  ;;  %v3686_v28 = vpop.permute.xlu1 %3685 }
0x1485   : > { %v5748_v7 = vld [vmem:[#allocation2] sm:$0xff]   ;;  %3706 = vst.msk [vmem:[#allocation2 + $0x18] sm:$0xf] %vm3699_vm9, %v3688_v16  ;;  %3705 = vst.msk [vmem:[#allocation2 + $0x14] sm:$0xf] %vm3699_vm9, %v3686_v28 }
0x1486   : > { %5633 = vmatprep.mubr.msk.bf16.mxu0 %vm875_vm0, %v5748_v7 }
0x1487   : > { %5634 = vmatmul.mubr.msk.bf16.vlgmr.msra.gmra.mxu0 %vm875_vm0, %v5749_v10 }
0x1488   : > { %v4035_v12 = vpop.permute.xlu0 %4034  ;;  %v3690_v36 = vpop.permute.xlu1 %3689 }
0x1489   : > { %4055 = vst.msk [vmem:[#allocation2 + $0x10] sm:$0xf] %vm4050_vm10, %v4035_v12 }
0x148a   : > { %3707 = vst.msk [vmem:[#allocation2 + $0x1c] sm:$0xf] %vm3699_vm9, %v3690_v36 }
0x148c   : > { %v4039_v9 = vpop.permute.xlu0 %4038  ;;  %v4037_v21 = vpop.permute.xlu1 %4036 }
0x148d   : > { %4057 = vst.msk [vmem:[#allocation2 + $0x18] sm:$0xf] %vm4050_vm10, %v4039_v9  ;;  %4056 = vst.msk [vmem:[#allocation2 + $0x14] sm:$0xf] %vm4050_vm10, %v4037_v21 }
0x1490   : > { %v4041_v25 = vpop.permute.xlu1 %4040 }
0x1491   : > { %4058 = vst.msk [vmem:[#allocation2 + $0x1c] sm:$0xf] %vm4050_vm10, %v4041_v25 }
0x1494   : > { %v5750_v17 = vld [vmem:[#allocation2 + $0x10] sm:$0xff]  }
0x1495   : > { %5637 = vmatprep.mubr.msk.bf16.mxu0 %vm875_vm0, %v5750_v17 }
0x1498   : > { %v5751_v59 = vld [vmem:[#allocation2 + $0x18] sm:$0xff]  }
0x1499   : > { %5638 = vmatmul.mubr.msk.bf16.gmra.mxu0 %vm875_vm0, %v5751_v59  ;;  %v5754_v59 = vld [vmem:[%s7622_s19 + $0x34] ss:$8 sps:$4 sm:$0xff]  }
0x149a   : > { %4422 = vmatprep.subr.bf16.mxu1 %v5754_v59 }
0x1547   : > { %v5635_v32 = vpop.f32.mrf.mxu0 }
0x1548   : > { %v4181_v61 = vadd.f32 %v5635_v32, %v4975_v23 }
0x1549   : > { %v4172_v13 = vpop.f32.mrf.mxu0 }
0x154a   : > { %v4173_v0 = vadd.f32 %v4975_v23, %v4172_v13  ;;  %v4209_v49 = vsel %vm875_vm0, %v4181_v61, 0.0 }
0x154b   : > { %v5636_v29 = vpop.f32.mrf.mxu0 }
0x154c   : > { %v4203_v1 = vsel %vm875_vm0, %v4173_v0, 0.0  ;;  %v4184_v44 = vadd.f32 %v5636_v29, %v4975_v23  ;;  %v5755_v29 = vld [vmem:[%s7622_s19 + $0x20] ss:$8 sps:$4 sm:$0xff]  }
0x154d   : > { %v4175_v6 = vpop.f32.mrf.mxu0  ;;  %4204 = vadd.xlane.f32.xlu0 %v4203_v1  ;;  %v5758_v1 = vld [vmem:[%s7622_s19 + $0x10] ss:$8 sps:$4 sm:$0xff]  }
0x154e   : > { %v4176_v42 = vadd.f32 %v4975_v23, %v4175_v6  ;;  %v4212_v45 = vsel %vm875_vm0, %v4184_v44, 0.0  ;;  %v5763_v6 = vld [vmem:[%s7622_s19 + $0x4] ss:$8 sps:$4 sm:$0xff]  }
0x1550   : > { %v4206_v5 = vsel %vm875_vm0, %v4176_v42, 0.0 }
0x1551   : > { %4207 = vadd.xlane.f32.xlu1 %v4206_v5  ;;  %4210 = vadd.xlane.f32.xlu0 %v4209_v49  ;;  %v5764_v5 = vld [vmem:[%s7624_s21 + $0x78] sm:$0xff]  }
0x1552   : > { %v5765_v49 = vld [vmem:[%s7624_s21 + $0x38] sm:$0xff]   ;;  %5273 = vmatprep.subr.bf16.mxu0 %v5764_v5 }
0x1553   : > { %5274 = vmatpush3.bf16.msra.mxu0 %v5765_v49 }
0x1555   : > { %4213 = vadd.xlane.f32.xlu0 %v4212_v45  ;;  %v5766_v45 = vld [vmem:[%s7624_s21 + $0x70] sm:$0xff]  }
0x1556   : > { %5275 = vmatprep.subr.bf16.mxu0 %v5766_v45 }
0x1559   : > { %v5639_v15 = vpop.f32.mrf.mxu0 }
0x155a   : > { %v4197_v41 = vadd.f32 %v5639_v15, %v4975_v23  ;;  %v5767_v15 = vld [vmem:[%s7624_s21 + $0x30] sm:$0xff]  }
0x155b   : > { %v4188_v18 = vpop.f32.mrf.mxu0  ;;  %5276 = vmatpush3.bf16.msra.mxu0 %v5767_v15 }
0x155c   : > { %v4189_v3 = vadd.f32 %v4975_v23, %v4188_v18  ;;  %v4221_v55 = vsel %vm875_vm0, %v4197_v41, 0.0  ;;  %v5768_v18 = vld [vmem:[%s7624_s21 + $0x68] sm:$0xff]  }
0x155d   : > { %v5640_v19 = vpop.f32.mrf.mxu0  ;;  %5277 = vmatprep.subr.bf16.mxu0 %v5768_v18 }
0x155e   : > { %v4215_v30 = vsel %vm875_vm0, %v4189_v3, 0.0  ;;  %v4200_v63 = vadd.f32 %v5640_v19, %v4975_v23  ;;  %v5770_v19 = vld [vmem:[%s7624_s21 + $0x60] sm:$0xff]  }
0x155f   : > { %v4191_v52 = vpop.f32.mrf.mxu0  ;;  %4216 = vadd.xlane.f32.xlu0 %v4215_v30  ;;  %v5772_v30 = vld [vmem:[%s7624_s21 + $0x58] sm:$0xff]  }
0x1560   : > { %v4192_v46 = vadd.f32 %v4975_v23, %v4191_v52  ;;  %v4224_v53 = vsel %vm875_vm0, %v4200_v63, 0.0  ;;  %v5752_v23 = vld [vmem:[%s7622_s19 + $0x30] ss:$8 sps:$4 sm:$0xff]  }
0x1561   : > { %4423 = vmatpush1.bf16.msra.mxu1 %v5752_v23  ;;  %v5773_v52 = vld [vmem:[%s7624_s21 + $0x18] sm:$0xff]  }
0x1562   : > { %v4218_v33 = vsel %vm875_vm0, %v4192_v46, 0.0 }
0x1563   : > { %4219 = vadd.xlane.f32.xlu1 %v4218_v33  ;;  %4222 = vadd.xlane.f32.xlu0 %v4221_v55 }
0x1567   : > { %4225 = vadd.xlane.f32.xlu1 %v4224_v53 }
0x15d6   : > { %v4205_v57 = vpop.xlane.xlu0 %4204 }
0x15d7   : > { %v4228_v26 = vmul.f32 0.015625, %v4205_v57 }
0x15d9   : > { %v7356_v8 = vsub.f32 %v4173_v0, %v4228_v26  ;;  %v5757_v0 = vld [vmem:[%s7622_s19 + $0x24] ss:$8 sps:$4 sm:$0xff]  }
0x15da   : > { %v4211_v40 = vpop.xlane.xlu0 %4210  ;;  %v4208_v2 = vpop.xlane.xlu1 %4207  ;;  %4424 = vmatprep.subr.bf16.mxu1 %v5757_v0 }
0x15db   : > { %v4230_v14 = vmul.f32 0.015625, %v4211_v40  ;;  %v4229_v43 = vmul.f32 0.015625, %v4208_v2  ;;  %v4244_v39 = vmul.f32 %v7356_v8, %v7356_v8  ;;  %4425 = vmatpush1.bf16.msra.mxu1 %v5755_v29 }
0x15dd   : > { %v7360_v50 = vsub.f32 %v4181_v61, %v4230_v14  ;;  %v7362_v38 = vsub.f32 %v4176_v42, %v4229_v43  ;;  %v4252_v47 = vsel %vm875_vm0, %v4244_v39, 0.0  ;;  %v5760_v61 = vld [vmem:[%s7622_s19 + $0x14] ss:$8 sps:$4 sm:$0xff]   ;;  %v5761_v42 = vld [vmem:[%s7622_s19] ss:$8 sps:$4 sm:$0xff]  }
0x15de   : > { %v4214_v20 = vpop.xlane.xlu0 %4213  ;;  %4253 = vadd.xlane.f32.xlu0 %v4252_v47  ;;  %4426 = vmatprep.subr.bf16.mxu1 %v5760_v61 }
0x15df   : > { %v4231_v58 = vmul.f32 0.015625, %v4214_v20  ;;  %v4246_v37 = vmul.f32 %v7360_v50, %v7360_v50  ;;  %v4245_v11 = vmul.f32 %v7362_v38, %v7362_v38  ;;  %4427 = vmatpush1.bf16.msra.mxu1 %v5758_v1 }
0x15e0   : > { %4428 = vmatprep.subr.bf16.mxu1 %v5763_v6 }
0x15e1   : > { %v7369_v24 = vsub.f32 %v4184_v44, %v4231_v58  ;;  %v4258_v48 = vsel %vm875_vm0, %v4246_v37, 0.0  ;;  %v4255_v60 = vsel %vm875_vm0, %v4245_v11, 0.0  ;;  %v6130_v44 = vmov 0   ;;  %v4988_v37 = vld [vmem:[%s7620_s17] ss:$0 sm:$0xff] }
0x15e2   : > { %4259 = vadd.xlane.f32.xlu0 %v4258_v48  ;;  %4256 = vadd.xlane.f32.xlu1 %v4255_v60 }
0x15e3   : > { %v4247_v4 = vmul.f32 %v7369_v24, %v7369_v24  ;;  %4429 = vmatpush1.bf16.msra.mxu1 %v5761_v42  ;;  %4446 = vmatprep.mubr.bf16.mxu1 %v6130_v44 }
0x15e5   : > { %v4261_v31 = vsel %vm875_vm0, %v4247_v4, 0.0 }
0x15e6   : > { %4262 = vadd.xlane.f32.xlu1 %v4261_v31 }
0x15e8   : > { %v4217_v35 = vpop.xlane.xlu0 %4216 }
0x15e9   : > { %v4232_v62 = vmul.f32 0.015625, %v4217_v35 }
0x15eb   : > { %v7376_v27 = vsub.f32 %v4189_v3, %v4232_v62  ;;  %v5769_v3 = vld [vmem:[%s7624_s21 + $0x28] sm:$0xff]  }
0x15ec   : > { %v4223_v51 = vpop.xlane.xlu0 %4222  ;;  %v4220_v56 = vpop.xlane.xlu1 %4219  ;;  %5278 = vmatpush3.bf16.msra.mxu0 %v5769_v3 }
0x15ed   : > { %v4234_v22 = vmul.f32 0.015625, %v4223_v51  ;;  %v4233_v34 = vmul.f32 0.015625, %v4220_v56  ;;  %v4248_v54 = vmul.f32 %v7376_v27, %v7376_v27  ;;  %5279 = vmatprep.subr.bf16.mxu0 %v5770_v19 }
0x15ef   : > { %v7380_v16 = vsub.f32 %v4197_v41, %v4234_v22  ;;  %v7382_v28 = vsub.f32 %v4192_v46, %v4233_v34  ;;  %v4264_v7 = vsel %vm875_vm0, %v4248_v54, 0.0  ;;  %v5771_v41 = vld [vmem:[%s7624_s21 + $0x20] sm:$0xff]  }
0x15f0   : > { %4265 = vadd.xlane.f32.xlu0 %v4264_v7  ;;  %v4226_v10 = vpop.xlane.xlu1 %4225  ;;  %5280 = vmatpush3.bf16.msra.mxu0 %v5771_v41 }
0x15f1   : > { %v4235_v12 = vmul.f32 0.015625, %v4226_v10  ;;  %v4250_v36 = vmul.f32 %v7380_v16, %v7380_v16  ;;  %v4249_v9 = vmul.f32 %v7382_v28, %v7382_v28  ;;  %5281 = vmatprep.subr.bf16.mxu0 %v5772_v30 }
0x15f3   : > { %v7389_v21 = vsub.f32 %v4200_v63, %v4235_v12  ;;  %v4270_v25 = vsel %vm875_vm0, %v4250_v36, 0.0  ;;  %v4267_v17 = vsel %vm875_vm0, %v4249_v9, 0.0 }
0x15f4   : > { %4271 = vadd.xlane.f32.xlu0 %v4270_v25  ;;  %4268 = vadd.xlane.f32.xlu1 %v4267_v17 }
0x15f5   : > { %v4251_v32 = vmul.f32 %v7389_v21, %v7389_v21  ;;  %5282 = vmatpush3.bf16.msra.mxu0 %v5773_v52 }
0x15f7   : > { %v4273_v13 = vsel %vm875_vm0, %v4251_v32, 0.0 }
0x15f8   : > { %4274 = vadd.xlane.f32.xlu1 %v4273_v13 }
0x1667   : > { %v4254_v46 = vpop.xlane.xlu0 %4253 }
0x1668   : > { %v4276_v63 = vmul.f32 0.015625, %v4254_v46  ;;  %v5775_v46 = vld [vmem:[%s7624_s21 + $0x10] sm:$0xff]  }
0x166a   : > { %v4284_v33 = vadd.f32 1e-05, %v4276_v63  ;;  %v5777_v63 = vld [vmem:[%s7624_s21 + $0x8] sm:$0xff]  }
0x166b   : > { %v4260_v55 = vpop.xlane.xlu0 %4259  ;;  %v4257_v53 = vpop.xlane.xlu1 %4256 }
0x166c   : > { %6038 = vrsqrt.f32 %v4284_v33  ;;  %v4278_v57 = vmul.f32 0.015625, %v4260_v55  ;;  %v4277_v26 = vmul.f32 0.015625, %v4257_v53  ;;  %v5778_v33 = vld [vmem:[%s7624_s21 + $0x40] sm:$0xff]  }
0x166d   : > { %v5779_v55 = vld [vmem:[%s7624_s21] sm:$0xff]  }
0x166e   : > { %v4285_v40 = vadd.f32 1e-05, %v4277_v26  ;;  %v4286_v2 = vadd.f32 1e-05, %v4278_v57  ;;  %v7699_v53 = vld [vmem:[#allocation12_spill] sm:$0xff] }
0x166f   : > { %v4263_v14 = vpop.xlane.xlu1 %4262  ;;  %v4358_v57 = vsub.s32 1, %v7699_v53  ;;  %v4350_v26 = vld [vmem:[%s7623_s20] sm:$0x3] }
0x1670   : > { %v4279_v43 = vmul.f32 0.015625, %v4263_v14  ;;  %6040 = vrsqrt.f32 %v4285_v40  ;;  %v7700_v14 = vld [vmem:[#allocation13_spill] sm:$0xff] }
0x1671   : > { %6042 = vrsqrt.f32 %v4286_v2  ;;  %v4359_v2 = vrot.slane %v4350_v26, %v4358_v57 }
0x1672   : > { %v4287_v39 = vadd.f32 1e-05, %v4279_v43  ;;  %v4355_v43 = vrot.slane %v4350_v26, %v7700_v14 }
0x1674   : > { %6044 = vrsqrt.f32 %v4287_v39 }
0x1679   : > { %v6039_v47 = vpop.eup %6038  ;;  %v4266_v58 = vpop.xlane.xlu0 %4265 }
0x167a   : > { %v4300_v20 = vmul.f32 %v6039_v47, %v7356_v8  ;;  %v4280_v11 = vmul.f32 0.015625, %v4266_v58  ;;  %v4989_v8 = vld [vmem:[%s7621_s18] ss:$0 sm:$0xff] }
0x167c   : > { %v4288_v48 = vadd.f32 1e-05, %v4280_v11  ;;  %v4315_v4 = vmul.f32 %v4988_v37, %v4300_v20 }
0x167d   : > { %v6041_v60 = vpop.eup %6040  ;;  %v4272_v31 = vpop.xlane.xlu0 %4271 }
0x167e   : > { %v4269_v35 = vpop.xlane.xlu1 %4268  ;;  %v4301_v62 = vmul.f32 %v6041_v60, %v7362_v38  ;;  %6046 = vrsqrt.f32 %v4288_v48  ;;  %v4282_v51 = vmul.f32 0.015625, %v4272_v31  ;;  %v6043_v22 = vpop.eup %6042  ;;  %v7460_v25 = vadd.f32 %v4989_v8, %v4315_v4 }
0x167f   : > { %v4281_v56 = vmul.f32 0.015625, %v4269_v35  ;;  %v4302_v38 = vmul.f32 %v6043_v22, %v7360_v50 }
0x1680   : > { %v4316_v54 = vmul.f32 %v4988_v37, %v4301_v62  ;;  %v4290_v10 = vadd.f32 1e-05, %v4282_v51 }
0x1681   : > { %v6045_v34 = vpop.eup %6044  ;;  %v4289_v7 = vadd.f32 1e-05, %v4281_v56  ;;  %v4317_v13 = vmul.f32 %v4988_v37, %v4302_v38 }
0x1682   : > { %v4275_v12 = vpop.xlane.xlu1 %4274  ;;  %v4303_v36 = vmul.f32 %v6045_v34, %v7369_v24  ;;  %v7462_v17 = vadd.f32 %v4989_v8, %v4316_v54 }
0x1683   : > { %v4283_v9 = vmul.f32 0.015625, %v4275_v12  ;;  %6048 = vrsqrt.f32 %v4289_v7  ;;  %v7471_v0 = vadd.f32 %v4989_v8, %v4317_v13 }
0x1684   : > { %v4338_v32 = vpack.c.bf16 %v7462_v17, %v7460_v25  ;;  %v4318_v23 = vmul.f32 %v4988_v37, %v4303_v36  ;;  %6050 = vrsqrt.f32 %v4290_v10 }
0x1685   : > { %v4291_v59 = vadd.f32 1e-05, %v4283_v9 }
0x1686   : > { %4998 = vmatmul.mubr.msk.bf16.vlgmr.msra.gmra.mxu1 %vm875_vm0, %v4338_v32  ;;  %v7469_v24 = vadd.f32 %v4989_v8, %v4318_v23 }
0x1687   : > { %6052 = vrsqrt.f32 %v4291_v59  ;;  %4456 = vmatprep.mubr.bf16.mxu1 %v6130_v44 }
0x1688   : > { %v4339_v50 = vpack.c.bf16 %v7469_v24, %v7471_v0 }
0x168b   : > { %v6047_v29 = vpop.eup %6046 }
0x168c   : > { %v4304_v61 = vmul.f32 %v6047_v29, %v7376_v27 }
0x168e   : > { %4999 = vmatmul.mubr.msk.bf16.gmra.mxu1 %vm875_vm0, %v4339_v50  ;;  %v4319_v42 = vmul.f32 %v4988_v37, %v4304_v61 }
0x168f   : > { %4466 = vmatprep.mubr.bf16.mxu1 %v6130_v44 }
0x1690   : > { %v6049_v1 = vpop.eup %6048  ;;  %v7480_v18 = vadd.f32 %v4989_v8, %v4319_v42 }
0x1691   : > { %v4305_v6 = vmul.f32 %v6049_v1, %v7382_v28  ;;  %v6051_v5 = vpop.eup %6050 }
0x1692   : > { %v4306_v19 = vmul.f32 %v6051_v5, %v7380_v16  ;;  %v5774_v16 = vld [vmem:[%s7624_s21 + $0x50] sm:$0xff]  }
0x1693   : > { %v4320_v45 = vmul.f32 %v4988_v37, %v4305_v6  ;;  %5283 = vmatprep.subr.bf16.mxu0 %v5774_v16 }
0x1694   : > { %v6053_v49 = vpop.eup %6052  ;;  %v4321_v30 = vmul.f32 %v4988_v37, %v4306_v19  ;;  %5284 = vmatpush3.bf16.msra.mxu0 %v5775_v46 }
0x1695   : > { %v4307_v15 = vmul.f32 %v6053_v49, %v7389_v21  ;;  %v7482_v3 = vadd.f32 %v4989_v8, %v4320_v45 }
0x1696   : > { %v7491_v52 = vadd.f32 %v4989_v8, %v4321_v30 }
0x1697   : > { %v4340_v27 = vpack.c.bf16 %v7482_v3, %v7480_v18  ;;  %v4322_v41 = vmul.f32 %v4988_v37, %v4307_v15 }
0x1699   : > { %5000 = vmatmul.mubr.msk.bf16.gmra.mxu1 %vm875_vm0, %v4340_v27  ;;  %v7489_v28 = vadd.f32 %v4989_v8, %v4322_v41 }
0x169a   : > { %4476 = vmatprep.mubr.bf16.mxu1 %v6130_v44  ;;  %v5776_v44 = vld [vmem:[%s7624_s21 + $0x48] sm:$0xff]  }
0x169b   : > { %v4341_v21 = vpack.c.bf16 %v7489_v28, %v7491_v52  ;;  %5285 = vmatprep.subr.bf16.mxu0 %v5776_v44 }
0x169c   : > { %5286 = vmatpush3.bf16.msra.mxu0 %v5777_v63 }
0x169d   : > { %5287 = vmatprep.subr.bf16.mxu0 %v5778_v33 }
0x16a0   : > { %5288 = vmatpush3.bf16.msra.mxu0 %v5779_v55 }
0x16a1   : > { %5001 = vmatmul.mubr.msk.bf16.gmra.mxu1 %vm875_vm0, %v4341_v21 }
0x1746   : > { %v4448_v40 = vpop.f32.mrf.mxu1 }
0x1747   : > { %v4449_v37 = vadd.f32 %v4448_v40, %v4355_v43 }
0x1748   : > { %v4450_v39 = vpop.f32.mrf.mxu1 }
0x1749   : > { %v4451_v20 = vadd.f32 %v4450_v39, %v4359_v2  ;;  %v4487_v62 = vmax.f32 %v4449_v37, 0.0 }
0x174a   : > { %v4452_v47 = vpop.f32.mrf.mxu1 }
0x174b   : > { %v4453_v58 = vadd.f32 %v4452_v47, %v4355_v43  ;;  %v4488_v31 = vmax.f32 %v4451_v20, 0.0  ;;  %v5002_v20 = vld [vmem:[%s7625_s22] ss:$0 sm:$0xff] }
0x174c   : > { %v4454_v11 = vpop.f32.mrf.mxu1 }
0x174d   : > { %v4455_v48 = vadd.f32 %v4454_v11, %v4359_v2  ;;  %v4489_v60 = vmax.f32 %v4453_v58, 0.0 }
0x174e   : > { %v4458_v4 = vpop.f32.mrf.mxu1 }
0x174f   : > { %v4490_v35 = vmax.f32 %v4455_v48, 0.0  ;;  %v4503_v22 = vpack.c.bf16 %v4489_v60, %v4487_v62  ;;  %v4459_v7 = vadd.f32 %v4458_v4, %v4355_v43 }
0x1750   : > { %v4460_v51 = vpop.f32.mrf.mxu1 }
0x1751   : > { %v4504_v56 = vpack.c.bf16 %v4490_v35, %v4488_v31  ;;  %v4461_v34 = vadd.f32 %v4460_v51, %v4359_v2  ;;  %v4491_v59 = vmax.f32 %v4459_v7, 0.0 }
0x1752   : > { %v4462_v8 = vpop.f32.mrf.mxu1 }
0x1753   : > { %v4463_v54 = vadd.f32 %v4462_v8, %v4355_v43  ;;  %4678 = vmatprep.mubr.bf16.mxu0 %v4504_v56  ;;  %v4492_v9 = vmax.f32 %v4461_v34, 0.0 }
0x1754   : > { %v4464_v10 = vpop.f32.mrf.mxu1  ;;  %4679 = vmatmul.mubr.bf16.vlgmr.msra.gmra.mxu0 %v4503_v22 }
0x1755   : > { %v4465_v12 = vadd.f32 %v4464_v10, %v4359_v2  ;;  %v4493_v36 = vmax.f32 %v4463_v54, 0.0 }
0x1757   : > { %v4494_v38 = vmax.f32 %v4465_v12, 0.0  ;;  %v4505_v13 = vpack.c.bf16 %v4493_v36, %v4491_v59 }
0x1759   : > { %v4506_v32 = vpack.c.bf16 %v4494_v38, %v4492_v9  ;;  %v4468_v23 = vpop.f32.mrf.mxu1 }
0x175a   : > { %v4469_v6 = vadd.f32 %v4468_v23, %v4355_v43 }
0x175b   : > { %v4470_v29 = vpop.f32.mrf.mxu1  ;;  %4686 = vmatprep.mubr.bf16.mxu0 %v4506_v32 }
0x175c   : > { %4687 = vmatmul.mubr.bf16.gmra.mxu0 %v4505_v13  ;;  %v4471_v61 = vadd.f32 %v4470_v29, %v4359_v2  ;;  %v4495_v27 = vmax.f32 %v4469_v6, 0.0 }
0x175d   : > { %v4472_v50 = vpop.f32.mrf.mxu1 }
0x175e   : > { %v4473_v1 = vadd.f32 %v4472_v50, %v4355_v43  ;;  %v4496_v15 = vmax.f32 %v4471_v61, 0.0 }
0x175f   : > { %v4474_v42 = vpop.f32.mrf.mxu1 }
0x1760   : > { %v4475_v5 = vadd.f32 %v4474_v42, %v4359_v2  ;;  %v4497_v49 = vmax.f32 %v4473_v1, 0.0 }
0x1761   : > { %v4478_v45 = vpop.f32.mrf.mxu1 }
0x1762   : > { %v4498_v19 = vmax.f32 %v4475_v5, 0.0  ;;  %v4507_v21 = vpack.c.bf16 %v4497_v49, %v4495_v27  ;;  %v4479_v63 = vadd.f32 %v4478_v45, %v4355_v43 }
0x1763   : > { %v4480_v41 = vpop.f32.mrf.mxu1 }
0x1764   : > { %v4508_v30 = vpack.c.bf16 %v4498_v19, %v4496_v15  ;;  %v4481_v46 = vadd.f32 %v4480_v41, %v4359_v2  ;;  %v4499_v40 = vmax.f32 %v4479_v63, 0.0 }
0x1765   : > { %v4482_v16 = vpop.f32.mrf.mxu1 }
0x1766   : > { %v4483_v44 = vadd.f32 %v4482_v16, %v4355_v43  ;;  %4694 = vmatprep.mubr.bf16.mxu0 %v4508_v30  ;;  %v4500_v57 = vmax.f32 %v4481_v46, 0.0 }
0x1767   : > { %v4484_v33 = vpop.f32.mrf.mxu1  ;;  %4695 = vmatmul.mubr.bf16.gmra.mxu0 %v4507_v21 }
0x1768   : > { %v4485_v55 = vadd.f32 %v4484_v33, %v4359_v2  ;;  %v4501_v53 = vmax.f32 %v4483_v44, 0.0 }
0x176a   : > { %v4502_v26 = vmax.f32 %v4485_v55, 0.0  ;;  %v4509_v39 = vpack.c.bf16 %v4501_v53, %v4499_v40 }
0x176c   : > { %v4510_v14 = vpack.c.bf16 %v4502_v26, %v4500_v57 }
0x176e   : > { %4702 = vmatprep.mubr.bf16.mxu0 %v4510_v14 }
0x176f   : > { %4703 = vmatmul.mubr.bf16.gmra.mxu0 %v4509_v39 }
0x1814   : > { %v5289_v47 = vpop.f32.mrf.mxu0 }
0x1816   : > { %v5290_v58 = vpop.f32.mrf.mxu0 }
0x1817   : > { %v5291_v43 = vadd.f32 %v5290_v58, %v5289_v47 }
0x1818   : > { %v5292_v37 = vpop.f32.mrf.mxu0 }
0x1819   : > { %v4681_v2 = vadd.f32 %v5291_v43, %v5002_v20 }
0x181a   : > { %v5293_v11 = vpop.f32.mrf.mxu0 }
0x181b   : > { %v4711_v48 = vadd.f32 %v4681_v2, %v7460_v25  ;;  %v5294_v60 = vadd.f32 %v5293_v11, %v5292_v37 }
0x181c   : > { %v5295_v4 = vpop.f32.mrf.mxu0 }
0x181d   : > { %4719 = vst.msk [vmem:[%s7526_s25] sm:$0xff] %vm875_vm0, %v4711_v48  ;;  %v4684_v31 = vadd.f32 %v5294_v60, %v5002_v20 }
0x181e   : > { %v5296_v35 = vpop.f32.mrf.mxu0 }
0x181f   : > { %v4712_v62 = vadd.f32 %v4684_v31, %v7462_v17  ;;  %v5297_v51 = vadd.f32 %v5296_v35, %v5295_v4 }
0x1820   : > { %v5298_v56 = vpop.f32.mrf.mxu0 }
0x1821   : > { %4720 = vst.msk [vmem:[%s7526_s25 + $0x8] sm:$0xff] %vm875_vm0, %v4712_v62  ;;  %v4689_v22 = vadd.f32 %v5297_v51, %v5002_v20 }
0x1822   : > { %v5299_v25 = vpop.f32.mrf.mxu0 }
0x1823   : > { %v4713_v8 = vadd.f32 %v4689_v22, %v7471_v0  ;;  %v5300_v34 = vadd.f32 %v5299_v25, %v5298_v56 }
0x1825   : > { %4721 = vst.msk [vmem:[%s7526_s25 + $0x10] sm:$0xff] %vm875_vm0, %v4713_v8  ;;  %v4692_v54 = vadd.f32 %v5300_v34, %v5002_v20 }
0x1827   : > { %v4714_v7 = vadd.f32 %v4692_v54, %v7469_v24  ;;  %v5301_v10 = vpop.f32.mrf.mxu0 }
0x1829   : > { %4722 = vst.msk [vmem:[%s7526_s25 + $0x18] sm:$0xff] %vm875_vm0, %v4714_v7  ;;  %v5302_v17 = vpop.f32.mrf.mxu0 }
0x182a   : > { %v5303_v12 = vadd.f32 %v5302_v17, %v5301_v10 }
0x182b   : > { %v5304_v36 = vpop.f32.mrf.mxu0 }
0x182c   : > { %v4697_v9 = vadd.f32 %v5303_v12, %v5002_v20 }
0x182d   : > { %v5305_v38 = vpop.f32.mrf.mxu0 }
0x182e   : > { %v4715_v59 = vadd.f32 %v4697_v9, %v7480_v18  ;;  %v5306_v0 = vadd.f32 %v5305_v38, %v5304_v36 }
0x182f   : > { %v5307_v32 = vpop.f32.mrf.mxu0 }
0x1830   : > { %4723 = vst.msk [vmem:[%s7526_s25 + $0x20] sm:$0xff] %vm875_vm0, %v4715_v59  ;;  %v4700_v23 = vadd.f32 %v5306_v0, %v5002_v20 }
0x1831   : > { %v5308_v24 = vpop.f32.mrf.mxu0 }
0x1832   : > { %v4716_v13 = vadd.f32 %v4700_v23, %v7482_v3  ;;  %v5309_v29 = vadd.f32 %v5308_v24, %v5307_v32 }
0x1833   : > { %v5310_v50 = vpop.f32.mrf.mxu0 }
0x1834   : > { %4724 = vst.msk [vmem:[%s7526_s25 + $0x28] sm:$0xff] %vm875_vm0, %v4716_v13  ;;  %v4705_v61 = vadd.f32 %v5309_v29, %v5002_v20 }
0x1835   : > { %v5311_v1 = vpop.f32.mrf.mxu0 }
0x1836   : > { %v4717_v18 = vadd.f32 %v4705_v61, %v7491_v52  ;;  %v5312_v6 = vadd.f32 %v5311_v1, %v5310_v50 }
0x1838   : > { %4725 = vst.msk [vmem:[%s7526_s25 + $0x30] sm:$0xff] %vm875_vm0, %v4717_v18  ;;  %v4708_v42 = vadd.f32 %v5312_v6, %v5002_v20 }
0x183a   : > { %v4718_v3 = vadd.f32 %v4708_v42, %v7489_v28 }
0x183c   : > { %4726 = vst.msk [vmem:[%s7526_s25 + $0x38] sm:$0xff] %vm875_vm0, %v4718_v3 }
0x183d   : > { %6067 = shalt.err (!%p6064_p3)
}
0x183e   : > { %s6068_s27 = scalar_lea.hbm %s7553_s23, 1024  ;;  %s6072_s4 = scalar_lea.hbm %s7701_s2, 2048 }
0x183f   : > { %p6069_p4 = scmp.ne.s32.totalorder %s7553_s23, %s6068_s27  ;;  %p6073_p9 = scmp.lt.s32.totalorder %s7553_s23, %s7701_s2 }
0x1840   : > { %p6074_p10 = scmp.lt.s32.totalorder %s6072_s4, %s6068_s27 }
0x1841   : > { %p6070_p7 = pnand %p6069_p4, %p6291_p5 }
0x1842   : > { %p6075_p11 = por %p6074_p10, %p6073_p9 }
0x1843   : > { %p6071_p8 = pneg %p6070_p7 }
0x1845   : > { %p6076_p12 = pnand %p6075_p11, %p6071_p8 }
0x1847   : > { %6079 = shalt.err (!%p6076_p12)
}
0x1848   : > { %s6132_s6 = smov 128   ;;  %s7702_s24 = smov 8  }
0x1849   : > { %5673 = dma.vmem_to_hbm [thread:$0]  (%p6291_p5), %s7556_s26, 1024, %s7553_s23, %s7562_s5, %s6132_s6, %s6132_s6, %s7702_s24  }
0x184a PF: > { %s7703_s29 = sld [smem:[#allocation8_spill]] }
0x184b   : > { %s7704_s25 = sld [smem:[#allocation6_spill]] }
0x1850   : > { %p5679_p13 = scmp.ge.s32.totalorder %s7703_s29, 2 }
0x1851   : > { %s4756_s8 = sand.u32 1, %s7704_s25  }
0x1852   : > { %p5676_p0 = pnand %p5679_p13, %p6295_p6  ;;  %s4757_s0 = scalar_lea.sflag [#allocation4], %s4756_s8 }
0x1854   : > { %p5677_p1 = pneg %p5676_p0 }
0x1856   : > { %6097 = dma.done.wait (%p5677_p1), %s4757_s0, 1024  }
0x1857   : > { %6099 = vsyncadd (%p5677_p1), %s4757_s0, 4294966272  ;;  %s7706_s25 = sld [smem:[#allocation9_spill]]  ;;  %s7709_s4 = smov %s6106_s30 }
0x1858   : > { %s7707_s7 = sld [smem:[#allocation7_spill]] }
0x1859   : > { %s7708_s24 = sld [smem:[#allocation10_spill]] }
0x185d   : > { %p33_p2 = scmp.ge.s32.totalorder %s7706_s25, 4  }
0x185e   : > { %s7710_s30 = smov %s7707_s7 }
0x185f   :  { %35 = sbr.rel (!%p33_p2) target bundleno = 14 (0xe), region = 147 }
0x1864   :  { %4762 = vsyncpa [#allocation4], 1 }
0x1865   :  { %4764 = vsyncpa [#allocation4 + $0x1], 1 }

</bundles_post_ra>
